<compile_context>
chip_gen: v7x
topology: tpu7x:2x2x1
jax: 0.10.0
libtpu: 0.0.40
codegen_flags: <defaults>
</compile_context>

<pallas_src>
import jax
import jax.numpy as jnp
from jax.experimental import pallas as pl
from jax.experimental.pallas import tpu as pltpu

F_IN = 2381
F_PAD = 2560          # 10 * 256 (MXU-pass aligned on v6e/v7x, 128-aligned on v5e)
H1, H2, H3, NCLS = 512, 128, 8, 2
H3_PAD = 128          # pad tiny hidden layer to a full lane width (zeros)
NCLS_PAD = 128        # lane-dense output; padded classes masked via bias=-1e9
EPS = 1e-5
NEG_BIG = -1e9


# --------------------------------- kernel -----------------------------------

def mlp_kernel(x_ref, w1_ref, b1_ref, w2_ref, b2_ref, w3_ref, b3_ref,
               w4_ref, b4_ref, out_ref):
    x = x_ref[...]                                           # (TB, F_PAD) bf16
    # Linear(2381, 512) with BN1 folded in, + Tanh.  bf16 operands, f32 accum.
    h = jnp.tanh(jnp.dot(x, w1_ref[...],
                         preferred_element_type=jnp.float32) + b1_ref[...])
    # Linear(512, 128) + Tanh
    h = jnp.tanh(jnp.dot(h.astype(jnp.bfloat16), w2_ref[...],
                         preferred_element_type=jnp.float32) + b2_ref[...])
    # Linear(128, 8) with BN2 folded in, + Tanh (out padded 8 -> 128, zeros)
    h = jnp.tanh(jnp.dot(h.astype(jnp.bfloat16), w3_ref[...],
                         preferred_element_type=jnp.float32) + b3_ref[...])
    # Linear(8, 2) (classes padded 2 -> 128; padded cols: weight 0, bias -1e9)
    logits = (jnp.dot(h.astype(jnp.bfloat16), w4_ref[...],
                      preferred_element_type=jnp.float32) + b4_ref[...])
    # Softmax over the full 128 lanes; padded classes contribute exactly 0.
    m = jnp.max(logits, axis=1, keepdims=True)
    e = jnp.exp(logits - m)
    inv = 1.0 / jnp.sum(e, axis=1, keepdims=True)            # 1 divide per row
    out_ref[...] = e * inv


def pad_features(x):
    """One-time feature pad (2381 -> 2560) + bf16 cast, outside the hot path."""
    xp = jnp.pad(x.astype(jnp.float32), ((0, 0), (0, F_PAD - F_IN)))
    return xp.astype(jnp.bfloat16)


def lief_mlp_pallas(x_pad, params, *, tb=128):
    """x_pad: (B, F_PAD) bf16 (from pad_features). Returns (B, 2) softmax probs."""
    B = x_pad.shape[0]
    Bp = ((B + tb - 1) // tb) * tb
    if Bp != B:
        x_pad = jnp.pad(x_pad, ((0, Bp - B), (0, 0)))

    (w1, b1, w2, b2, w3, b3, w4, b4) = params

    def full_spec(a):
        # Constant block index -> stays resident in VMEM across grid steps.
        return pl.BlockSpec(a.shape, lambda i: (0, 0))

    grid = (Bp // tb,)
    out = pl.pallas_call(
        mlp_kernel,
        out_shape=jax.ShapeDtypeStruct((Bp, NCLS_PAD), jnp.float32),
        grid_spec=pltpu.PrefetchScalarGridSpec(
            num_scalar_prefetch=0,
            grid=grid,
            in_specs=[pl.BlockSpec((tb, F_PAD), lambda i: (i, 0)),
                      full_spec(w1), full_spec(b1),
                      full_spec(w2), full_spec(b2),
                      full_spec(w3), full_spec(b3),
                      full_spec(w4), full_spec(b4)],
            out_specs=pl.BlockSpec((tb, NCLS_PAD), lambda i: (i, 0)),
        ),
        compiler_params=pltpu.CompilerParams(
            dimension_semantics=("parallel",),
            vmem_limit_bytes=32 << 20),
    )(x_pad, w1, b1, w2, b2, w3, b3, w4, b4)
    return out[:B, :NCLS]


# ----------------------------- parameter setup ------------------------------

def _linear_init(key, fan_in, fan_out):
    """PyTorch-style nn.Linear init; weight stored as (in, out)."""
    kw, kb = jax.random.split(key)
    bound = 1.0 / jnp.sqrt(float(fan_in))
    w = jax.random.uniform(kw, (fan_in, fan_out), jnp.float32, -bound, bound)
    b = jax.random.uniform(kb, (1, fan_out), jnp.float32, -bound, bound)
    return w, b


def _bn_fold(key, n):
    """Eval-mode BatchNorm1d folded to per-feature scale/shift."""
    kg, kb, km, kv = jax.random.split(key, 4)
    gamma = jax.random.uniform(kg, (1, n), jnp.float32, 0.5, 1.5)
    beta = 0.1 * jax.random.normal(kb, (1, n), jnp.float32)
    run_mean = 0.1 * jax.random.normal(km, (1, n), jnp.float32)
    run_var = jax.random.uniform(kv, (1, n), jnp.float32, 0.5, 1.5)
    scale = gamma / jnp.sqrt(run_var + EPS)
    shift = beta - run_mean * scale
    return scale, shift


def make_raw_params(key):
    k = jax.random.split(key, 6)
    bn1s, bn1b = _bn_fold(k[0], F_IN)
    w1, b1 = _linear_init(k[1], F_IN, H1)
    w2, b2 = _linear_init(k[2], H1, H2)
    bn2s, bn2b = _bn_fold(k[3], H2)
    w3, b3 = _linear_init(k[4], H2, H3)
    w4, b4 = _linear_init(k[5], H3, NCLS)
    return (bn1s, bn1b, w1, b1, w2, b2, bn2s, bn2b, w3, b3, w4, b4)


def fold_and_pad_params(raw):
    """Fold BN1->Linear1 and BN2->Linear3 in f32, pad, then cast weights bf16."""
    bn1s, bn1b, w1, b1, w2, b2, bn2s, bn2b, w3, b3, w4, b4 = raw
    # BN(x) @ W + b == x @ (scale.T * W) + (shift @ W + b)
    w1f = bn1s.T * w1
    b1f = bn1b @ w1 + b1
    w3f = bn2s.T * w3
    b3f = bn2b @ w3 + b3

    w1p = jnp.pad(w1f, ((0, F_PAD - F_IN), (0, 0))).astype(jnp.bfloat16)
    w2p = w2.astype(jnp.bfloat16)
    w3p = jnp.pad(w3f, ((0, 0), (0, H3_PAD - H3))).astype(jnp.bfloat16)
    b3p = jnp.pad(b3f, ((0, 0), (0, H3_PAD - H3)))
    w4p = jnp.pad(w4, ((0, H3_PAD - H3), (0, NCLS_PAD - NCLS))).astype(jnp.bfloat16)
    b4p = jnp.concatenate(
        [b4, jnp.full((1, NCLS_PAD - NCLS), NEG_BIG, jnp.float32)], axis=1)
    return (w1p, b1f, w2p, b2, w3p, b3p, w4p, b4p)


# ------------------------------- references ---------------------------------

def reference_forward(x, raw):
    """Pure-f32 reference matching the PyTorch module (eval mode)."""
    bn1s, bn1b, w1, b1, w2, b2, bn2s, bn2b, w3, b3, w4, b4 = raw
    h = x * bn1s + bn1b
    h = jnp.tanh(h @ w1 + b1)
    h = jnp.tanh(h @ w2 + b2)
    h = h * bn2s + bn2b
    h = jnp.tanh(h @ w3 + b3)
    logits = h @ w4 + b4
    return jax.nn.softmax(logits, axis=1)


def reference_bf16(x_pad, padded):
    """Same folded/bf16 math as the kernel, via plain XLA (tight check)."""
    w1, b1, w2, b2, w3, b3, w4, b4 = padded
    h = jnp.tanh(jnp.dot(x_pad.astype(jnp.bfloat16), w1,
                         preferred_element_type=jnp.float32) + b1)
    h = jnp.tanh(jnp.dot(h.astype(jnp.bfloat16), w2,
                         preferred_element_type=jnp.float32) + b2)
    h = jnp.tanh(jnp.dot(h.astype(jnp.bfloat16), w3,
                         preferred_element_type=jnp.float32) + b3)
    logits = jnp.dot(h.astype(jnp.bfloat16), w4,
                     preferred_element_type=jnp.float32) + b4
    return jax.nn.softmax(logits, axis=1)[:, :NCLS]


if __name__ == "__main__":
    key = jax.random.PRNGKey(0)
    kx, kp = jax.random.split(key)
    B, TB = 256, 128                      # 2 grid steps -> megacore-shardable
    x = jax.random.normal(kx, (B, F_IN), jnp.float32)

    raw = make_raw_params(kp)
    padded = fold_and_pad_params(raw)
    x_pad = pad_features(x)               # one-time pad + bf16 cast

    out = lief_mlp_pallas(x_pad, padded, tb=TB)
    out = jax.block_until_ready(out)

    assert out.shape == (B, NCLS)
    # Tight check vs identical bf16/folded math done by XLA.
    ref_tight = reference_bf16(x_pad, padded)
    assert jnp.allclose(out, ref_tight, rtol=1e-3, atol=1e-3), \
        "mismatch vs bf16 reference"
    # Loose check vs the full-f32 unfolded reference (bf16 weight tolerance).
    ref_f32 = reference_forward(x, raw)
    assert jnp.allclose(out, ref_f32, rtol=2e-2, atol=2e-2), \
        "mismatch vs f32 reference"
    assert jnp.allclose(jnp.sum(out, axis=1), 1.0, atol=1e-4)

    print("KERNEL_OK")
</pallas_src>

<mosaic_0001>
module attributes {stable_mosaic.version = 11 : i64} {
  func.func @mlp_kernel(%arg0: i32, %arg1: memref<128x2560xbf16, #tpu.memory_space<vmem>>, %arg2: memref<2560x512xbf16, #tpu.memory_space<vmem>>, %arg3: memref<1x512xf32, #tpu.memory_space<vmem>>, %arg4: memref<512x128xbf16, #tpu.memory_space<vmem>>, %arg5: memref<1x128xf32, #tpu.memory_space<vmem>>, %arg6: memref<128x128xbf16, #tpu.memory_space<vmem>>, %arg7: memref<1x128xf32, #tpu.memory_space<vmem>>, %arg8: memref<128x128xbf16, #tpu.memory_space<vmem>>, %arg9: memref<1x128xf32, #tpu.memory_space<vmem>>, %arg10: memref<128x128xf32, #tpu.memory_space<vmem>>) attributes {dimension_semantics = [#tpu.dimension_semantics<parallel>], iteration_bounds = array<i64: 2>, scalar_prefetch = 0 : i64, scratch_operands = 0 : i64, tpu.core_type = #tpu.core_type<tc>, window_params = [{transform_indices = @transform_0, window_bounds = array<i64: 128, 2560>}, {pipeline_mode = #tpu.pipeline_mode<synchronous>, transform_indices = @transform_1, window_bounds = array<i64: 2560, 512>}, {pipeline_mode = #tpu.pipeline_mode<synchronous>, transform_indices = @transform_2, window_bounds = array<i64: 1, 512>}, {pipeline_mode = #tpu.pipeline_mode<synchronous>, transform_indices = @transform_3, window_bounds = array<i64: 512, 128>}, {pipeline_mode = #tpu.pipeline_mode<synchronous>, transform_indices = @transform_4, window_bounds = array<i64: 1, 128>}, {pipeline_mode = #tpu.pipeline_mode<synchronous>, transform_indices = @transform_5, window_bounds = array<i64: 128, 128>}, {pipeline_mode = #tpu.pipeline_mode<synchronous>, transform_indices = @transform_6, window_bounds = array<i64: 1, 128>}, {pipeline_mode = #tpu.pipeline_mode<synchronous>, transform_indices = @transform_7, window_bounds = array<i64: 128, 128>}, {pipeline_mode = #tpu.pipeline_mode<synchronous>, transform_indices = @transform_8, window_bounds = array<i64: 1, 128>}, {transform_indices = @transform_9, window_bounds = array<i64: 128, 128>}]} {
    %c0 = arith.constant 0 : index
    %c0_0 = arith.constant 0 : index
    %0 = vector.load %arg1[%c0, %c0_0] : memref<128x2560xbf16, #tpu.memory_space<vmem>>, vector<128x2560xbf16>
    %c0_1 = arith.constant 0 : index
    %c0_2 = arith.constant 0 : index
    %1 = vector.load %arg2[%c0_1, %c0_2] : memref<2560x512xbf16, #tpu.memory_space<vmem>>, vector<2560x512xbf16>
    %cst = arith.constant dense<0.000000e+00> : vector<128x512xf32>
    %2 = tpu.matmul %0, %1, %cst {dimension_numbers = #tpu.dot_dimension_numbers<[1], [0], [0], [1], [0, 0, 1, 1], [], []>} : vector<128x2560xbf16>, vector<2560x512xbf16>, vector<128x512xf32> -> vector<128x512xf32>
    %c0_3 = arith.constant 0 : index
    %c0_4 = arith.constant 0 : index
    %3 = vector.load %arg3[%c0_3, %c0_4] : memref<1x512xf32, #tpu.memory_space<vmem>>, vector<1x512xf32>
    %4 = vector.broadcast %3 : vector<1x512xf32> to vector<128x512xf32>
    %5 = arith.addf %2, %4 : vector<128x512xf32>
    %6 = math.tanh %5 : vector<128x512xf32>
    %7 = arith.truncf %6 : vector<128x512xf32> to vector<128x512xbf16>
    %c0_5 = arith.constant 0 : index
    %c0_6 = arith.constant 0 : index
    %8 = vector.load %arg4[%c0_5, %c0_6] : memref<512x128xbf16, #tpu.memory_space<vmem>>, vector<512x128xbf16>
    %cst_7 = arith.constant dense<0.000000e+00> : vector<128x128xf32>
    %9 = tpu.matmul %7, %8, %cst_7 {dimension_numbers = #tpu.dot_dimension_numbers<[1], [0], [0], [1], [0, 0, 1, 1], [], []>} : vector<128x512xbf16>, vector<512x128xbf16>, vector<128x128xf32> -> vector<128x128xf32>
    %c0_8 = arith.constant 0 : index
    %c0_9 = arith.constant 0 : index
    %10 = vector.load %arg5[%c0_8, %c0_9] : memref<1x128xf32, #tpu.memory_space<vmem>>, vector<1x128xf32>
    %11 = vector.broadcast %10 : vector<1x128xf32> to vector<128x128xf32>
    %12 = arith.addf %9, %11 : vector<128x128xf32>
    %13 = math.tanh %12 : vector<128x128xf32>
    %14 = arith.truncf %13 : vector<128x128xf32> to vector<128x128xbf16>
    %c0_10 = arith.constant 0 : index
    %c0_11 = arith.constant 0 : index
    %15 = vector.load %arg6[%c0_10, %c0_11] : memref<128x128xbf16, #tpu.memory_space<vmem>>, vector<128x128xbf16>
    %cst_12 = arith.constant dense<0.000000e+00> : vector<128x128xf32>
    %16 = tpu.matmul %14, %15, %cst_12 {dimension_numbers = #tpu.dot_dimension_numbers<[1], [0], [0], [1], [0, 0, 1, 1], [], []>} : vector<128x128xbf16>, vector<128x128xbf16>, vector<128x128xf32> -> vector<128x128xf32>
    %c0_13 = arith.constant 0 : index
    %c0_14 = arith.constant 0 : index
    %17 = vector.load %arg7[%c0_13, %c0_14] : memref<1x128xf32, #tpu.memory_space<vmem>>, vector<1x128xf32>
    %18 = vector.broadcast %17 : vector<1x128xf32> to vector<128x128xf32>
    %19 = arith.addf %16, %18 : vector<128x128xf32>
    %20 = math.tanh %19 : vector<128x128xf32>
    %21 = arith.truncf %20 : vector<128x128xf32> to vector<128x128xbf16>
    %c0_15 = arith.constant 0 : index
    %c0_16 = arith.constant 0 : index
    %22 = vector.load %arg8[%c0_15, %c0_16] : memref<128x128xbf16, #tpu.memory_space<vmem>>, vector<128x128xbf16>
    %cst_17 = arith.constant dense<0.000000e+00> : vector<128x128xf32>
    %23 = tpu.matmul %21, %22, %cst_17 {dimension_numbers = #tpu.dot_dimension_numbers<[1], [0], [0], [1], [0, 0, 1, 1], [], []>} : vector<128x128xbf16>, vector<128x128xbf16>, vector<128x128xf32> -> vector<128x128xf32>
    %c0_18 = arith.constant 0 : index
    %c0_19 = arith.constant 0 : index
    %24 = vector.load %arg9[%c0_18, %c0_19] : memref<1x128xf32, #tpu.memory_space<vmem>>, vector<1x128xf32>
    %25 = vector.broadcast %24 : vector<1x128xf32> to vector<128x128xf32>
    %26 = arith.addf %23, %25 : vector<128x128xf32>
    %cst_20 = arith.constant dense<0xFF800000> : vector<128xf32>
    %27 = vector.multi_reduction <maximumf>, %26, %cst_20 [1] : vector<128x128xf32> to vector<128xf32>
    %28 = vector.shape_cast %27 : vector<128xf32> to vector<128x1xf32>
    %29 = vector.broadcast %28 : vector<128x1xf32> to vector<128x128xf32>
    %30 = arith.subf %26, %29 : vector<128x128xf32>
    %31 = math.exp %30 : vector<128x128xf32>
    %cst_21 = arith.constant dense<0.000000e+00> : vector<128xf32>
    %32 = vector.multi_reduction <add>, %31, %cst_21 [1] : vector<128x128xf32> to vector<128xf32>
    %33 = vector.shape_cast %32 : vector<128xf32> to vector<128x1xf32>
    %cst_22 = arith.constant 1.000000e+00 : f32
    %34 = vector.broadcast %cst_22 : f32 to vector<128x1xf32>
    %35 = arith.divf %34, %33 : vector<128x1xf32>
    %36 = vector.broadcast %35 : vector<128x1xf32> to vector<128x128xf32>
    %37 = arith.mulf %31, %36 : vector<128x128xf32>
    %c0_23 = arith.constant 0 : index
    %c0_24 = arith.constant 0 : index
    %38 = vector.load %arg10[%c0_23, %c0_24] : memref<128x128xf32, #tpu.memory_space<vmem>>, vector<128x128xf32>
    tpu.vector_store %arg10[%c0_23, %c0_24], %37 {strides = array<i32>} : memref<128x128xf32, #tpu.memory_space<vmem>>, vector<128x128xf32>,
    return
  }
  func.func @transform_0(%arg0: i32) -> (i32, i32) {
    %c0_i32 = arith.constant 0 : i32
    %c0_i32_0 = arith.constant 0 : i32
    return %arg0, %c0_i32 : i32, i32
  }
  func.func @transform_1(%arg0: i32) -> (i32, i32) {
    %c0_i32 = arith.constant 0 : i32
    %c0_i32_0 = arith.constant 0 : i32
    %c0_i32_1 = arith.constant 0 : i32
    return %c0_i32, %c0_i32_0 : i32, i32
  }
  func.func @transform_2(%arg0: i32) -> (i32, i32) {
    %c0_i32 = arith.constant 0 : i32
    %c0_i32_0 = arith.constant 0 : i32
    %c0_i32_1 = arith.constant 0 : i32
    return %c0_i32, %c0_i32_0 : i32, i32
  }
  func.func @transform_3(%arg0: i32) -> (i32, i32) {
    %c0_i32 = arith.constant 0 : i32
    %c0_i32_0 = arith.constant 0 : i32
    %c0_i32_1 = arith.constant 0 : i32
    return %c0_i32, %c0_i32_0 : i32, i32
  }
  func.func @transform_4(%arg0: i32) -> (i32, i32) {
    %c0_i32 = arith.constant 0 : i32
    %c0_i32_0 = arith.constant 0 : i32
    %c0_i32_1 = arith.constant 0 : i32
    return %c0_i32, %c0_i32_0 : i32, i32
  }
  func.func @transform_5(%arg0: i32) -> (i32, i32) {
    %c0_i32 = arith.constant 0 : i32
    %c0_i32_0 = arith.constant 0 : i32
    %c0_i32_1 = arith.constant 0 : i32
    return %c0_i32, %c0_i32_0 : i32, i32
  }
  func.func @transform_6(%arg0: i32) -> (i32, i32) {
    %c0_i32 = arith.constant 0 : i32
    %c0_i32_0 = arith.constant 0 : i32
    %c0_i32_1 = arith.constant 0 : i32
    return %c0_i32, %c0_i32_0 : i32, i32
  }
  func.func @transform_7(%arg0: i32) -> (i32, i32) {
    %c0_i32 = arith.constant 0 : i32
    %c0_i32_0 = arith.constant 0 : i32
    %c0_i32_1 = arith.constant 0 : i32
    return %c0_i32, %c0_i32_0 : i32, i32
  }
  func.func @transform_8(%arg0: i32) -> (i32, i32) {
    %c0_i32 = arith.constant 0 : i32
    %c0_i32_0 = arith.constant 0 : i32
    %c0_i32_1 = arith.constant 0 : i32
    return %c0_i32, %c0_i32_0 : i32, i32
  }
  func.func @transform_9(%arg0: i32) -> (i32, i32) {
    %c0_i32 = arith.constant 0 : i32
    %c0_i32_0 = arith.constant 0 : i32
    return %arg0, %c0_i32 : i32, i32
  }
}

</mosaic_0001>

<bundles_post_ra>
// kernel: tpu_custom_call.1
= control target key start
LH: loop header
LB: loop body
LE: loop exit
PB: predicated region body
PF: predicated region fallthrough
CT: control target
= control target key end

     0   :  { %s13376_s0 = inlined_call_operand.hbm [shape: bf16[256,2560], index: 0, kind: input, shape index: {}]   ;;  %s13377_s1 = inlined_call_operand.hbm [shape: bf16[2560,512], index: 1, kind: input, shape index: {}]   ;;  %s13378_s2 = inlined_call_operand.hbm [shape: f32[1,512], index: 2, kind: input, shape index: {}]   ;;  %s13379_s3 = inlined_call_operand.hbm [shape: bf16[512,128], index: 3, kind: input, shape index: {}]   ;;  %s13380_s4 = inlined_call_operand.hbm [shape: f32[1,128], index: 4, kind: input, shape index: {}]   ;;  %s13381_s5 = inlined_call_operand.hbm [shape: bf16[128,128], index: 5, kind: input, shape index: {}]   ;;  %s13382_s6 = inlined_call_operand.hbm [shape: f32[1,128], index: 6, kind: input, shape index: {}]   ;;  %s13383_s7 = inlined_call_operand.hbm [shape: bf16[128,128], index: 7, kind: input, shape index: {}]   ;;  %s13384_s8 = inlined_call_operand.hbm [shape: f32[1,128], index: 8, kind: input, shape index: {}]   ;;  %s13385_s9 = inlined_call_operand.hbm [shape: f32[256,128], index: 9, kind: output, shape index: {}]  }
   0x1   :  { %13390 = sst [smem:[#allocation24_spill]] %s13377_s1 }
   0x2   :  { %13391 = sst [smem:[#allocation25_spill]] %s13378_s2 }
   0x3   :  { %13392 = sst [smem:[#allocation26_spill]] %s13385_s9 }
   0x4   :  { %14 = vsyncpa [#allocation3], 0 }
   0x5   :  { %16 = vsyncpa [#allocation3 + $0x1], 0 }
   0x6   :  { %17 = vsyncpa [#allocation6], 0 }
   0x7   :  { %18 = vsyncpa [#allocation9], 0 }
   0x8   :  { %19 = vsyncpa [#allocation12], 0 }
   0x9   :  { %20 = vsyncpa [#allocation15], 0 }
   0xa   :  { %21 = vsyncpa [#allocation4], 0 }
   0xb   :  { %23 = vsyncpa [#allocation4 + $0x1], 0  ;;  %s12614_s30 = smov 0   ;;  %s12616_s10 = smov 0  }
   0xc   :  { %s12618_s11 = smov 0   ;;  %s12620_s12 = smov 0  }
   0xd LB: > { %s12546_s13 = smov [#allocation5]   ;;  %s12635_s15 = sadd.s32 4294967295, %s12544_s12   ;;  %s12544_s12 = sphi %s12620_s12, %s13419_s12   ;;  %s12540_s11 = sphi %s12618_s11, %s13418_s11   ;;  %s12536_s10 = sphi %s12616_s10, %s13417_s10   ;;  %s12532_s30 = sphi %s12614_s30, %s13416_s30  }
   0xe   : > { %s266_s14 = sshll.u32 %s12546_s13, 4  ;;  %p8822_p0 = scmp.ge.s32.totalorder %s12544_s12, 1  ;;  %s12640_s14 = int_to_ptr.vmem [resolvable:$true] %s266_s14 }
   0xf   : > { %p13387_p1 = scmp.eq.s32.totalorder %s12635_s15, 0  ;;  %p254_p2 = scmp.lt.s32.totalorder %s12544_s12, 3 }
  0x10   : > { %s12547_s17 = smov [#allocation8]   ;;  %s12548_s20 = smov [#allocation11]  }
  0x11   : > { %p12642_p3 = pnand %p8822_p0, %p254_p2  ;;  %s290_s18 = sshll.u32 %s12547_s17, 4  ;;  %s12655_s18 = int_to_ptr.vmem [resolvable:$true] %s290_s18 }
  0x12   : > { %s12657_s21 = sshll.u32 %s12548_s20, 4  ;;  %s13395_s1 = sld [smem:[#allocation24_spill]]  ;;  %s315_s21 = int_to_ptr.vmem [resolvable:$true] %s12657_s21 }
  0x13   : > { %s13393_s16 = scalar_select %p12642_p3, 1, 0 }
  0x14   : > { %p10605_p5 = pneg %p12642_p3 }
  0x16   : > { %p12651_p6 = pnand %p10605_p5, %p13387_p1 }
  0x18   : > { %s12208_s24 = scalar_lea.hbm %s13395_s1, 81920  ;;  %p12667_p8 = pneg %p12651_p6 }
  0x19   : > { %p12209_p7 = scmp.ne.s32.totalorder %s13395_s1, %s12208_s24  ;;  %p12215_p11 = scmp.lt.u32.totalorder %s12208_s24, %s13395_s1 }
  0x1b   : > { %p12211_p9 = pnand %p12667_p8, %p12209_p7 }
  0x1d   : > { %p12212_p10 = pneg %p12211_p9 }
  0x1f   : > { %p12217_p12 = pnand %p12215_p11, %p12212_p10 }
  0x21   : > { %12220 = shalt.err (!%p12217_p12)
}
  0x22   : > { %s12221_s13 = scalar_lea.vmem %s12640_s14, 81920  ;;  %p12229_p5 = scmp.lt.s32.totalorder %s12640_s14, %s12640_s14 }
  0x23   : > { %p12222_p13 = scmp.ne.s32.totalorder %s12640_s14, %s12221_s13  ;;  %p12230_p4 = scmp.lt.s32.totalorder %s12221_s13, %s12221_s13 }
  0x25   : > { %p12224_p0 = pnand %p12222_p13, %p12667_p8  ;;  %p12231_p7 = por %p12230_p4, %p12229_p5 }
  0x27   : > { %p12225_p2 = pneg %p12224_p0 }
  0x29   : > { %p12232_p9 = pnand %p12231_p7, %p12225_p2 }
  0x2b   : > { %12235 = shalt.err (!%p12232_p9)
}
  0x2c   : > { %s12549_s17 = smov 256   ;;  %s12550_s20 = smov 16  }
  0x2d   : > { %10608 = dma.hbm_to_vmem [thread:$0]  (!%p12651_p6), %s13395_s1, 81920, %s12640_s14, [#allocation6], %s12549_s17, %s12549_s17, %s12550_s20  }
  0x2e   : > { %s12236_s26 = scalar_lea.hbm %s13379_s3, 4096 }
  0x2f   : > { %p12237_p4 = scmp.ne.s32.totalorder %s13379_s3, %s12236_s26  ;;  %p12243_p12 = scmp.lt.u32.totalorder %s12236_s26, %s13379_s3 }
  0x31   : > { %p12239_p10 = pnand %p12237_p4, %p12667_p8 }
  0x33   : > { %p12240_p11 = pneg %p12239_p10 }
  0x35   : > { %p12245_p13 = pnand %p12243_p12, %p12240_p11 }
  0x37   : > { %12248 = shalt.err (!%p12245_p13)
}
  0x38   : > { %s12249_s14 = scalar_lea.vmem %s12655_s18, 4096  ;;  %p12257_p7 = scmp.lt.s32.totalorder %s12655_s18, %s12655_s18 }
  0x39   : > { %p12250_p0 = scmp.ne.s32.totalorder %s12655_s18, %s12249_s14  ;;  %p12258_p9 = scmp.lt.s32.totalorder %s12249_s14, %s12249_s14 }
  0x3b   : > { %p12252_p2 = pnand %p12250_p0, %p12667_p8  ;;  %p12259_p4 = por %p12258_p9, %p12257_p7 }
  0x3d   : > { %p12253_p5 = pneg %p12252_p2 }
  0x3f   : > { %p12260_p10 = pnand %p12259_p4, %p12253_p5 }
  0x41   : > { %12263 = shalt.err (!%p12260_p10)
}
  0x42   : > { %s12551_s17 = smov 64   ;;  %s12552_s9 = smov 4  }
  0x43   : > { %10614 = dma.hbm_to_vmem [thread:$0]  (!%p12651_p6), %s13379_s3, 4096, %s12655_s18, [#allocation9], %s12551_s17, %s12551_s17, %s12552_s9  }
  0x44   : > { %s12264_s25 = scalar_lea.hbm %s13381_s5, 1024 }
  0x45   : > { %p12265_p11 = scmp.ne.s32.totalorder %s13381_s5, %s12264_s25  ;;  %p12271_p0 = scmp.lt.u32.totalorder %s12264_s25, %s13381_s5 }
  0x47   : > { %p12267_p12 = pnand %p12265_p11, %p12667_p8 }
  0x49   : > { %p12268_p13 = pneg %p12267_p12 }
  0x4b   : > { %p12273_p2 = pnand %p12271_p0, %p12268_p13 }
  0x4d   : > { %12276 = shalt.err (!%p12273_p2)
}
  0x4e   : > { %s12277_s14 = scalar_lea.vmem %s315_s21, 1024  ;;  %p12285_p4 = scmp.lt.s32.totalorder %s315_s21, %s315_s21 }
  0x4f   : > { %p12278_p5 = scmp.ne.s32.totalorder %s315_s21, %s12277_s14  ;;  %p12286_p10 = scmp.lt.s32.totalorder %s12277_s14, %s12277_s14 }
  0x51   : > { %p12280_p7 = pnand %p12278_p5, %p12667_p8  ;;  %p12287_p1 = por %p12286_p10, %p12285_p4 }
  0x53   : > { %p12281_p9 = pneg %p12280_p7 }
  0x55   : > { %p12288_p3 = pnand %p12287_p1, %p12281_p9 }
  0x57   : > { %12291 = shalt.err (!%p12288_p3)
}
  0x58   : > { %10620 = dma.hbm_to_vmem [thread:$0]  (!%p12651_p6), %s13381_s5, 1024, %s315_s21, [#allocation12], %s12551_s17, %s12551_s17, %s12552_s9  }
  0x59   : > { %s12553_s22 = smov [#allocation14]   ;;  %s12554_s24 = smov [#allocation7]  }
  0x5a   : > { %s338_s23 = sshll.u32 %s12553_s22, 4  ;;  %s280_s25 = sshll.u32 %s12554_s24, 4  ;;  %s339_s23 = int_to_ptr.vmem [resolvable:$true] %s338_s23  ;;  %s281_s25 = int_to_ptr.vmem [resolvable:$true] %s280_s25 }
  0x5b   : > { %s12292_s29 = scalar_lea.hbm %s13383_s7, 1024 }
  0x5c   : > { %p12293_p1 = scmp.ne.s32.totalorder %s13383_s7, %s12292_s29  ;;  %p12299_p12 = scmp.lt.u32.totalorder %s12292_s29, %s13383_s7 }
  0x5e   : > { %p12295_p3 = pnand %p12293_p1, %p12667_p8 }
  0x60   : > { %p12296_p11 = pneg %p12295_p3 }
  0x62   : > { %p12301_p13 = pnand %p12299_p12, %p12296_p11 }
  0x64   : > { %12304 = shalt.err (!%p12301_p13)
}
  0x65   : > { %s12305_s21 = scalar_lea.vmem %s339_s23, 1024  ;;  %p12313_p7 = scmp.lt.s32.totalorder %s339_s23, %s339_s23 }
  0x66   : > { %p12306_p0 = scmp.ne.s32.totalorder %s339_s23, %s12305_s21  ;;  %p12314_p9 = scmp.lt.s32.totalorder %s12305_s21, %s12305_s21 }
  0x68   : > { %p12308_p2 = pnand %p12306_p0, %p12667_p8  ;;  %p12315_p4 = por %p12314_p9, %p12313_p7 }
  0x6a   : > { %p12309_p5 = pneg %p12308_p2 }
  0x6c   : > { %p12316_p10 = pnand %p12315_p4, %p12309_p5 }
  0x6e   : > { %12319 = shalt.err (!%p12316_p10)
}
  0x6f   : > { %10626 = dma.hbm_to_vmem [thread:$0]  (!%p12651_p6), %s13383_s7, 1024, %s339_s23, [#allocation15], %s12551_s17, %s12551_s17, %s12552_s9  }
  0x70   : > { %s13397_s2 = sld [smem:[#allocation25_spill]] }
  0x76   : > { %s12320_s26 = scalar_lea.hbm %s13397_s2, 64 }
  0x77   : > { %p12321_p1 = scmp.ne.s32.totalorder %s13397_s2, %s12320_s26  ;;  %p12327_p12 = scmp.lt.u32.totalorder %s12320_s26, %s13397_s2 }
  0x79   : > { %p12323_p3 = pnand %p12321_p1, %p12667_p8 }
  0x7b   : > { %p12324_p11 = pneg %p12323_p3 }
  0x7d   : > { %p12329_p13 = pnand %p12327_p12, %p12324_p11 }
  0x7f   : > { %12332 = shalt.err (!%p12329_p13)
}
  0x80   : > { %s12333_s18 = scalar_lea.vmem %s281_s25, 64  ;;  %p12341_p7 = scmp.lt.s32.totalorder %s281_s25, %s281_s25 }
  0x81   : > { %p12334_p0 = scmp.ne.s32.totalorder %s281_s25, %s12333_s18  ;;  %p12342_p9 = scmp.lt.s32.totalorder %s12333_s18, %s12333_s18 }
  0x83   : > { %p12336_p2 = pnand %p12334_p0, %p12667_p8  ;;  %p12343_p4 = por %p12342_p9, %p12341_p7 }
  0x85   : > { %p12337_p5 = pneg %p12336_p2 }
  0x87   : > { %p12344_p10 = pnand %p12343_p4, %p12337_p5 }
  0x89   : > { %12347 = shalt.err (!%p12344_p10)
}
  0x8a   : > { %10611 = dma.hbm_to_vmem [thread:$0]  (!%p12651_p6), %s13397_s2, 64, %s281_s25, [#allocation6]  }
  0x8b   : > { %s12555_s23 = smov [#allocation10]   ;;  %s12556_s1 = smov [#allocation13]  }
  0x8c   : > { %s304_s21 = sshll.u32 %s12555_s23, 4  ;;  %s328_s20 = sshll.u32 %s12556_s1, 4  ;;  %s305_s21 = int_to_ptr.vmem [resolvable:$true] %s304_s21  ;;  %s329_s20 = int_to_ptr.vmem [resolvable:$true] %s328_s20 }
  0x8d   : > { %s12348_s26 = scalar_lea.hbm %s13380_s4, 16 }
  0x8e   : > { %p12349_p1 = scmp.ne.s32.totalorder %s13380_s4, %s12348_s26  ;;  %p12355_p12 = scmp.lt.u32.totalorder %s12348_s26, %s13380_s4 }
  0x90   : > { %p12351_p3 = pnand %p12349_p1, %p12667_p8 }
  0x92   : > { %p12352_p11 = pneg %p12351_p3 }
  0x94   : > { %p12357_p13 = pnand %p12355_p12, %p12352_p11 }
  0x96   : > { %12360 = shalt.err (!%p12357_p13)
}
  0x97   : > { %s12361_s25 = scalar_lea.vmem %s305_s21, 16  ;;  %s12368_s18 = scalar_lea.vmem %s305_s21, 32 }
  0x98   : > { %p12362_p0 = scmp.ne.s32.totalorder %s305_s21, %s12361_s25  ;;  %p12369_p7 = scmp.lt.s32.totalorder %s305_s21, %s305_s21 }
  0x99   : > { %p12370_p9 = scmp.lt.s32.totalorder %s12368_s18, %s12361_s25 }
  0x9a   : > { %p12364_p2 = pnand %p12362_p0, %p12667_p8 }
  0x9b   : > { %p12371_p4 = por %p12370_p9, %p12369_p7 }
  0x9c   : > { %p12365_p5 = pneg %p12364_p2 }
  0x9e   : > { %p12372_p10 = pnand %p12371_p4, %p12365_p5 }
  0xa0   : > { %12375 = shalt.err (!%p12372_p10)
}
  0xa1   : > { %10617 = dma.hbm_to_vmem [thread:$0]  (!%p12651_p6), %s13380_s4, 16, %s305_s21, [#allocation9]  }
  0xa2   : > { %s12376_s22 = scalar_lea.hbm %s13382_s6, 16 }
  0xa3   : > { %p12377_p1 = scmp.ne.s32.totalorder %s13382_s6, %s12376_s22  ;;  %p12383_p12 = scmp.lt.u32.totalorder %s12376_s22, %s13382_s6 }
  0xa5   : > { %p12379_p3 = pnand %p12377_p1, %p12667_p8 }
  0xa7   : > { %p12380_p11 = pneg %p12379_p3 }
  0xa9   : > { %p12385_p13 = pnand %p12383_p12, %p12380_p11 }
  0xab   : > { %12388 = shalt.err (!%p12385_p13)
}
  0xac   : > { %s12389_s13 = scalar_lea.vmem %s329_s20, 16  ;;  %s12396_s21 = scalar_lea.vmem %s329_s20, 32 }
  0xad   : > { %p12390_p0 = scmp.ne.s32.totalorder %s329_s20, %s12389_s13  ;;  %p12397_p7 = scmp.lt.s32.totalorder %s329_s20, %s329_s20 }
  0xae   : > { %p12398_p9 = scmp.lt.s32.totalorder %s12396_s21, %s12389_s13 }
  0xaf   : > { %p12392_p2 = pnand %p12390_p0, %p12667_p8 }
  0xb0   : > { %p12399_p4 = por %p12398_p9, %p12397_p7 }
  0xb1   : > { %p12393_p5 = pneg %p12392_p2 }
  0xb3   : > { %p12400_p10 = pnand %p12399_p4, %p12393_p5 }
  0xb5   : > { %12403 = shalt.err (!%p12400_p10)
}
  0xb6   : > { %10623 = dma.hbm_to_vmem [thread:$0]  (!%p12651_p6), %s13382_s6, 16, %s329_s20, [#allocation12]  }
  0xb7   : > { %s12557_s18 = smov [#allocation16]   ;;  %s12404_s1 = scalar_lea.hbm %s13384_s8, 16 }
  0xb8   : > { %s352_s17 = sshll.u32 %s12557_s18, 4  ;;  %p12405_p1 = scmp.ne.s32.totalorder %s13384_s8, %s12404_s1  ;;  %s353_s17 = int_to_ptr.vmem [resolvable:$true] %s352_s17 }
  0xb9   : > { %p12411_p12 = scmp.lt.u32.totalorder %s12404_s1, %s13384_s8 }
  0xba   : > { %p12407_p3 = pnand %p12405_p1, %p12667_p8 }
  0xbc   : > { %p12408_p11 = pneg %p12407_p3 }
  0xbe   : > { %p12413_p13 = pnand %p12411_p12, %p12408_p11 }
  0xc0   : > { %12416 = shalt.err (!%p12413_p13)
}
  0xc1   : > { %s12417_s20 = scalar_lea.vmem %s353_s17, 16  ;;  %s12424_s29 = scalar_lea.vmem %s353_s17, 32 }
  0xc2   : > { %p12418_p0 = scmp.ne.s32.totalorder %s353_s17, %s12417_s20  ;;  %p12425_p7 = scmp.lt.s32.totalorder %s353_s17, %s353_s17 }
  0xc3   : > { %p12426_p9 = scmp.lt.s32.totalorder %s12424_s29, %s12417_s20 }
  0xc4   : > { %p12420_p2 = pnand %p12418_p0, %p12667_p8 }
  0xc5   : > { %p12427_p4 = por %p12426_p9, %p12425_p7 }
  0xc6   : > { %p12421_p5 = pneg %p12420_p2 }
  0xc8   : > { %p12428_p10 = pnand %p12427_p4, %p12421_p5 }
  0xca   : > { %12431 = shalt.err (!%p12428_p10)
}
  0xcb   : > { %10629 = dma.hbm_to_vmem [thread:$0]  (!%p12651_p6), %s13384_s8, 16, %s353_s17, [#allocation15]  }
  0xcc   : > { %s8821_s27 = sadd.s32 4294967294, %s12544_s12   ;;  %s12831_s19 = sadd.s32 1, %s12544_s12  }
  0xcd   : > { %s33_s14 = ssub.s32 %s12544_s12, %s12831_s19  ;;  %s36_s25 = sadd.s32 1, %s12540_s11 }
  0xce   : > { %p34_p8 = scmp.eq.s32.totalorder %s33_s14, 0  ;;  %p43_p1 = scmp.ne.s32.totalorder %s12540_s11, %s12536_s10 }
  0xcf   : > { %p44_p3 = scmp.eq.s32.totalorder %s12544_s12, 0  ;;  %p49_p11 = scmp.ne.s32.totalorder %s12536_s10, %s12532_s30 }
  0xd0   : > { %s12842_s18 = scalar_select %p34_p8, %s12540_s11, %s36_s25  }
  0xd1   : > { %p45_p12 = por %p44_p3, %p43_p1  ;;  %p13398_p13 = scmp.eq.s32.totalorder %s12635_s15, 0 }
  0xd2   : > { %p241_p6 = scmp.eq.s32.totalorder %s12635_s15, 1  ;;  %p247_p2 = scmp.eq.s32.totalorder %s8821_s27, 1 }
  0xd3   : > { %p12846_p0 = por %p13398_p13, %p49_p11  ;;  %p10646_p5 = scmp.lt.s32.totalorder %s12544_s12, 2 }
  0xd4   : > { %s363_s17 = sand.u32 1, %s12540_s11   ;;  %p12853_p7 = por %p241_p6, %p43_p1 }
  0xd5   : > { %p12857_p9 = por %p247_p2, %p49_p11  ;;  %s10566_s22 = smul.u32 1280, %s363_s17 }
  0xd6   : > { %s13400_s23 = scalar_select %p12853_p7, 1, 0 }
  0xd7   : > { %s13401_s1 = scalar_select %p12857_p9, 1, 0 }
  0xd8   : > { %s10567_s24 = smul.u32 20480, %s12544_s12  ;;  %p12862_p4 = pnand %p10646_p5, %p45_p12 }
  0xd9   : > { %s367_s13 = scalar_lea.vmem [#allocation2], %s10566_s22  ;;  %s12873_s27 = scalar_lea.sflag [#allocation3], %s363_s17 }
  0xda   : > { %s12869_s29 = scalar_lea.hbm %s13376_s0, %s10567_s24  ;;  %s375_s21 = sshll.u32 %s367_s13, 4  ;;  %s12871_s21 = int_to_ptr.vmem [resolvable:$true] %s375_s21 }
  0xdb   : > { %s12432_s14 = scalar_lea.hbm %s12869_s29, 20480  ;;  %p12434_p8 = pneg %p12862_p4 }
  0xdc   : > { %p12433_p10 = scmp.ne.s32.totalorder %s12869_s29, %s12432_s14  ;;  %s12437_s28 = scalar_lea.hbm %s13376_s0, 40960 }
  0xdd   : > { %p12438_p11 = scmp.lt.u32.totalorder %s12869_s29, %s13376_s0  ;;  %p12439_p12 = scmp.lt.u32.totalorder %s12437_s28, %s12432_s14 }
  0xde   : > { %p12435_p1 = pnand %p12434_p8, %p12433_p10  ;;  %p12441_p6 = scmp.lt.u32.totalorder %s12432_s14, %s12869_s29 }
  0xdf   : > { %p12440_p13 = por %p12439_p12, %p12438_p11 }
  0xe0   : > { %p12436_p3 = pneg %p12435_p1 }
  0xe1   : > { %p12442_p2 = por %p12441_p6, %p12440_p13 }
  0xe3   : > { %p12443_p5 = pnand %p12442_p2, %p12436_p3 }
  0xe5   : > { %12446 = shalt.err (!%p12443_p5)
}
  0xe6   : > { %s12447_s17 = scalar_lea.vmem %s12871_s21, 20480  ;;  %s12558_s22 = smov [#allocation2]  }
  0xe7   : > { %p12448_p10 = scmp.ne.s32.totalorder %s12871_s21, %s12447_s17  ;;  %s12452_s13 = sshll.u32 %s12558_s22, 4  ;;  %s12453_s13 = int_to_ptr.vmem [resolvable:$false] %s12452_s13 }
  0xe8   : > { %s12454_s2 = scalar_lea.vmem %s12453_s13, 40960  ;;  %p12455_p7 = scmp.lt.s32.totalorder %s12871_s21, %s12453_s13 }
  0xe9   : > { %p12450_p1 = pnand %p12448_p10, %p12434_p8  ;;  %p12456_p11 = scmp.lt.s32.totalorder %s12454_s2, %s12447_s17 }
  0xeb   : > { %p12451_p9 = pneg %p12450_p1  ;;  %p12457_p12 = por %p12456_p11, %p12455_p7 }
  0xed   : > { %p12458_p13 = pnand %p12457_p12, %p12451_p9 }
  0xef   : > { %12461 = shalt.err (!%p12458_p13)
}
  0xf0   : > { %s12559_s14 = smov 1280   ;;  %s12560_s25 = smov 80  }
  0xf1   : > { %10633 = dma.hbm_to_vmem [thread:$0]  (!%p12862_p4), %s12869_s29, 20480, %s12871_s21, %s12873_s27, %s12559_s14, %s12559_s14, %s12560_s25  }
  0xf2   : > { %p13403_p8 = scmp.ne.s32.totalorder %s13393_s16, 0 }
  0xf3   : > { %s12904_s24 = sand.u32 (!%p13403_p8), 1, %s12536_s10  }
  0xf4   : > { %387 = sbr.rel (%p13403_p8) target bundleno = 2213 (0x8a5), region = 56  ;;  %s390_s20 = scalar_lea.sflag (!%p13403_p8), [#allocation3], %s12904_s24 }
  0xf5   : > { %s10568_s28 = smul.u32 (!%p13403_p8), 1280, %s12904_s24 }
  0xf7   : > { %s12908_s17 = scalar_lea.vmem (!%p13403_p8), [#allocation2], %s10568_s28 }
  0xfb   : > { %12507 = dma.done.wait (%p12846_p0), %s390_s20, 20480  }
  0xfc   : > { %12509 = vsyncadd (%p12846_p0), %s390_s20, 4294946816  ;;  %p13404_p7 = scmp.eq.s32.totalorder %s12635_s15, 0 }
  0xfe   : > { %12511 = dma.done.wait (%p13404_p7), [#allocation6], 81984   ;;  %p13405_p9 = pmov %p13404_p7 }
  0xff   : > { %p13406_p4 = pmov %p13404_p7 }
 0x100   : > { %12513 = vsyncadd (%p13405_p9), [#allocation6], 4294885312 }
 0x101   : > { %12515 = dma.done.wait (%p13406_p4), [#allocation9], 4112   ;;  %p13407_p3 = pmov %p13406_p4 }
 0x103   : > { %12517 = vsyncadd (%p13407_p3), [#allocation9], 4294963184  ;;  %p13408_p6 = pmov %p13407_p3 }
 0x104   : > { %p13409_p2 = pmov %p13407_p3 }
 0x105   : > { %12519 = dma.done.wait (%p13408_p6), [#allocation12], 1040  }
 0x106   : > { %12521 = vsyncadd (%p13409_p2), [#allocation12], 4294966256  ;;  %p13410_p0 = pmov %p13409_p2 }
 0x108   : > { %12523 = dma.done.wait (%p13410_p0), [#allocation15], 1040   ;;  %p13411_p5 = pmov %p13410_p0 }
 0x109   : > { %v10704_v0 = vld [vmem:[#allocation5 + $0x4] ss:$16 sps:$4 sm:$0xff]   ;;  %v10706_v1 = vld [vmem:[#allocation5 + $0xc] ss:$16 sps:$4 sm:$0xff]   ;;  %v10708_v2 = vld [vmem:[#allocation5] ss:$16 sps:$4 sm:$0xff]  }
 0x10a   : > { %12525 = vsyncadd (%p13411_p5), [#allocation15], 4294966256  ;;  %5285 = vmatprep.subr.bf16.mxu0 %v10704_v0  ;;  %v10709_v3 = vld [vmem:[#allocation5 + $0x8] ss:$16 sps:$4 sm:$0xff]   ;;  %6415 = vmatprep.subr.bf16.mxu1 %v10706_v1  ;;  %v10710_v4 = vld [vmem:[#allocation5 + $0x24] ss:$16 sps:$4 sm:$0xff]  }
 0x10b   : > { %5286 = vmatpush1.bf16.msra.mxu0 %v10708_v2  ;;  %6416 = vmatpush1.bf16.msra.mxu1 %v10709_v3  ;;  %v10712_v5 = vld [vmem:[#allocation5 + $0x2c] ss:$16 sps:$4 sm:$0xff]   ;;  %v10714_v6 = vld [vmem:[#allocation5 + $0x20] ss:$16 sps:$4 sm:$0xff]   ;;  %v10715_v7 = vld [vmem:[#allocation5 + $0x28] ss:$16 sps:$4 sm:$0xff]  }
 0x10c   : > { %5287 = vmatprep.subr.bf16.mxu0 %v10710_v4  ;;  %6417 = vmatprep.subr.bf16.mxu1 %v10712_v5  ;;  %v10716_v8 = vld [vmem:[#allocation5 + $0x44] ss:$16 sps:$4 sm:$0xff]   ;;  %v10718_v9 = vld [vmem:[#allocation5 + $0x4c] ss:$16 sps:$4 sm:$0xff]   ;;  %v10720_v10 = vld [vmem:[#allocation5 + $0x40] ss:$16 sps:$4 sm:$0xff]  }
 0x10d   : > { %v10721_v11 = vld [vmem:[#allocation5 + $0x48] ss:$16 sps:$4 sm:$0xff]   ;;  %v10722_v12 = vld [vmem:[#allocation5 + $0x64] ss:$16 sps:$4 sm:$0xff]   ;;  %v10724_v13 = vld [vmem:[#allocation5 + $0x6c] ss:$16 sps:$4 sm:$0xff]  }
 0x10e   : > { %v10726_v14 = vld [vmem:[#allocation5 + $0x60] ss:$16 sps:$4 sm:$0xff]   ;;  %v10727_v15 = vld [vmem:[#allocation5 + $0x68] ss:$16 sps:$4 sm:$0xff]   ;;  %v10728_v16 = vld [vmem:[#allocation5 + $0x84] ss:$16 sps:$4 sm:$0xff]  }
 0x10f   : > { %5288 = vmatpush1.bf16.msra.mxu0 %v10714_v6  ;;  %6418 = vmatpush1.bf16.msra.mxu1 %v10715_v7  ;;  %v10730_v17 = vld [vmem:[#allocation5 + $0x8c] ss:$16 sps:$4 sm:$0xff]   ;;  %v10732_v18 = vld [vmem:[#allocation5 + $0x80] ss:$16 sps:$4 sm:$0xff]   ;;  %v10733_v19 = vld [vmem:[#allocation5 + $0x88] ss:$16 sps:$4 sm:$0xff]  }
 0x110   : > { %5289 = vmatprep.subr.bf16.mxu0 %v10716_v8  ;;  %6419 = vmatprep.subr.bf16.mxu1 %v10718_v9  ;;  %v10734_v20 = vld [vmem:[#allocation5 + $0xa4] ss:$16 sps:$4 sm:$0xff]   ;;  %v10736_v21 = vld [vmem:[#allocation5 + $0xac] ss:$16 sps:$4 sm:$0xff]   ;;  %v10738_v22 = vld [vmem:[#allocation5 + $0xa0] ss:$16 sps:$4 sm:$0xff]  }
 0x111   : > { %v10739_v23 = vld [vmem:[#allocation5 + $0xa8] ss:$16 sps:$4 sm:$0xff]   ;;  %v10740_v24 = vld [vmem:[#allocation5 + $0xc4] ss:$16 sps:$4 sm:$0xff]   ;;  %v10742_v25 = vld [vmem:[#allocation5 + $0xcc] ss:$16 sps:$4 sm:$0xff]  }
 0x112   : > { %v10744_v26 = vld [vmem:[#allocation5 + $0xc0] ss:$16 sps:$4 sm:$0xff]   ;;  %v10745_v27 = vld [vmem:[#allocation5 + $0xc8] ss:$16 sps:$4 sm:$0xff]   ;;  %v10746_v28 = vld [vmem:[#allocation5 + $0xe4] ss:$16 sps:$4 sm:$0xff]  }
 0x113   : > { %5290 = vmatpush1.bf16.msra.mxu0 %v10720_v10  ;;  %6420 = vmatpush1.bf16.msra.mxu1 %v10721_v11  ;;  %v10748_v29 = vld [vmem:[#allocation5 + $0xec] ss:$16 sps:$4 sm:$0xff]   ;;  %v10750_v30 = vld [vmem:[#allocation5 + $0xe0] ss:$16 sps:$4 sm:$0xff]   ;;  %v10751_v31 = vld [vmem:[#allocation5 + $0xe8] ss:$16 sps:$4 sm:$0xff]  }
 0x114   : > { %5291 = vmatprep.subr.bf16.mxu0 %v10722_v12  ;;  %6421 = vmatprep.subr.bf16.mxu1 %v10724_v13  ;;  %v10752_v32 = vld [vmem:[#allocation5 + $0x104] ss:$16 sps:$4 sm:$0xff]   ;;  %v10754_v33 = vld [vmem:[#allocation5 + $0x10c] ss:$16 sps:$4 sm:$0xff]   ;;  %v10756_v34 = vld [vmem:[#allocation5 + $0x100] ss:$16 sps:$4 sm:$0xff]  }
 0x115   : > { %v10757_v35 = vld [vmem:[#allocation5 + $0x108] ss:$16 sps:$4 sm:$0xff]   ;;  %v10758_v36 = vld [vmem:[#allocation5 + $0x124] ss:$16 sps:$4 sm:$0xff]   ;;  %v10760_v37 = vld [vmem:[#allocation5 + $0x12c] ss:$16 sps:$4 sm:$0xff]  }
 0x116   : > { %v10762_v38 = vld [vmem:[#allocation5 + $0x120] ss:$16 sps:$4 sm:$0xff]   ;;  %v10763_v39 = vld [vmem:[#allocation5 + $0x128] ss:$16 sps:$4 sm:$0xff]   ;;  %v10764_v40 = vld [vmem:[#allocation5 + $0x144] ss:$16 sps:$4 sm:$0xff]  }
 0x117   : > { %5292 = vmatpush1.bf16.msra.mxu0 %v10726_v14  ;;  %6422 = vmatpush1.bf16.msra.mxu1 %v10727_v15  ;;  %v10766_v41 = vld [vmem:[#allocation5 + $0x14c] ss:$16 sps:$4 sm:$0xff]   ;;  %v10768_v42 = vld [vmem:[#allocation5 + $0x140] ss:$16 sps:$4 sm:$0xff]   ;;  %v10769_v43 = vld [vmem:[#allocation5 + $0x148] ss:$16 sps:$4 sm:$0xff]  }
 0x118   : > { %5293 = vmatprep.subr.bf16.mxu0 %v10728_v16  ;;  %6423 = vmatprep.subr.bf16.mxu1 %v10730_v17  ;;  %v10770_v44 = vld [vmem:[#allocation5 + $0x164] ss:$16 sps:$4 sm:$0xff]   ;;  %v10772_v45 = vld [vmem:[#allocation5 + $0x16c] ss:$16 sps:$4 sm:$0xff]   ;;  %v10774_v46 = vld [vmem:[#allocation5 + $0x160] ss:$16 sps:$4 sm:$0xff]  }
 0x119   : > { %v10775_v47 = vld [vmem:[#allocation5 + $0x168] ss:$16 sps:$4 sm:$0xff]   ;;  %v10802_v48 = vld [vmem:[%s12908_s17 + $0x4] ss:$80 sps:$4 sm:$0xff]   ;;  %v10778_v50 = vld [vmem:[#allocation5 + $0x18c] ss:$16 sps:$4 sm:$0xff]  }
 0x11a   : > { %v10776_v49 = vld [vmem:[#allocation5 + $0x184] ss:$16 sps:$4 sm:$0xff]   ;;  %5317 = vmatprep.mubr.bf16.mxu0 %v10802_v48  ;;  %6447 = vmatprep.mubr.bf16.mxu1 %v10802_v48  ;;  %v10780_v51 = vld [vmem:[#allocation5 + $0x180] ss:$16 sps:$4 sm:$0xff]   ;;  %v10781_v52 = vld [vmem:[#allocation5 + $0x188] ss:$16 sps:$4 sm:$0xff]  }
 0x11b   : > { %5294 = vmatpush1.bf16.msra.mxu0 %v10732_v18  ;;  %6424 = vmatpush1.bf16.msra.mxu1 %v10733_v19  ;;  %v10782_v53 = vld [vmem:[#allocation5 + $0x1a4] ss:$16 sps:$4 sm:$0xff]   ;;  %v10784_v54 = vld [vmem:[#allocation5 + $0x1ac] ss:$16 sps:$4 sm:$0xff]   ;;  %v10786_v55 = vld [vmem:[#allocation5 + $0x1a0] ss:$16 sps:$4 sm:$0xff]  }
 0x11c   : > { %5295 = vmatprep.subr.bf16.mxu0 %v10734_v20  ;;  %6425 = vmatprep.subr.bf16.mxu1 %v10736_v21  ;;  %v10787_v56 = vld [vmem:[#allocation5 + $0x1a8] ss:$16 sps:$4 sm:$0xff]   ;;  %v10788_v57 = vld [vmem:[#allocation5 + $0x1c4] ss:$16 sps:$4 sm:$0xff]   ;;  %v10790_v58 = vld [vmem:[#allocation5 + $0x1cc] ss:$16 sps:$4 sm:$0xff]  }
 0x11d   : > { %v10792_v59 = vld [vmem:[#allocation5 + $0x1c0] ss:$16 sps:$4 sm:$0xff]   ;;  %v10793_v60 = vld [vmem:[#allocation5 + $0x1c8] ss:$16 sps:$4 sm:$0xff]   ;;  %v10794_v61 = vld [vmem:[#allocation5 + $0x1e4] ss:$16 sps:$4 sm:$0xff]  }
 0x11e   : > { %v10796_v62 = vld [vmem:[#allocation5 + $0x1ec] ss:$16 sps:$4 sm:$0xff]   ;;  %v10798_v63 = vld [vmem:[#allocation5 + $0x1e0] ss:$16 sps:$4 sm:$0xff]   ;;  %v10799_v0 = vld [vmem:[#allocation5 + $0x1e8] ss:$16 sps:$4 sm:$0xff]  }
 0x11f   : > { %5296 = vmatpush1.bf16.msra.mxu0 %v10738_v22  ;;  %6426 = vmatpush1.bf16.msra.mxu1 %v10739_v23  ;;  %v10805_v1 = vld [vmem:[#allocation5 + $0x204] ss:$16 sps:$4 sm:$0xff]   ;;  %v10808_v2 = vld [vmem:[#allocation5 + $0x20c] ss:$16 sps:$4 sm:$0xff]   ;;  %v10800_v3 = vld [vmem:[%s12908_s17] ss:$80 sps:$4 sm:$0xff]  }
 0x120   : > { %5297 = vmatprep.subr.bf16.mxu0 %v10740_v24  ;;  %6427 = vmatprep.subr.bf16.mxu1 %v10742_v25  ;;  %v10803_v4 = vld [vmem:[#allocation5 + $0x200] ss:$16 sps:$4 sm:$0xff]   ;;  %v10806_v5 = vld [vmem:[#allocation5 + $0x208] ss:$16 sps:$4 sm:$0xff]   ;;  %v10811_v6 = vld [vmem:[#allocation5 + $0x224] ss:$16 sps:$4 sm:$0xff]  }
 0x121   : > { %v10814_v7 = vld [vmem:[#allocation5 + $0x22c] ss:$16 sps:$4 sm:$0xff]   ;;  %v10815_v8 = vld [vmem:[%s12908_s17 + $0xa4] ss:$80 sps:$4 sm:$0xff]   ;;  %v10809_v9 = vld [vmem:[#allocation5 + $0x220] ss:$16 sps:$4 sm:$0xff]  }
 0x122   : > { %v10812_v10 = vld [vmem:[#allocation5 + $0x228] ss:$16 sps:$4 sm:$0xff]   ;;  %v10820_v11 = vld [vmem:[#allocation5 + $0x244] ss:$16 sps:$4 sm:$0xff]   ;;  %v10823_v12 = vld [vmem:[#allocation5 + $0x24c] ss:$16 sps:$4 sm:$0xff]  }
 0x123   : > { %5298 = vmatpush1.bf16.msra.mxu0 %v10744_v26  ;;  %6428 = vmatpush1.bf16.msra.mxu1 %v10745_v27  ;;  %v10817_v13 = vld [vmem:[%s12908_s17 + $0xa0] ss:$80 sps:$4 sm:$0xff]   ;;  %v10821_v15 = vld [vmem:[#allocation5 + $0x248] ss:$16 sps:$4 sm:$0xff]   ;;  %v10826_v16 = vld [vmem:[#allocation5 + $0x264] ss:$16 sps:$4 sm:$0xff]  }
 0x124   : > { %5299 = vmatprep.subr.bf16.mxu0 %v10746_v28  ;;  %6429 = vmatprep.subr.bf16.mxu1 %v10748_v29  ;;  %v10818_v14 = vld [vmem:[#allocation5 + $0x240] ss:$16 sps:$4 sm:$0xff]   ;;  %v10829_v17 = vld [vmem:[#allocation5 + $0x26c] ss:$16 sps:$4 sm:$0xff]   ;;  %v10830_v18 = vld [vmem:[%s12908_s17 + $0x144] ss:$80 sps:$4 sm:$0xff]  }
 0x125   : > { %v10824_v19 = vld [vmem:[#allocation5 + $0x260] ss:$16 sps:$4 sm:$0xff]   ;;  %v10827_v20 = vld [vmem:[#allocation5 + $0x268] ss:$16 sps:$4 sm:$0xff]   ;;  %v10835_v21 = vld [vmem:[#allocation5 + $0x284] ss:$16 sps:$4 sm:$0xff]  }
 0x126   : > { %v10838_v22 = vld [vmem:[#allocation5 + $0x28c] ss:$16 sps:$4 sm:$0xff]   ;;  %v10832_v23 = vld [vmem:[%s12908_s17 + $0x140] ss:$80 sps:$4 sm:$0xff]   ;;  %v10836_v25 = vld [vmem:[#allocation5 + $0x288] ss:$16 sps:$4 sm:$0xff]  }
 0x127   : > { %5300 = vmatpush1.bf16.msra.mxu0 %v10750_v30  ;;  %6430 = vmatpush1.bf16.msra.mxu1 %v10751_v31  ;;  %v10833_v24 = vld [vmem:[#allocation5 + $0x280] ss:$16 sps:$4 sm:$0xff]   ;;  %v10841_v26 = vld [vmem:[#allocation5 + $0x2a4] ss:$16 sps:$4 sm:$0xff]   ;;  %v10844_v27 = vld [vmem:[#allocation5 + $0x2ac] ss:$16 sps:$4 sm:$0xff]  }
 0x128   : > { %5301 = vmatprep.subr.bf16.mxu0 %v10752_v32  ;;  %6431 = vmatprep.subr.bf16.mxu1 %v10754_v33  ;;  %v10845_v28 = vld [vmem:[%s12908_s17 + $0x1e4] ss:$80 sps:$4 sm:$0xff]   ;;  %v10839_v29 = vld [vmem:[#allocation5 + $0x2a0] ss:$16 sps:$4 sm:$0xff]   ;;  %v10842_v30 = vld [vmem:[#allocation5 + $0x2a8] ss:$16 sps:$4 sm:$0xff]  }
 0x129   : > { %v10850_v31 = vld [vmem:[#allocation5 + $0x2c4] ss:$16 sps:$4 sm:$0xff]   ;;  %v10853_v32 = vld [vmem:[#allocation5 + $0x2cc] ss:$16 sps:$4 sm:$0xff]   ;;  %v10847_v33 = vld [vmem:[%s12908_s17 + $0x1e0] ss:$80 sps:$4 sm:$0xff]  }
 0x12a   : > { %v10875_v48 = vld [vmem:[%s12908_s17 + $0x324] ss:$80 sps:$4 sm:$0xff]   ;;  %s8844_s16 = sshll.u32 %s12904_s24, 7  ;;  %s9701_s26 = sshll.u32 %s12635_s15, 11 }
 0x12b   : > { %5302 = vmatpush1.bf16.msra.mxu0 %v10756_v34  ;;  %6432 = vmatpush1.bf16.msra.mxu1 %v10757_v35  ;;  %v10848_v34 = vld [vmem:[#allocation5 + $0x2c0] ss:$16 sps:$4 sm:$0xff]   ;;  %v10851_v35 = vld [vmem:[#allocation5 + $0x2c8] ss:$16 sps:$4 sm:$0xff]   ;;  %s13292_s9 = scalar_lea.vmem [#allocation17], %s8844_s16  ;;  %s13412_s22 = sld [smem:[#allocation26_spill]] }
 0x12c   : > { %5303 = vmatprep.subr.bf16.mxu0 %v10758_v36  ;;  %6433 = vmatprep.subr.bf16.mxu1 %v10760_v37  ;;  %v10856_v36 = vld [vmem:[#allocation5 + $0x2e4] ss:$16 sps:$4 sm:$0xff]   ;;  %v10859_v37 = vld [vmem:[#allocation5 + $0x2ec] ss:$16 sps:$4 sm:$0xff]   ;;  %s8672_s29 = sshll.u32 %s13292_s9, 4  ;;  %s8659_s15 = scalar_lea.sflag [#allocation4], %s12904_s24  ;;  %s13329_s29 = int_to_ptr.vmem [resolvable:$true] %s8672_s29 }
 0x12d   : > { %s12462_s2 = scalar_lea.vmem %s13329_s29, 2048  ;;  %p13413_p1 = scmp.ne.s32.totalorder %s13400_s23, 0 }
 0x12e   : > { %p12463_p10 = scmp.ne.s32.totalorder %s13329_s29, %s12462_s2  ;;  %s12561_s14 = smov [#allocation17]  }
 0x12f   : > { %5304 = vmatpush1.bf16.msra.mxu0 %v10762_v38  ;;  %6434 = vmatpush1.bf16.msra.mxu1 %v10763_v39  ;;  %v10860_v38 = vld [vmem:[%s12908_s17 + $0x284] ss:$80 sps:$4 sm:$0xff]   ;;  %v10854_v39 = vld [vmem:[#allocation5 + $0x2e0] ss:$16 sps:$4 sm:$0xff]   ;;  %s12466_s25 = sshll.u32 %s12561_s14, 4  ;;  %s12467_s25 = int_to_ptr.vmem [resolvable:$false] %s12466_s25 }
 0x130   : > { %5305 = vmatprep.subr.bf16.mxu0 %v10764_v40  ;;  %6435 = vmatprep.subr.bf16.mxu1 %v10766_v41  ;;  %v10857_v40 = vld [vmem:[#allocation5 + $0x2e8] ss:$16 sps:$4 sm:$0xff]   ;;  %v10865_v41 = vld [vmem:[#allocation5 + $0x304] ss:$16 sps:$4 sm:$0xff]   ;;  %p12464_p11 = pnand %p12463_p10, %p13413_p1  ;;  %s12468_s28 = scalar_lea.vmem %s12467_s25, 4096 }
 0x131   : > { %s13327_s13 = scalar_lea.hbm %s13412_s22, %s9701_s26  ;;  %p12469_p13 = scmp.lt.s32.totalorder %s13329_s29, %s12467_s25 }
 0x132   : > { %p12465_p12 = pneg %p12464_p11  ;;  %p12470_p8 = scmp.lt.s32.totalorder %s12468_s28, %s12462_s2 }
 0x133   : > { %5306 = vmatpush1.bf16.msra.mxu0 %v10768_v42  ;;  %6436 = vmatpush1.bf16.msra.mxu1 %v10769_v43  ;;  %v10868_v42 = vld [vmem:[#allocation5 + $0x30c] ss:$16 sps:$4 sm:$0xff]   ;;  %v10862_v43 = vld [vmem:[%s12908_s17 + $0x280] ss:$80 sps:$4 sm:$0xff]  }
 0x134   : > { %5307 = vmatprep.subr.bf16.mxu0 %v10770_v44  ;;  %6437 = vmatprep.subr.bf16.mxu1 %v10772_v45  ;;  %v10863_v44 = vld [vmem:[#allocation5 + $0x300] ss:$16 sps:$4 sm:$0xff]   ;;  %v10866_v45 = vld [vmem:[#allocation5 + $0x308] ss:$16 sps:$4 sm:$0xff]   ;;  %p12471_p7 = por %p12470_p8, %p12469_p13 }
 0x136   : > { %p12472_p9 = pnand %p12471_p7, %p12465_p12 }
 0x137   : > { %5308 = vmatpush1.bf16.msra.mxu0 %v10774_v46  ;;  %6438 = vmatpush1.bf16.msra.mxu1 %v10775_v47  ;;  %v10871_v46 = vld [vmem:[#allocation5 + $0x324] ss:$16 sps:$4 sm:$0xff]   ;;  %v10874_v47 = vld [vmem:[#allocation5 + $0x32c] ss:$16 sps:$4 sm:$0xff]  }
 0x138   : > { %5309 = vmatprep.subr.bf16.mxu0 %v10776_v49  ;;  %6439 = vmatprep.subr.bf16.mxu1 %v10778_v50  ;;  %v10869_v49 = vld [vmem:[#allocation5 + $0x320] ss:$16 sps:$4 sm:$0xff]   ;;  %v10872_v50 = vld [vmem:[#allocation5 + $0x328] ss:$16 sps:$4 sm:$0xff]  }
 0x13b   : > { %5310 = vmatpush1.bf16.msra.mxu0 %v10780_v51  ;;  %6440 = vmatpush1.bf16.msra.mxu1 %v10781_v52  ;;  %v10880_v51 = vld [vmem:[#allocation5 + $0x344] ss:$16 sps:$4 sm:$0xff]   ;;  %v10883_v52 = vld [vmem:[#allocation5 + $0x34c] ss:$16 sps:$4 sm:$0xff]  }
 0x13c   : > { %5311 = vmatprep.subr.bf16.mxu0 %v10782_v53  ;;  %6441 = vmatprep.subr.bf16.mxu1 %v10784_v54  ;;  %v10877_v53 = vld [vmem:[%s12908_s17 + $0x320] ss:$80 sps:$4 sm:$0xff]  }
 0x13d   : > { %v10878_v54 = vld [vmem:[#allocation5 + $0x340] ss:$16 sps:$4 sm:$0xff]  }
 0x13f   : > { %5312 = vmatpush1.bf16.msra.mxu0 %v10786_v55  ;;  %6442 = vmatpush1.bf16.msra.mxu1 %v10787_v56  ;;  %v10881_v55 = vld [vmem:[#allocation5 + $0x348] ss:$16 sps:$4 sm:$0xff]   ;;  %v10886_v56 = vld [vmem:[#allocation5 + $0x364] ss:$16 sps:$4 sm:$0xff]  }
 0x140   : > { %5313 = vmatprep.subr.bf16.mxu0 %v10788_v57  ;;  %6443 = vmatprep.subr.bf16.mxu1 %v10790_v58  ;;  %v10889_v57 = vld [vmem:[#allocation5 + $0x36c] ss:$16 sps:$4 sm:$0xff]   ;;  %v10890_v58 = vld [vmem:[%s12908_s17 + $0x3c4] ss:$80 sps:$4 sm:$0xff]  }
 0x143   : > { %5314 = vmatpush1.bf16.msra.mxu0 %v10792_v59  ;;  %6444 = vmatpush1.bf16.msra.mxu1 %v10793_v60  ;;  %v10884_v59 = vld [vmem:[#allocation5 + $0x360] ss:$16 sps:$4 sm:$0xff]   ;;  %v10887_v60 = vld [vmem:[#allocation5 + $0x368] ss:$16 sps:$4 sm:$0xff]  }
 0x144   : > { %5315 = vmatprep.subr.bf16.mxu0 %v10794_v61  ;;  %6445 = vmatprep.subr.bf16.mxu1 %v10796_v62  ;;  %v10895_v61 = vld [vmem:[#allocation5 + $0x384] ss:$16 sps:$4 sm:$0xff]   ;;  %v10898_v62 = vld [vmem:[#allocation5 + $0x38c] ss:$16 sps:$4 sm:$0xff]  }
 0x147   : > { %5316 = vmatpush1.bf16.msra.mxu0 %v10798_v63  ;;  %6446 = vmatpush1.bf16.msra.mxu1 %v10799_v0  ;;  %v10892_v63 = vld [vmem:[%s12908_s17 + $0x3c0] ss:$80 sps:$4 sm:$0xff]  }
 0x148   : > { %5398 = vmatprep.subr.bf16.mxu0 %v10805_v1  ;;  %6528 = vmatprep.subr.bf16.mxu1 %v10808_v2  ;;  %v10893_v0 = vld [vmem:[#allocation5 + $0x380] ss:$16 sps:$4 sm:$0xff]   ;;  %v10896_v1 = vld [vmem:[#allocation5 + $0x388] ss:$16 sps:$4 sm:$0xff]   ;;  %v10901_v2 = vld [vmem:[#allocation5 + $0x3a4] ss:$16 sps:$4 sm:$0xff]  }
 0x14a   : > { %5318 = vmatmul.mubr.bf16.vlgmr.msra.gmra.mrb[0].mxu0 %v10800_v3  ;;  %6448 = vmatmul.mubr.bf16.vlgmr.msra.gmra.mrb[0].mxu1 %v10800_v3  ;;  %v10904_v3 = vld [vmem:[#allocation5 + $0x3ac] ss:$16 sps:$4 sm:$0xff]  }
 0x14b   : > { %5399 = vmatpush1.bf16.msra.mxu0 %v10803_v4  ;;  %6529 = vmatpush1.bf16.msra.mxu1 %v10806_v5  ;;  %v10905_v4 = vld [vmem:[%s12908_s17 + $0x464] ss:$80 sps:$4 sm:$0xff]   ;;  %v10899_v5 = vld [vmem:[#allocation5 + $0x3a0] ss:$16 sps:$4 sm:$0xff]  }
 0x14c   : > { %5400 = vmatprep.subr.bf16.mxu0 %v10811_v6  ;;  %6530 = vmatprep.subr.bf16.mxu1 %v10814_v7  ;;  %v10902_v6 = vld [vmem:[#allocation5 + $0x3a8] ss:$16 sps:$4 sm:$0xff]   ;;  %v10910_v7 = vld [vmem:[#allocation5 + $0x3c4] ss:$16 sps:$4 sm:$0xff]  }
 0x14d   : > { %5327 = vmatprep.mubr.bf16.mxu0 %v10815_v8  ;;  %6457 = vmatprep.mubr.bf16.mxu1 %v10815_v8  ;;  %v10913_v8 = vld [vmem:[#allocation5 + $0x3cc] ss:$16 sps:$4 sm:$0xff]  }
 0x14f   : > { %5401 = vmatpush1.bf16.msra.mxu0 %v10809_v9  ;;  %6531 = vmatpush1.bf16.msra.mxu1 %v10812_v10  ;;  %v10907_v9 = vld [vmem:[%s12908_s17 + $0x460] ss:$80 sps:$4 sm:$0xff]  }
 0x150   : > { %5402 = vmatprep.subr.bf16.mxu0 %v10820_v11  ;;  %6532 = vmatprep.subr.bf16.mxu1 %v10823_v12  ;;  %v10908_v10 = vld [vmem:[#allocation5 + $0x3c0] ss:$16 sps:$4 sm:$0xff]   ;;  %v10911_v11 = vld [vmem:[#allocation5 + $0x3c8] ss:$16 sps:$4 sm:$0xff]   ;;  %v10916_v12 = vld [vmem:[#allocation5 + $0x3e4] ss:$16 sps:$4 sm:$0xff]  }
 0x152   : > { %5328 = vmatmul.mubr.bf16.gmra.mrb[4].mxu0 %v10817_v13  ;;  %6458 = vmatmul.mubr.bf16.gmra.mrb[4].mxu1 %v10817_v13  ;;  %v10919_v13 = vld [vmem:[#allocation5 + $0x3ec] ss:$16 sps:$4 sm:$0xff]  }
 0x153   : > { %5403 = vmatpush1.bf16.msra.mxu0 %v10818_v14  ;;  %6533 = vmatpush1.bf16.msra.mxu1 %v10821_v15  ;;  %v10922_v14 = vld [vmem:[%s12908_s17 + $0xc] ss:$80 sps:$4 sm:$0xff]   ;;  %v10914_v15 = vld [vmem:[#allocation5 + $0x3e0] ss:$16 sps:$4 sm:$0xff]  }
 0x154   : > { %5404 = vmatprep.subr.bf16.mxu0 %v10826_v16  ;;  %6534 = vmatprep.subr.bf16.mxu1 %v10829_v17  ;;  %v10917_v16 = vld [vmem:[#allocation5 + $0x3e8] ss:$16 sps:$4 sm:$0xff]   ;;  %v10925_v17 = vld [vmem:[#allocation5 + $0x404] ss:$16 sps:$4 sm:$0xff]  }
 0x155   : > { %5337 = vmatprep.mubr.bf16.mxu0 %v10830_v18  ;;  %6467 = vmatprep.mubr.bf16.mxu1 %v10830_v18  ;;  %v10928_v18 = vld [vmem:[#allocation5 + $0x40c] ss:$16 sps:$4 sm:$0xff]  }
 0x157   : > { %5405 = vmatpush1.bf16.msra.mxu0 %v10824_v19  ;;  %6535 = vmatpush1.bf16.msra.mxu1 %v10827_v20  ;;  %v10920_v19 = vld [vmem:[%s12908_s17 + $0x8] ss:$80 sps:$4 sm:$0xff]   ;;  %v10923_v20 = vld [vmem:[#allocation5 + $0x400] ss:$16 sps:$4 sm:$0xff]  }
 0x158   : > { %5406 = vmatprep.subr.bf16.mxu0 %v10835_v21  ;;  %6536 = vmatprep.subr.bf16.mxu1 %v10838_v22  ;;  %v10926_v21 = vld [vmem:[#allocation5 + $0x408] ss:$16 sps:$4 sm:$0xff]   ;;  %v10931_v22 = vld [vmem:[#allocation5 + $0x424] ss:$16 sps:$4 sm:$0xff]  }
 0x15a   : > { %5338 = vmatmul.mubr.bf16.gmra.mrb[8].mxu0 %v10832_v23  ;;  %6468 = vmatmul.mubr.bf16.gmra.mrb[8].mxu1 %v10832_v23  ;;  %v10934_v23 = vld [vmem:[#allocation5 + $0x42c] ss:$16 sps:$4 sm:$0xff]  }
 0x15b   : > { %5407 = vmatpush1.bf16.msra.mxu0 %v10833_v24  ;;  %6537 = vmatpush1.bf16.msra.mxu1 %v10836_v25  ;;  %v10935_v24 = vld [vmem:[%s12908_s17 + $0xac] ss:$80 sps:$4 sm:$0xff]   ;;  %v10929_v25 = vld [vmem:[#allocation5 + $0x420] ss:$16 sps:$4 sm:$0xff]  }
 0x15c   : > { %5408 = vmatprep.subr.bf16.mxu0 %v10841_v26  ;;  %6538 = vmatprep.subr.bf16.mxu1 %v10844_v27  ;;  %v10932_v26 = vld [vmem:[#allocation5 + $0x428] ss:$16 sps:$4 sm:$0xff]   ;;  %v10940_v27 = vld [vmem:[#allocation5 + $0x444] ss:$16 sps:$4 sm:$0xff]  }
 0x15d   : > { %5347 = vmatprep.mubr.bf16.mxu0 %v10845_v28  ;;  %6477 = vmatprep.mubr.bf16.mxu1 %v10845_v28  ;;  %v10943_v28 = vld [vmem:[#allocation5 + $0x44c] ss:$16 sps:$4 sm:$0xff]  }
 0x15f   : > { %5409 = vmatpush1.bf16.msra.mxu0 %v10839_v29  ;;  %6539 = vmatpush1.bf16.msra.mxu1 %v10842_v30  ;;  %v10937_v29 = vld [vmem:[%s12908_s17 + $0xa8] ss:$80 sps:$4 sm:$0xff]   ;;  %v10938_v30 = vld [vmem:[#allocation5 + $0x440] ss:$16 sps:$4 sm:$0xff]  }
 0x160   : > { %5410 = vmatprep.subr.bf16.mxu0 %v10850_v31  ;;  %6540 = vmatprep.subr.bf16.mxu1 %v10853_v32  ;;  %v10941_v31 = vld [vmem:[#allocation5 + $0x448] ss:$16 sps:$4 sm:$0xff]   ;;  %v10946_v32 = vld [vmem:[#allocation5 + $0x464] ss:$16 sps:$4 sm:$0xff]  }
 0x162   : > { %5348 = vmatmul.mubr.bf16.gmra.mrb[12].mxu0 %v10847_v33  ;;  %6478 = vmatmul.mubr.bf16.gmra.mrb[12].mxu1 %v10847_v33  ;;  %v10949_v33 = vld [vmem:[#allocation5 + $0x46c] ss:$16 sps:$4 sm:$0xff]  }
 0x163   : > { %5411 = vmatpush1.bf16.msra.mxu0 %v10848_v34  ;;  %6541 = vmatpush1.bf16.msra.mxu1 %v10851_v35  ;;  %v10950_v34 = vld [vmem:[%s12908_s17 + $0x14c] ss:$80 sps:$4 sm:$0xff]   ;;  %v10944_v35 = vld [vmem:[#allocation5 + $0x460] ss:$16 sps:$4 sm:$0xff]  }
 0x164   : > { %5412 = vmatprep.subr.bf16.mxu0 %v10856_v36  ;;  %6542 = vmatprep.subr.bf16.mxu1 %v10859_v37  ;;  %v10947_v36 = vld [vmem:[#allocation5 + $0x468] ss:$16 sps:$4 sm:$0xff]   ;;  %v10955_v37 = vld [vmem:[#allocation5 + $0x484] ss:$16 sps:$4 sm:$0xff]  }
 0x165   : > { %5357 = vmatprep.mubr.bf16.mxu0 %v10860_v38  ;;  %6487 = vmatprep.mubr.bf16.mxu1 %v10860_v38  ;;  %v10958_v38 = vld [vmem:[#allocation5 + $0x48c] ss:$16 sps:$4 sm:$0xff]  }
 0x167   : > { %5413 = vmatpush1.bf16.msra.mxu0 %v10854_v39  ;;  %6543 = vmatpush1.bf16.msra.mxu1 %v10857_v40  ;;  %v10952_v39 = vld [vmem:[%s12908_s17 + $0x148] ss:$80 sps:$4 sm:$0xff]   ;;  %v10953_v40 = vld [vmem:[#allocation5 + $0x480] ss:$16 sps:$4 sm:$0xff]  }
 0x168   : > { %5414 = vmatprep.subr.bf16.mxu0 %v10865_v41  ;;  %6544 = vmatprep.subr.bf16.mxu1 %v10868_v42  ;;  %v10956_v41 = vld [vmem:[#allocation5 + $0x488] ss:$16 sps:$4 sm:$0xff]   ;;  %v10961_v42 = vld [vmem:[#allocation5 + $0x4a4] ss:$16 sps:$4 sm:$0xff]  }
 0x16a   : > { %5358 = vmatmul.mubr.bf16.gmra.mrb[16].mxu0 %v10862_v43  ;;  %6488 = vmatmul.mubr.bf16.gmra.mrb[16].mxu1 %v10862_v43  ;;  %v10964_v43 = vld [vmem:[#allocation5 + $0x4ac] ss:$16 sps:$4 sm:$0xff]  }
 0x16b   : > { %5415 = vmatpush1.bf16.msra.mxu0 %v10863_v44  ;;  %6545 = vmatpush1.bf16.msra.mxu1 %v10866_v45  ;;  %v10965_v44 = vld [vmem:[%s12908_s17 + $0x1ec] ss:$80 sps:$4 sm:$0xff]   ;;  %v10959_v45 = vld [vmem:[#allocation5 + $0x4a0] ss:$16 sps:$4 sm:$0xff]  }
 0x16c   : > { %5416 = vmatprep.subr.bf16.mxu0 %v10871_v46  ;;  %6546 = vmatprep.subr.bf16.mxu1 %v10874_v47  ;;  %v10962_v46 = vld [vmem:[#allocation5 + $0x4a8] ss:$16 sps:$4 sm:$0xff]   ;;  %v10970_v47 = vld [vmem:[#allocation5 + $0x4c4] ss:$16 sps:$4 sm:$0xff]  }
 0x16d   : > { %5367 = vmatprep.mubr.bf16.mxu0 %v10875_v48  ;;  %6497 = vmatprep.mubr.bf16.mxu1 %v10875_v48  ;;  %v10973_v48 = vld [vmem:[#allocation5 + $0x4cc] ss:$16 sps:$4 sm:$0xff]  }
 0x16f   : > { %5417 = vmatpush1.bf16.msra.mxu0 %v10869_v49  ;;  %6547 = vmatpush1.bf16.msra.mxu1 %v10872_v50  ;;  %v10967_v49 = vld [vmem:[%s12908_s17 + $0x1e8] ss:$80 sps:$4 sm:$0xff]   ;;  %v10968_v50 = vld [vmem:[#allocation5 + $0x4c0] ss:$16 sps:$4 sm:$0xff]  }
 0x170   : > { %5418 = vmatprep.subr.bf16.mxu0 %v10880_v51  ;;  %6548 = vmatprep.subr.bf16.mxu1 %v10883_v52  ;;  %v10971_v51 = vld [vmem:[#allocation5 + $0x4c8] ss:$16 sps:$4 sm:$0xff]   ;;  %v10976_v52 = vld [vmem:[#allocation5 + $0x4e4] ss:$16 sps:$4 sm:$0xff]  }
 0x172   : > { %5368 = vmatmul.mubr.bf16.gmra.mrb[20].mxu0 %v10877_v53  ;;  %6498 = vmatmul.mubr.bf16.gmra.mrb[20].mxu1 %v10877_v53  ;;  %v10979_v53 = vld [vmem:[#allocation5 + $0x4ec] ss:$16 sps:$4 sm:$0xff]  }
 0x173   : > { %5419 = vmatpush1.bf16.msra.mxu0 %v10878_v54  ;;  %6549 = vmatpush1.bf16.msra.mxu1 %v10881_v55  ;;  %v10980_v54 = vld [vmem:[%s12908_s17 + $0x28c] ss:$80 sps:$4 sm:$0xff]   ;;  %v10974_v55 = vld [vmem:[#allocation5 + $0x4e0] ss:$16 sps:$4 sm:$0xff]  }
 0x174   : > { %5420 = vmatprep.subr.bf16.mxu0 %v10886_v56  ;;  %6550 = vmatprep.subr.bf16.mxu1 %v10889_v57  ;;  %v10977_v56 = vld [vmem:[#allocation5 + $0x4e8] ss:$16 sps:$4 sm:$0xff]   ;;  %v10985_v57 = vld [vmem:[#allocation5 + $0x504] ss:$16 sps:$4 sm:$0xff]  }
 0x175   : > { %5377 = vmatprep.mubr.bf16.mxu0 %v10890_v58  ;;  %6507 = vmatprep.mubr.bf16.mxu1 %v10890_v58  ;;  %v10988_v58 = vld [vmem:[#allocation5 + $0x50c] ss:$16 sps:$4 sm:$0xff]  }
 0x177   : > { %5421 = vmatpush1.bf16.msra.mxu0 %v10884_v59  ;;  %6551 = vmatpush1.bf16.msra.mxu1 %v10887_v60  ;;  %v10982_v59 = vld [vmem:[%s12908_s17 + $0x288] ss:$80 sps:$4 sm:$0xff]   ;;  %v10983_v60 = vld [vmem:[#allocation5 + $0x500] ss:$16 sps:$4 sm:$0xff]  }
 0x178   : > { %5422 = vmatprep.subr.bf16.mxu0 %v10895_v61  ;;  %6552 = vmatprep.subr.bf16.mxu1 %v10898_v62  ;;  %v10986_v61 = vld [vmem:[#allocation5 + $0x508] ss:$16 sps:$4 sm:$0xff]   ;;  %v10991_v62 = vld [vmem:[#allocation5 + $0x524] ss:$16 sps:$4 sm:$0xff]  }
 0x17a   : > { %5378 = vmatmul.mubr.bf16.gmra.mrb[24].mxu0 %v10892_v63  ;;  %6508 = vmatmul.mubr.bf16.gmra.mrb[24].mxu1 %v10892_v63  ;;  %v10994_v63 = vld [vmem:[#allocation5 + $0x52c] ss:$16 sps:$4 sm:$0xff]  }
 0x17b   : > { %5423 = vmatpush1.bf16.msra.mxu0 %v10893_v0  ;;  %6553 = vmatpush1.bf16.msra.mxu1 %v10896_v1  ;;  %v10995_v0 = vld [vmem:[%s12908_s17 + $0x32c] ss:$80 sps:$4 sm:$0xff]   ;;  %v10989_v1 = vld [vmem:[#allocation5 + $0x520] ss:$16 sps:$4 sm:$0xff]  }
 0x17c   : > { %5424 = vmatprep.subr.bf16.mxu0 %v10901_v2  ;;  %6554 = vmatprep.subr.bf16.mxu1 %v10904_v3  ;;  %v10992_v2 = vld [vmem:[#allocation5 + $0x528] ss:$16 sps:$4 sm:$0xff]   ;;  %v11000_v3 = vld [vmem:[#allocation5 + $0x544] ss:$16 sps:$4 sm:$0xff]  }
 0x17d   : > { %5387 = vmatprep.mubr.bf16.mxu0 %v10905_v4  ;;  %6517 = vmatprep.mubr.bf16.mxu1 %v10905_v4  ;;  %v11003_v4 = vld [vmem:[#allocation5 + $0x54c] ss:$16 sps:$4 sm:$0xff]  }
 0x17f   : > { %5425 = vmatpush1.bf16.msra.mxu0 %v10899_v5  ;;  %6555 = vmatpush1.bf16.msra.mxu1 %v10902_v6  ;;  %v10997_v5 = vld [vmem:[%s12908_s17 + $0x328] ss:$80 sps:$4 sm:$0xff]   ;;  %v10998_v6 = vld [vmem:[#allocation5 + $0x540] ss:$16 sps:$4 sm:$0xff]  }
 0x180   : > { %5426 = vmatprep.subr.bf16.mxu0 %v10910_v7  ;;  %6556 = vmatprep.subr.bf16.mxu1 %v10913_v8  ;;  %v11001_v7 = vld [vmem:[#allocation5 + $0x548] ss:$16 sps:$4 sm:$0xff]   ;;  %v11006_v8 = vld [vmem:[#allocation5 + $0x564] ss:$16 sps:$4 sm:$0xff]  }
 0x182   : > { %5388 = vmatmul.mubr.bf16.gmra.mrb[28].mxu0 %v10907_v9  ;;  %6518 = vmatmul.mubr.bf16.gmra.mrb[28].mxu1 %v10907_v9  ;;  %v11009_v9 = vld [vmem:[#allocation5 + $0x56c] ss:$16 sps:$4 sm:$0xff]  }
 0x183   : > { %5427 = vmatpush1.bf16.msra.mxu0 %v10908_v10  ;;  %6557 = vmatpush1.bf16.msra.mxu1 %v10911_v11  ;;  %v11010_v10 = vld [vmem:[%s12908_s17 + $0x3cc] ss:$80 sps:$4 sm:$0xff]   ;;  %v11004_v11 = vld [vmem:[#allocation5 + $0x560] ss:$16 sps:$4 sm:$0xff]  }
 0x184   : > { %5428 = vmatprep.subr.bf16.mxu0 %v10916_v12  ;;  %6558 = vmatprep.subr.bf16.mxu1 %v10919_v13  ;;  %v11007_v12 = vld [vmem:[#allocation5 + $0x568] ss:$16 sps:$4 sm:$0xff]   ;;  %v11015_v13 = vld [vmem:[#allocation5 + $0x584] ss:$16 sps:$4 sm:$0xff]  }
 0x185   : > { %5430 = vmatprep.mubr.bf16.mxu0 %v10922_v14  ;;  %6560 = vmatprep.mubr.bf16.mxu1 %v10922_v14  ;;  %v11018_v14 = vld [vmem:[#allocation5 + $0x58c] ss:$16 sps:$4 sm:$0xff]  }
 0x187   : > { %5429 = vmatpush1.bf16.msra.mxu0 %v10914_v15  ;;  %6559 = vmatpush1.bf16.msra.mxu1 %v10917_v16  ;;  %v11012_v15 = vld [vmem:[%s12908_s17 + $0x3c8] ss:$80 sps:$4 sm:$0xff]   ;;  %v11013_v16 = vld [vmem:[#allocation5 + $0x580] ss:$16 sps:$4 sm:$0xff]  }
 0x188   : > { %5511 = vmatprep.subr.bf16.mxu0 %v10925_v17  ;;  %6641 = vmatprep.subr.bf16.mxu1 %v10928_v18  ;;  %v11016_v17 = vld [vmem:[#allocation5 + $0x588] ss:$16 sps:$4 sm:$0xff]   ;;  %v11021_v18 = vld [vmem:[#allocation5 + $0x5a4] ss:$16 sps:$4 sm:$0xff]  }
 0x18a   : > { %5431 = vmatmul.mubr.bf16.vlgmr.msra.gmra.mrb[0].mxu0 %v10920_v19  ;;  %6561 = vmatmul.mubr.bf16.vlgmr.msra.gmra.mrb[0].mxu1 %v10920_v19  ;;  %v11024_v19 = vld [vmem:[#allocation5 + $0x5ac] ss:$16 sps:$4 sm:$0xff]  }
 0x18b   : > { %5512 = vmatpush1.bf16.msra.mxu0 %v10923_v20  ;;  %6642 = vmatpush1.bf16.msra.mxu1 %v10926_v21  ;;  %v11025_v20 = vld [vmem:[%s12908_s17 + $0x46c] ss:$80 sps:$4 sm:$0xff]   ;;  %v11019_v21 = vld [vmem:[#allocation5 + $0x5a0] ss:$16 sps:$4 sm:$0xff]  }
 0x18c   : > { %5513 = vmatprep.subr.bf16.mxu0 %v10931_v22  ;;  %6643 = vmatprep.subr.bf16.mxu1 %v10934_v23  ;;  %v11022_v22 = vld [vmem:[#allocation5 + $0x5a8] ss:$16 sps:$4 sm:$0xff]   ;;  %v11030_v23 = vld [vmem:[#allocation5 + $0x5c4] ss:$16 sps:$4 sm:$0xff]  }
 0x18d   : > { %5440 = vmatprep.mubr.bf16.mxu0 %v10935_v24  ;;  %6570 = vmatprep.mubr.bf16.mxu1 %v10935_v24  ;;  %v11033_v24 = vld [vmem:[#allocation5 + $0x5cc] ss:$16 sps:$4 sm:$0xff]  }
 0x18f   : > { %5514 = vmatpush1.bf16.msra.mxu0 %v10929_v25  ;;  %6644 = vmatpush1.bf16.msra.mxu1 %v10932_v26  ;;  %v11027_v25 = vld [vmem:[%s12908_s17 + $0x468] ss:$80 sps:$4 sm:$0xff]   ;;  %v11028_v26 = vld [vmem:[#allocation5 + $0x5c0] ss:$16 sps:$4 sm:$0xff]  }
 0x190   : > { %5515 = vmatprep.subr.bf16.mxu0 %v10940_v27  ;;  %6645 = vmatprep.subr.bf16.mxu1 %v10943_v28  ;;  %v11031_v27 = vld [vmem:[#allocation5 + $0x5c8] ss:$16 sps:$4 sm:$0xff]   ;;  %v11036_v28 = vld [vmem:[#allocation5 + $0x5e4] ss:$16 sps:$4 sm:$0xff]  }
 0x192   : > { %5441 = vmatmul.mubr.bf16.gmra.mrb[4].mxu0 %v10937_v29  ;;  %6571 = vmatmul.mubr.bf16.gmra.mrb[4].mxu1 %v10937_v29  ;;  %v11039_v29 = vld [vmem:[#allocation5 + $0x5ec] ss:$16 sps:$4 sm:$0xff]  }
 0x193   : > { %5516 = vmatpush1.bf16.msra.mxu0 %v10938_v30  ;;  %6646 = vmatpush1.bf16.msra.mxu1 %v10941_v31  ;;  %v11042_v30 = vld [vmem:[%s12908_s17 + $0x14] ss:$80 sps:$4 sm:$0xff]   ;;  %v11034_v31 = vld [vmem:[#allocation5 + $0x5e0] ss:$16 sps:$4 sm:$0xff]  }
 0x194   : > { %5517 = vmatprep.subr.bf16.mxu0 %v10946_v32  ;;  %6647 = vmatprep.subr.bf16.mxu1 %v10949_v33  ;;  %v11037_v32 = vld [vmem:[#allocation5 + $0x5e8] ss:$16 sps:$4 sm:$0xff]   ;;  %v11045_v33 = vld [vmem:[#allocation5 + $0x604] ss:$16 sps:$4 sm:$0xff]  }
 0x195   : > { %5450 = vmatprep.mubr.bf16.mxu0 %v10950_v34  ;;  %6580 = vmatprep.mubr.bf16.mxu1 %v10950_v34  ;;  %v11048_v34 = vld [vmem:[#allocation5 + $0x60c] ss:$16 sps:$4 sm:$0xff]  }
 0x197   : > { %5518 = vmatpush1.bf16.msra.mxu0 %v10944_v35  ;;  %6648 = vmatpush1.bf16.msra.mxu1 %v10947_v36  ;;  %v11040_v35 = vld [vmem:[%s12908_s17 + $0x10] ss:$80 sps:$4 sm:$0xff]  }
 0x198   : > { %5519 = vmatprep.subr.bf16.mxu0 %v10955_v37  ;;  %6649 = vmatprep.subr.bf16.mxu1 %v10958_v38  ;;  %v11043_v36 = vld [vmem:[#allocation5 + $0x600] ss:$16 sps:$4 sm:$0xff]   ;;  %v11046_v37 = vld [vmem:[#allocation5 + $0x608] ss:$16 sps:$4 sm:$0xff]   ;;  %v11051_v38 = vld [vmem:[#allocation5 + $0x624] ss:$16 sps:$4 sm:$0xff]  }
 0x19a   : > { %5451 = vmatmul.mubr.bf16.gmra.mrb[8].mxu0 %v10952_v39  ;;  %6581 = vmatmul.mubr.bf16.gmra.mrb[8].mxu1 %v10952_v39  ;;  %v11054_v39 = vld [vmem:[#allocation5 + $0x62c] ss:$16 sps:$4 sm:$0xff]  }
 0x19b   : > { %5520 = vmatpush1.bf16.msra.mxu0 %v10953_v40  ;;  %6650 = vmatpush1.bf16.msra.mxu1 %v10956_v41  ;;  %v11055_v40 = vld [vmem:[%s12908_s17 + $0xb4] ss:$80 sps:$4 sm:$0xff]   ;;  %v11049_v41 = vld [vmem:[#allocation5 + $0x620] ss:$16 sps:$4 sm:$0xff]  }
 0x19c   : > { %5521 = vmatprep.subr.bf16.mxu0 %v10961_v42  ;;  %6651 = vmatprep.subr.bf16.mxu1 %v10964_v43  ;;  %v11052_v42 = vld [vmem:[#allocation5 + $0x628] ss:$16 sps:$4 sm:$0xff]   ;;  %v11060_v43 = vld [vmem:[#allocation5 + $0x644] ss:$16 sps:$4 sm:$0xff]  }
 0x19d   : > { %5460 = vmatprep.mubr.bf16.mxu0 %v10965_v44  ;;  %6590 = vmatprep.mubr.bf16.mxu1 %v10965_v44  ;;  %v11063_v44 = vld [vmem:[#allocation5 + $0x64c] ss:$16 sps:$4 sm:$0xff]  }
 0x19f   : > { %5522 = vmatpush1.bf16.msra.mxu0 %v10959_v45  ;;  %6652 = vmatpush1.bf16.msra.mxu1 %v10962_v46  ;;  %v11057_v45 = vld [vmem:[%s12908_s17 + $0xb0] ss:$80 sps:$4 sm:$0xff]  }
 0x1a0   : > { %5523 = vmatprep.subr.bf16.mxu0 %v10970_v47  ;;  %6653 = vmatprep.subr.bf16.mxu1 %v10973_v48  ;;  %v11058_v46 = vld [vmem:[#allocation5 + $0x640] ss:$16 sps:$4 sm:$0xff]   ;;  %v11061_v47 = vld [vmem:[#allocation5 + $0x648] ss:$16 sps:$4 sm:$0xff]   ;;  %v11066_v48 = vld [vmem:[#allocation5 + $0x664] ss:$16 sps:$4 sm:$0xff]  }
 0x1a2   : > { %5461 = vmatmul.mubr.bf16.gmra.mrb[12].mxu0 %v10967_v49  ;;  %6591 = vmatmul.mubr.bf16.gmra.mrb[12].mxu1 %v10967_v49  ;;  %v11069_v49 = vld [vmem:[#allocation5 + $0x66c] ss:$16 sps:$4 sm:$0xff]  }
 0x1a3   : > { %5524 = vmatpush1.bf16.msra.mxu0 %v10968_v50  ;;  %6654 = vmatpush1.bf16.msra.mxu1 %v10971_v51  ;;  %v11070_v50 = vld [vmem:[%s12908_s17 + $0x154] ss:$80 sps:$4 sm:$0xff]   ;;  %v11064_v51 = vld [vmem:[#allocation5 + $0x660] ss:$16 sps:$4 sm:$0xff]  }
 0x1a4   : > { %5525 = vmatprep.subr.bf16.mxu0 %v10976_v52  ;;  %6655 = vmatprep.subr.bf16.mxu1 %v10979_v53  ;;  %v11067_v52 = vld [vmem:[#allocation5 + $0x668] ss:$16 sps:$4 sm:$0xff]   ;;  %v11075_v53 = vld [vmem:[#allocation5 + $0x684] ss:$16 sps:$4 sm:$0xff]  }
 0x1a5   : > { %5470 = vmatprep.mubr.bf16.mxu0 %v10980_v54  ;;  %6600 = vmatprep.mubr.bf16.mxu1 %v10980_v54  ;;  %v11078_v54 = vld [vmem:[#allocation5 + $0x68c] ss:$16 sps:$4 sm:$0xff]  }
 0x1a7   : > { %5526 = vmatpush1.bf16.msra.mxu0 %v10974_v55  ;;  %6656 = vmatpush1.bf16.msra.mxu1 %v10977_v56  ;;  %v11072_v55 = vld [vmem:[%s12908_s17 + $0x150] ss:$80 sps:$4 sm:$0xff]  }
 0x1a8   : > { %5527 = vmatprep.subr.bf16.mxu0 %v10985_v57  ;;  %6657 = vmatprep.subr.bf16.mxu1 %v10988_v58  ;;  %v11073_v56 = vld [vmem:[#allocation5 + $0x680] ss:$16 sps:$4 sm:$0xff]   ;;  %v11076_v57 = vld [vmem:[#allocation5 + $0x688] ss:$16 sps:$4 sm:$0xff]   ;;  %v11081_v58 = vld [vmem:[#allocation5 + $0x6a4] ss:$16 sps:$4 sm:$0xff]  }
 0x1aa   : > { %5471 = vmatmul.mubr.bf16.gmra.mrb[16].mxu0 %v10982_v59  ;;  %6601 = vmatmul.mubr.bf16.gmra.mrb[16].mxu1 %v10982_v59  ;;  %v11084_v59 = vld [vmem:[#allocation5 + $0x6ac] ss:$16 sps:$4 sm:$0xff]  }
 0x1ab   : > { %5528 = vmatpush1.bf16.msra.mxu0 %v10983_v60  ;;  %6658 = vmatpush1.bf16.msra.mxu1 %v10986_v61  ;;  %v11085_v60 = vld [vmem:[%s12908_s17 + $0x1f4] ss:$80 sps:$4 sm:$0xff]   ;;  %v11079_v61 = vld [vmem:[#allocation5 + $0x6a0] ss:$16 sps:$4 sm:$0xff]  }
 0x1ac   : > { %5529 = vmatprep.subr.bf16.mxu0 %v10991_v62  ;;  %6659 = vmatprep.subr.bf16.mxu1 %v10994_v63  ;;  %v11082_v62 = vld [vmem:[#allocation5 + $0x6a8] ss:$16 sps:$4 sm:$0xff]   ;;  %v11090_v63 = vld [vmem:[#allocation5 + $0x6c4] ss:$16 sps:$4 sm:$0xff]  }
 0x1ad   : > { %5480 = vmatprep.mubr.bf16.mxu0 %v10995_v0  ;;  %6610 = vmatprep.mubr.bf16.mxu1 %v10995_v0  ;;  %v11093_v0 = vld [vmem:[#allocation5 + $0x6cc] ss:$16 sps:$4 sm:$0xff]  }
 0x1af   : > { %5530 = vmatpush1.bf16.msra.mxu0 %v10989_v1  ;;  %6660 = vmatpush1.bf16.msra.mxu1 %v10992_v2  ;;  %v11087_v1 = vld [vmem:[%s12908_s17 + $0x1f0] ss:$80 sps:$4 sm:$0xff]  }
 0x1b0   : > { %5531 = vmatprep.subr.bf16.mxu0 %v11000_v3  ;;  %6661 = vmatprep.subr.bf16.mxu1 %v11003_v4  ;;  %v11088_v2 = vld [vmem:[#allocation5 + $0x6c0] ss:$16 sps:$4 sm:$0xff]   ;;  %v11091_v3 = vld [vmem:[#allocation5 + $0x6c8] ss:$16 sps:$4 sm:$0xff]   ;;  %v11096_v4 = vld [vmem:[#allocation5 + $0x6e4] ss:$16 sps:$4 sm:$0xff]  }
 0x1b2   : > { %5481 = vmatmul.mubr.bf16.gmra.mrb[20].mxu0 %v10997_v5  ;;  %6611 = vmatmul.mubr.bf16.gmra.mrb[20].mxu1 %v10997_v5  ;;  %v11099_v5 = vld [vmem:[#allocation5 + $0x6ec] ss:$16 sps:$4 sm:$0xff]  }
 0x1b3   : > { %5532 = vmatpush1.bf16.msra.mxu0 %v10998_v6  ;;  %6662 = vmatpush1.bf16.msra.mxu1 %v11001_v7  ;;  %v11100_v6 = vld [vmem:[%s12908_s17 + $0x294] ss:$80 sps:$4 sm:$0xff]   ;;  %v11094_v7 = vld [vmem:[#allocation5 + $0x6e0] ss:$16 sps:$4 sm:$0xff]  }
 0x1b4   : > { %5533 = vmatprep.subr.bf16.mxu0 %v11006_v8  ;;  %6663 = vmatprep.subr.bf16.mxu1 %v11009_v9  ;;  %v11097_v8 = vld [vmem:[#allocation5 + $0x6e8] ss:$16 sps:$4 sm:$0xff]   ;;  %v11105_v9 = vld [vmem:[#allocation5 + $0x704] ss:$16 sps:$4 sm:$0xff]  }
 0x1b5   : > { %5490 = vmatprep.mubr.bf16.mxu0 %v11010_v10  ;;  %6620 = vmatprep.mubr.bf16.mxu1 %v11010_v10  ;;  %v11108_v10 = vld [vmem:[#allocation5 + $0x70c] ss:$16 sps:$4 sm:$0xff]  }
 0x1b7   : > { %5534 = vmatpush1.bf16.msra.mxu0 %v11004_v11  ;;  %6664 = vmatpush1.bf16.msra.mxu1 %v11007_v12  ;;  %v11102_v11 = vld [vmem:[%s12908_s17 + $0x290] ss:$80 sps:$4 sm:$0xff]  }
 0x1b8   : > { %5535 = vmatprep.subr.bf16.mxu0 %v11015_v13  ;;  %6665 = vmatprep.subr.bf16.mxu1 %v11018_v14  ;;  %v11103_v12 = vld [vmem:[#allocation5 + $0x700] ss:$16 sps:$4 sm:$0xff]   ;;  %v11106_v13 = vld [vmem:[#allocation5 + $0x708] ss:$16 sps:$4 sm:$0xff]   ;;  %v11111_v14 = vld [vmem:[#allocation5 + $0x724] ss:$16 sps:$4 sm:$0xff]  }
 0x1ba   : > { %5491 = vmatmul.mubr.bf16.gmra.mrb[24].mxu0 %v11012_v15  ;;  %6621 = vmatmul.mubr.bf16.gmra.mrb[24].mxu1 %v11012_v15  ;;  %v11114_v15 = vld [vmem:[#allocation5 + $0x72c] ss:$16 sps:$4 sm:$0xff]  }
 0x1bb   : > { %5536 = vmatpush1.bf16.msra.mxu0 %v11013_v16  ;;  %6666 = vmatpush1.bf16.msra.mxu1 %v11016_v17  ;;  %v11115_v16 = vld [vmem:[%s12908_s17 + $0x334] ss:$80 sps:$4 sm:$0xff]   ;;  %v11109_v17 = vld [vmem:[#allocation5 + $0x720] ss:$16 sps:$4 sm:$0xff]  }
 0x1bc   : > { %5537 = vmatprep.subr.bf16.mxu0 %v11021_v18  ;;  %6667 = vmatprep.subr.bf16.mxu1 %v11024_v19  ;;  %v11112_v18 = vld [vmem:[#allocation5 + $0x728] ss:$16 sps:$4 sm:$0xff]   ;;  %v11120_v19 = vld [vmem:[#allocation5 + $0x744] ss:$16 sps:$4 sm:$0xff]  }
 0x1bd   : > { %5500 = vmatprep.mubr.bf16.mxu0 %v11025_v20  ;;  %6630 = vmatprep.mubr.bf16.mxu1 %v11025_v20  ;;  %v11123_v20 = vld [vmem:[#allocation5 + $0x74c] ss:$16 sps:$4 sm:$0xff]  }
 0x1bf   : > { %5538 = vmatpush1.bf16.msra.mxu0 %v11019_v21  ;;  %6668 = vmatpush1.bf16.msra.mxu1 %v11022_v22  ;;  %v11117_v21 = vld [vmem:[%s12908_s17 + $0x330] ss:$80 sps:$4 sm:$0xff]  }
 0x1c0   : > { %5539 = vmatprep.subr.bf16.mxu0 %v11030_v23  ;;  %6669 = vmatprep.subr.bf16.mxu1 %v11033_v24  ;;  %v11118_v22 = vld [vmem:[#allocation5 + $0x740] ss:$16 sps:$4 sm:$0xff]   ;;  %v11121_v23 = vld [vmem:[#allocation5 + $0x748] ss:$16 sps:$4 sm:$0xff]   ;;  %v11126_v24 = vld [vmem:[#allocation5 + $0x764] ss:$16 sps:$4 sm:$0xff]  }
 0x1c2   : > { %5501 = vmatmul.mubr.bf16.gmra.mrb[28].mxu0 %v11027_v25  ;;  %6631 = vmatmul.mubr.bf16.gmra.mrb[28].mxu1 %v11027_v25  ;;  %v11129_v25 = vld [vmem:[#allocation5 + $0x76c] ss:$16 sps:$4 sm:$0xff]  }
 0x1c3   : > { %5540 = vmatpush1.bf16.msra.mxu0 %v11028_v26  ;;  %6670 = vmatpush1.bf16.msra.mxu1 %v11031_v27  ;;  %v11130_v26 = vld [vmem:[%s12908_s17 + $0x3d4] ss:$80 sps:$4 sm:$0xff]   ;;  %v11124_v27 = vld [vmem:[#allocation5 + $0x760] ss:$16 sps:$4 sm:$0xff]  }
 0x1c4   : > { %5541 = vmatprep.subr.bf16.mxu0 %v11036_v28  ;;  %6671 = vmatprep.subr.bf16.mxu1 %v11039_v29  ;;  %v11127_v28 = vld [vmem:[#allocation5 + $0x768] ss:$16 sps:$4 sm:$0xff]   ;;  %v11135_v29 = vld [vmem:[#allocation5 + $0x784] ss:$16 sps:$4 sm:$0xff]  }
 0x1c5   : > { %5543 = vmatprep.mubr.bf16.mxu0 %v11042_v30  ;;  %6673 = vmatprep.mubr.bf16.mxu1 %v11042_v30  ;;  %v11138_v30 = vld [vmem:[#allocation5 + $0x78c] ss:$16 sps:$4 sm:$0xff]  }
 0x1c7   : > { %5542 = vmatpush1.bf16.msra.mxu0 %v11034_v31  ;;  %6672 = vmatpush1.bf16.msra.mxu1 %v11037_v32  ;;  %v11132_v31 = vld [vmem:[%s12908_s17 + $0x3d0] ss:$80 sps:$4 sm:$0xff]  }
 0x1c8   : > { %5624 = vmatprep.subr.bf16.mxu0 %v11045_v33  ;;  %6754 = vmatprep.subr.bf16.mxu1 %v11048_v34  ;;  %v11133_v32 = vld [vmem:[#allocation5 + $0x780] ss:$16 sps:$4 sm:$0xff]   ;;  %v11136_v33 = vld [vmem:[#allocation5 + $0x788] ss:$16 sps:$4 sm:$0xff]   ;;  %v11141_v34 = vld [vmem:[#allocation5 + $0x7a4] ss:$16 sps:$4 sm:$0xff]  }
 0x1ca   : > { %5544 = vmatmul.mubr.bf16.vlgmr.msra.gmra.mrb[0].mxu0 %v11040_v35  ;;  %6674 = vmatmul.mubr.bf16.vlgmr.msra.gmra.mrb[0].mxu1 %v11040_v35  ;;  %v11144_v35 = vld [vmem:[#allocation5 + $0x7ac] ss:$16 sps:$4 sm:$0xff]  }
 0x1cb   : > { %5625 = vmatpush1.bf16.msra.mxu0 %v11043_v36  ;;  %6755 = vmatpush1.bf16.msra.mxu1 %v11046_v37  ;;  %v11145_v36 = vld [vmem:[%s12908_s17 + $0x474] ss:$80 sps:$4 sm:$0xff]   ;;  %v11139_v37 = vld [vmem:[#allocation5 + $0x7a0] ss:$16 sps:$4 sm:$0xff]  }
 0x1cc   : > { %5626 = vmatprep.subr.bf16.mxu0 %v11051_v38  ;;  %6756 = vmatprep.subr.bf16.mxu1 %v11054_v39  ;;  %v11142_v38 = vld [vmem:[#allocation5 + $0x7a8] ss:$16 sps:$4 sm:$0xff]   ;;  %v11150_v39 = vld [vmem:[#allocation5 + $0x7c4] ss:$16 sps:$4 sm:$0xff]  }
 0x1cd   : > { %5553 = vmatprep.mubr.bf16.mxu0 %v11055_v40  ;;  %6683 = vmatprep.mubr.bf16.mxu1 %v11055_v40  ;;  %v11153_v40 = vld [vmem:[#allocation5 + $0x7cc] ss:$16 sps:$4 sm:$0xff]  }
 0x1cf   : > { %5627 = vmatpush1.bf16.msra.mxu0 %v11049_v41  ;;  %6757 = vmatpush1.bf16.msra.mxu1 %v11052_v42  ;;  %v11147_v41 = vld [vmem:[%s12908_s17 + $0x470] ss:$80 sps:$4 sm:$0xff]  }
 0x1d0   : > { %5628 = vmatprep.subr.bf16.mxu0 %v11060_v43  ;;  %6758 = vmatprep.subr.bf16.mxu1 %v11063_v44  ;;  %v11148_v42 = vld [vmem:[#allocation5 + $0x7c0] ss:$16 sps:$4 sm:$0xff]   ;;  %v11151_v43 = vld [vmem:[#allocation5 + $0x7c8] ss:$16 sps:$4 sm:$0xff]   ;;  %v11156_v44 = vld [vmem:[#allocation5 + $0x7e4] ss:$16 sps:$4 sm:$0xff]  }
 0x1d2   : > { %5554 = vmatmul.mubr.bf16.gmra.mrb[4].mxu0 %v11057_v45  ;;  %6684 = vmatmul.mubr.bf16.gmra.mrb[4].mxu1 %v11057_v45  ;;  %v11159_v45 = vld [vmem:[#allocation5 + $0x7ec] ss:$16 sps:$4 sm:$0xff]  }
 0x1d3   : > { %5629 = vmatpush1.bf16.msra.mxu0 %v11058_v46  ;;  %6759 = vmatpush1.bf16.msra.mxu1 %v11061_v47  ;;  %v11162_v46 = vld [vmem:[%s12908_s17 + $0x1c] ss:$80 sps:$4 sm:$0xff]   ;;  %v11154_v47 = vld [vmem:[#allocation5 + $0x7e0] ss:$16 sps:$4 sm:$0xff]  }
 0x1d4   : > { %5630 = vmatprep.subr.bf16.mxu0 %v11066_v48  ;;  %6760 = vmatprep.subr.bf16.mxu1 %v11069_v49  ;;  %v11157_v48 = vld [vmem:[#allocation5 + $0x7e8] ss:$16 sps:$4 sm:$0xff]   ;;  %v11165_v49 = vld [vmem:[#allocation5 + $0x804] ss:$16 sps:$4 sm:$0xff]  }
 0x1d5   : > { %5563 = vmatprep.mubr.bf16.mxu0 %v11070_v50  ;;  %6693 = vmatprep.mubr.bf16.mxu1 %v11070_v50  ;;  %v11168_v50 = vld [vmem:[#allocation5 + $0x80c] ss:$16 sps:$4 sm:$0xff]  }
 0x1d7   : > { %5631 = vmatpush1.bf16.msra.mxu0 %v11064_v51  ;;  %6761 = vmatpush1.bf16.msra.mxu1 %v11067_v52  ;;  %v11160_v51 = vld [vmem:[%s12908_s17 + $0x18] ss:$80 sps:$4 sm:$0xff]   ;;  %v11163_v52 = vld [vmem:[#allocation5 + $0x800] ss:$16 sps:$4 sm:$0xff]  }
 0x1d8   : > { %5632 = vmatprep.subr.bf16.mxu0 %v11075_v53  ;;  %6762 = vmatprep.subr.bf16.mxu1 %v11078_v54  ;;  %v11166_v53 = vld [vmem:[#allocation5 + $0x808] ss:$16 sps:$4 sm:$0xff]   ;;  %v11171_v54 = vld [vmem:[#allocation5 + $0x824] ss:$16 sps:$4 sm:$0xff]  }
 0x1da   : > { %5564 = vmatmul.mubr.bf16.gmra.mrb[8].mxu0 %v11072_v55  ;;  %6694 = vmatmul.mubr.bf16.gmra.mrb[8].mxu1 %v11072_v55  ;;  %v11174_v55 = vld [vmem:[#allocation5 + $0x82c] ss:$16 sps:$4 sm:$0xff]  }
 0x1db   : > { %5633 = vmatpush1.bf16.msra.mxu0 %v11073_v56  ;;  %6763 = vmatpush1.bf16.msra.mxu1 %v11076_v57  ;;  %v11175_v56 = vld [vmem:[%s12908_s17 + $0xbc] ss:$80 sps:$4 sm:$0xff]   ;;  %v11169_v57 = vld [vmem:[#allocation5 + $0x820] ss:$16 sps:$4 sm:$0xff]  }
 0x1dc   : > { %5634 = vmatprep.subr.bf16.mxu0 %v11081_v58  ;;  %6764 = vmatprep.subr.bf16.mxu1 %v11084_v59  ;;  %v11172_v58 = vld [vmem:[#allocation5 + $0x828] ss:$16 sps:$4 sm:$0xff]   ;;  %v11180_v59 = vld [vmem:[#allocation5 + $0x844] ss:$16 sps:$4 sm:$0xff]  }
 0x1dd   : > { %5573 = vmatprep.mubr.bf16.mxu0 %v11085_v60  ;;  %6703 = vmatprep.mubr.bf16.mxu1 %v11085_v60  ;;  %v11183_v60 = vld [vmem:[#allocation5 + $0x84c] ss:$16 sps:$4 sm:$0xff]  }
 0x1df   : > { %5635 = vmatpush1.bf16.msra.mxu0 %v11079_v61  ;;  %6765 = vmatpush1.bf16.msra.mxu1 %v11082_v62  ;;  %v11177_v61 = vld [vmem:[%s12908_s17 + $0xb8] ss:$80 sps:$4 sm:$0xff]   ;;  %v11178_v62 = vld [vmem:[#allocation5 + $0x840] ss:$16 sps:$4 sm:$0xff]  }
 0x1e0   : > { %5636 = vmatprep.subr.bf16.mxu0 %v11090_v63  ;;  %6766 = vmatprep.subr.bf16.mxu1 %v11093_v0  ;;  %v11181_v63 = vld [vmem:[#allocation5 + $0x848] ss:$16 sps:$4 sm:$0xff]   ;;  %v11186_v0 = vld [vmem:[#allocation5 + $0x864] ss:$16 sps:$4 sm:$0xff]  }
 0x1e2   : > { %5574 = vmatmul.mubr.bf16.gmra.mrb[12].mxu0 %v11087_v1  ;;  %6704 = vmatmul.mubr.bf16.gmra.mrb[12].mxu1 %v11087_v1  ;;  %v11189_v1 = vld [vmem:[#allocation5 + $0x86c] ss:$16 sps:$4 sm:$0xff]  }
 0x1e3   : > { %5637 = vmatpush1.bf16.msra.mxu0 %v11088_v2  ;;  %6767 = vmatpush1.bf16.msra.mxu1 %v11091_v3  ;;  %v11190_v2 = vld [vmem:[%s12908_s17 + $0x15c] ss:$80 sps:$4 sm:$0xff]   ;;  %v11184_v3 = vld [vmem:[#allocation5 + $0x860] ss:$16 sps:$4 sm:$0xff]  }
 0x1e4   : > { %5638 = vmatprep.subr.bf16.mxu0 %v11096_v4  ;;  %6768 = vmatprep.subr.bf16.mxu1 %v11099_v5  ;;  %v11187_v4 = vld [vmem:[#allocation5 + $0x868] ss:$16 sps:$4 sm:$0xff]   ;;  %v11195_v5 = vld [vmem:[#allocation5 + $0x884] ss:$16 sps:$4 sm:$0xff]  }
 0x1e5   : > { %5583 = vmatprep.mubr.bf16.mxu0 %v11100_v6  ;;  %6713 = vmatprep.mubr.bf16.mxu1 %v11100_v6  ;;  %v11198_v6 = vld [vmem:[#allocation5 + $0x88c] ss:$16 sps:$4 sm:$0xff]  }
 0x1e7   : > { %5639 = vmatpush1.bf16.msra.mxu0 %v11094_v7  ;;  %6769 = vmatpush1.bf16.msra.mxu1 %v11097_v8  ;;  %v11192_v7 = vld [vmem:[%s12908_s17 + $0x158] ss:$80 sps:$4 sm:$0xff]   ;;  %v11193_v8 = vld [vmem:[#allocation5 + $0x880] ss:$16 sps:$4 sm:$0xff]  }
 0x1e8   : > { %5640 = vmatprep.subr.bf16.mxu0 %v11105_v9  ;;  %6770 = vmatprep.subr.bf16.mxu1 %v11108_v10  ;;  %v11196_v9 = vld [vmem:[#allocation5 + $0x888] ss:$16 sps:$4 sm:$0xff]   ;;  %v11201_v10 = vld [vmem:[#allocation5 + $0x8a4] ss:$16 sps:$4 sm:$0xff]  }
 0x1ea   : > { %5584 = vmatmul.mubr.bf16.gmra.mrb[16].mxu0 %v11102_v11  ;;  %6714 = vmatmul.mubr.bf16.gmra.mrb[16].mxu1 %v11102_v11  ;;  %v11204_v11 = vld [vmem:[#allocation5 + $0x8ac] ss:$16 sps:$4 sm:$0xff]  }
 0x1eb   : > { %5641 = vmatpush1.bf16.msra.mxu0 %v11103_v12  ;;  %6771 = vmatpush1.bf16.msra.mxu1 %v11106_v13  ;;  %v11205_v12 = vld [vmem:[%s12908_s17 + $0x1fc] ss:$80 sps:$4 sm:$0xff]   ;;  %v11199_v13 = vld [vmem:[#allocation5 + $0x8a0] ss:$16 sps:$4 sm:$0xff]  }
 0x1ec   : > { %5642 = vmatprep.subr.bf16.mxu0 %v11111_v14  ;;  %6772 = vmatprep.subr.bf16.mxu1 %v11114_v15  ;;  %v11202_v14 = vld [vmem:[#allocation5 + $0x8a8] ss:$16 sps:$4 sm:$0xff]   ;;  %v11210_v15 = vld [vmem:[#allocation5 + $0x8c4] ss:$16 sps:$4 sm:$0xff]  }
 0x1ed   : > { %5593 = vmatprep.mubr.bf16.mxu0 %v11115_v16  ;;  %6723 = vmatprep.mubr.bf16.mxu1 %v11115_v16  ;;  %v11213_v16 = vld [vmem:[#allocation5 + $0x8cc] ss:$16 sps:$4 sm:$0xff]  }
 0x1ef   : > { %5643 = vmatpush1.bf16.msra.mxu0 %v11109_v17  ;;  %6773 = vmatpush1.bf16.msra.mxu1 %v11112_v18  ;;  %v11207_v17 = vld [vmem:[%s12908_s17 + $0x1f8] ss:$80 sps:$4 sm:$0xff]   ;;  %v11208_v18 = vld [vmem:[#allocation5 + $0x8c0] ss:$16 sps:$4 sm:$0xff]  }
 0x1f0   : > { %5644 = vmatprep.subr.bf16.mxu0 %v11120_v19  ;;  %6774 = vmatprep.subr.bf16.mxu1 %v11123_v20  ;;  %v11211_v19 = vld [vmem:[#allocation5 + $0x8c8] ss:$16 sps:$4 sm:$0xff]   ;;  %v11216_v20 = vld [vmem:[#allocation5 + $0x8e4] ss:$16 sps:$4 sm:$0xff]  }
 0x1f2   : > { %5594 = vmatmul.mubr.bf16.gmra.mrb[20].mxu0 %v11117_v21  ;;  %6724 = vmatmul.mubr.bf16.gmra.mrb[20].mxu1 %v11117_v21  ;;  %v11219_v21 = vld [vmem:[#allocation5 + $0x8ec] ss:$16 sps:$4 sm:$0xff]  }
 0x1f3   : > { %5645 = vmatpush1.bf16.msra.mxu0 %v11118_v22  ;;  %6775 = vmatpush1.bf16.msra.mxu1 %v11121_v23  ;;  %v11220_v22 = vld [vmem:[%s12908_s17 + $0x29c] ss:$80 sps:$4 sm:$0xff]   ;;  %v11214_v23 = vld [vmem:[#allocation5 + $0x8e0] ss:$16 sps:$4 sm:$0xff]  }
 0x1f4   : > { %5646 = vmatprep.subr.bf16.mxu0 %v11126_v24  ;;  %6776 = vmatprep.subr.bf16.mxu1 %v11129_v25  ;;  %v11217_v24 = vld [vmem:[#allocation5 + $0x8e8] ss:$16 sps:$4 sm:$0xff]   ;;  %v11225_v25 = vld [vmem:[#allocation5 + $0x904] ss:$16 sps:$4 sm:$0xff]  }
 0x1f5   : > { %5603 = vmatprep.mubr.bf16.mxu0 %v11130_v26  ;;  %6733 = vmatprep.mubr.bf16.mxu1 %v11130_v26  ;;  %v11228_v26 = vld [vmem:[#allocation5 + $0x90c] ss:$16 sps:$4 sm:$0xff]  }
 0x1f7   : > { %5647 = vmatpush1.bf16.msra.mxu0 %v11124_v27  ;;  %6777 = vmatpush1.bf16.msra.mxu1 %v11127_v28  ;;  %v11222_v27 = vld [vmem:[%s12908_s17 + $0x298] ss:$80 sps:$4 sm:$0xff]   ;;  %v11223_v28 = vld [vmem:[#allocation5 + $0x900] ss:$16 sps:$4 sm:$0xff]  }
 0x1f8   : > { %5648 = vmatprep.subr.bf16.mxu0 %v11135_v29  ;;  %6778 = vmatprep.subr.bf16.mxu1 %v11138_v30  ;;  %v11226_v29 = vld [vmem:[#allocation5 + $0x908] ss:$16 sps:$4 sm:$0xff]   ;;  %v11231_v30 = vld [vmem:[#allocation5 + $0x924] ss:$16 sps:$4 sm:$0xff]  }
 0x1fa   : > { %5604 = vmatmul.mubr.bf16.gmra.mrb[24].mxu0 %v11132_v31  ;;  %6734 = vmatmul.mubr.bf16.gmra.mrb[24].mxu1 %v11132_v31  ;;  %v11234_v31 = vld [vmem:[#allocation5 + $0x92c] ss:$16 sps:$4 sm:$0xff]  }
 0x1fb   : > { %5649 = vmatpush1.bf16.msra.mxu0 %v11133_v32  ;;  %6779 = vmatpush1.bf16.msra.mxu1 %v11136_v33  ;;  %v11235_v32 = vld [vmem:[%s12908_s17 + $0x33c] ss:$80 sps:$4 sm:$0xff]   ;;  %v11229_v33 = vld [vmem:[#allocation5 + $0x920] ss:$16 sps:$4 sm:$0xff]  }
 0x1fc   : > { %5650 = vmatprep.subr.bf16.mxu0 %v11141_v34  ;;  %6780 = vmatprep.subr.bf16.mxu1 %v11144_v35  ;;  %v11232_v34 = vld [vmem:[#allocation5 + $0x928] ss:$16 sps:$4 sm:$0xff]   ;;  %v11240_v35 = vld [vmem:[#allocation5 + $0x944] ss:$16 sps:$4 sm:$0xff]  }
 0x1fd   : > { %5613 = vmatprep.mubr.bf16.mxu0 %v11145_v36  ;;  %6743 = vmatprep.mubr.bf16.mxu1 %v11145_v36  ;;  %v11243_v36 = vld [vmem:[#allocation5 + $0x94c] ss:$16 sps:$4 sm:$0xff]  }
 0x1ff   : > { %5651 = vmatpush1.bf16.msra.mxu0 %v11139_v37  ;;  %6781 = vmatpush1.bf16.msra.mxu1 %v11142_v38  ;;  %v11237_v37 = vld [vmem:[%s12908_s17 + $0x338] ss:$80 sps:$4 sm:$0xff]   ;;  %v11238_v38 = vld [vmem:[#allocation5 + $0x940] ss:$16 sps:$4 sm:$0xff]  }
 0x200   : > { %5652 = vmatprep.subr.bf16.mxu0 %v11150_v39  ;;  %6782 = vmatprep.subr.bf16.mxu1 %v11153_v40  ;;  %v11241_v39 = vld [vmem:[#allocation5 + $0x948] ss:$16 sps:$4 sm:$0xff]   ;;  %v11246_v40 = vld [vmem:[#allocation5 + $0x964] ss:$16 sps:$4 sm:$0xff]  }
 0x202   : > { %5614 = vmatmul.mubr.bf16.gmra.mrb[28].mxu0 %v11147_v41  ;;  %6744 = vmatmul.mubr.bf16.gmra.mrb[28].mxu1 %v11147_v41  ;;  %v11249_v41 = vld [vmem:[#allocation5 + $0x96c] ss:$16 sps:$4 sm:$0xff]  }
 0x203   : > { %5653 = vmatpush1.bf16.msra.mxu0 %v11148_v42  ;;  %6783 = vmatpush1.bf16.msra.mxu1 %v11151_v43  ;;  %v11250_v42 = vld [vmem:[%s12908_s17 + $0x3dc] ss:$80 sps:$4 sm:$0xff]   ;;  %v11244_v43 = vld [vmem:[#allocation5 + $0x960] ss:$16 sps:$4 sm:$0xff]  }
 0x204   : > { %5654 = vmatprep.subr.bf16.mxu0 %v11156_v44  ;;  %6784 = vmatprep.subr.bf16.mxu1 %v11159_v45  ;;  %v11247_v44 = vld [vmem:[#allocation5 + $0x968] ss:$16 sps:$4 sm:$0xff]   ;;  %v11255_v45 = vld [vmem:[#allocation5 + $0x984] ss:$16 sps:$4 sm:$0xff]  }
 0x205   : > { %5656 = vmatprep.mubr.bf16.mxu0 %v11162_v46  ;;  %6786 = vmatprep.mubr.bf16.mxu1 %v11162_v46  ;;  %v11258_v46 = vld [vmem:[#allocation5 + $0x98c] ss:$16 sps:$4 sm:$0xff]  }
 0x207   : > { %5655 = vmatpush1.bf16.msra.mxu0 %v11154_v47  ;;  %6785 = vmatpush1.bf16.msra.mxu1 %v11157_v48  ;;  %v11252_v47 = vld [vmem:[%s12908_s17 + $0x3d8] ss:$80 sps:$4 sm:$0xff]   ;;  %v11253_v48 = vld [vmem:[#allocation5 + $0x980] ss:$16 sps:$4 sm:$0xff]  }
 0x208   : > { %5737 = vmatprep.subr.bf16.mxu0 %v11165_v49  ;;  %6867 = vmatprep.subr.bf16.mxu1 %v11168_v50  ;;  %v11256_v49 = vld [vmem:[#allocation5 + $0x988] ss:$16 sps:$4 sm:$0xff]   ;;  %v11261_v50 = vld [vmem:[#allocation5 + $0x9a4] ss:$16 sps:$4 sm:$0xff]  }
 0x20a   : > { %5657 = vmatmul.mubr.bf16.vlgmr.msra.gmra.mrb[0].mxu0 %v11160_v51  ;;  %6787 = vmatmul.mubr.bf16.vlgmr.msra.gmra.mrb[0].mxu1 %v11160_v51  ;;  %v11264_v51 = vld [vmem:[#allocation5 + $0x9ac] ss:$16 sps:$4 sm:$0xff]  }
 0x20b   : > { %5738 = vmatpush1.bf16.msra.mxu0 %v11163_v52  ;;  %6868 = vmatpush1.bf16.msra.mxu1 %v11166_v53  ;;  %v11265_v52 = vld [vmem:[%s12908_s17 + $0x47c] ss:$80 sps:$4 sm:$0xff]   ;;  %v11259_v53 = vld [vmem:[#allocation5 + $0x9a0] ss:$16 sps:$4 sm:$0xff]  }
 0x20c   : > { %5739 = vmatprep.subr.bf16.mxu0 %v11171_v54  ;;  %6869 = vmatprep.subr.bf16.mxu1 %v11174_v55  ;;  %v11262_v54 = vld [vmem:[#allocation5 + $0x9a8] ss:$16 sps:$4 sm:$0xff]   ;;  %v11270_v55 = vld [vmem:[#allocation5 + $0x9c4] ss:$16 sps:$4 sm:$0xff]  }
 0x20d   : > { %5666 = vmatprep.mubr.bf16.mxu0 %v11175_v56  ;;  %6796 = vmatprep.mubr.bf16.mxu1 %v11175_v56  ;;  %v11273_v56 = vld [vmem:[#allocation5 + $0x9cc] ss:$16 sps:$4 sm:$0xff]  }
 0x20f   : > { %5740 = vmatpush1.bf16.msra.mxu0 %v11169_v57  ;;  %6870 = vmatpush1.bf16.msra.mxu1 %v11172_v58  ;;  %v11267_v57 = vld [vmem:[%s12908_s17 + $0x478] ss:$80 sps:$4 sm:$0xff]   ;;  %v11268_v58 = vld [vmem:[#allocation5 + $0x9c0] ss:$16 sps:$4 sm:$0xff]  }
 0x210   : > { %5741 = vmatprep.subr.bf16.mxu0 %v11180_v59  ;;  %6871 = vmatprep.subr.bf16.mxu1 %v11183_v60  ;;  %v11271_v59 = vld [vmem:[#allocation5 + $0x9c8] ss:$16 sps:$4 sm:$0xff]   ;;  %v11276_v60 = vld [vmem:[#allocation5 + $0x9e4] ss:$16 sps:$4 sm:$0xff]  }
 0x212   : > { %5667 = vmatmul.mubr.bf16.gmra.mrb[4].mxu0 %v11177_v61  ;;  %6797 = vmatmul.mubr.bf16.gmra.mrb[4].mxu1 %v11177_v61  ;;  %v11279_v61 = vld [vmem:[#allocation5 + $0x9ec] ss:$16 sps:$4 sm:$0xff]  }
 0x213   : > { %5742 = vmatpush1.bf16.msra.mxu0 %v11178_v62  ;;  %6872 = vmatpush1.bf16.msra.mxu1 %v11181_v63  ;;  %v11282_v62 = vld [vmem:[%s12908_s17 + $0x24] ss:$80 sps:$4 sm:$0xff]   ;;  %v11274_v63 = vld [vmem:[#allocation5 + $0x9e0] ss:$16 sps:$4 sm:$0xff]  }
 0x214   : > { %5743 = vmatprep.subr.bf16.mxu0 %v11186_v0  ;;  %6873 = vmatprep.subr.bf16.mxu1 %v11189_v1  ;;  %v11277_v0 = vld [vmem:[#allocation5 + $0x9e8] ss:$16 sps:$4 sm:$0xff]   ;;  %v11285_v1 = vld [vmem:[#allocation5 + $0xa04] ss:$16 sps:$4 sm:$0xff]  }
 0x215   : > { %5676 = vmatprep.mubr.bf16.mxu0 %v11190_v2  ;;  %6806 = vmatprep.mubr.bf16.mxu1 %v11190_v2  ;;  %v11288_v2 = vld [vmem:[#allocation5 + $0xa0c] ss:$16 sps:$4 sm:$0xff]  }
 0x217   : > { %5744 = vmatpush1.bf16.msra.mxu0 %v11184_v3  ;;  %6874 = vmatpush1.bf16.msra.mxu1 %v11187_v4  ;;  %v11280_v3 = vld [vmem:[%s12908_s17 + $0x20] ss:$80 sps:$4 sm:$0xff]  }
 0x218   : > { %5745 = vmatprep.subr.bf16.mxu0 %v11195_v5  ;;  %6875 = vmatprep.subr.bf16.mxu1 %v11198_v6  ;;  %v11283_v4 = vld [vmem:[#allocation5 + $0xa00] ss:$16 sps:$4 sm:$0xff]   ;;  %v11286_v5 = vld [vmem:[#allocation5 + $0xa08] ss:$16 sps:$4 sm:$0xff]   ;;  %v11291_v6 = vld [vmem:[#allocation5 + $0xa24] ss:$16 sps:$4 sm:$0xff]  }
 0x21a   : > { %5677 = vmatmul.mubr.bf16.gmra.mrb[8].mxu0 %v11192_v7  ;;  %6807 = vmatmul.mubr.bf16.gmra.mrb[8].mxu1 %v11192_v7  ;;  %v11294_v7 = vld [vmem:[#allocation5 + $0xa2c] ss:$16 sps:$4 sm:$0xff]  }
 0x21b   : > { %5746 = vmatpush1.bf16.msra.mxu0 %v11193_v8  ;;  %6876 = vmatpush1.bf16.msra.mxu1 %v11196_v9  ;;  %v11295_v8 = vld [vmem:[%s12908_s17 + $0xc4] ss:$80 sps:$4 sm:$0xff]   ;;  %v11289_v9 = vld [vmem:[#allocation5 + $0xa20] ss:$16 sps:$4 sm:$0xff]  }
 0x21c   : > { %5747 = vmatprep.subr.bf16.mxu0 %v11201_v10  ;;  %6877 = vmatprep.subr.bf16.mxu1 %v11204_v11  ;;  %v11292_v10 = vld [vmem:[#allocation5 + $0xa28] ss:$16 sps:$4 sm:$0xff]   ;;  %v11300_v11 = vld [vmem:[#allocation5 + $0xa44] ss:$16 sps:$4 sm:$0xff]  }
 0x21d   : > { %5686 = vmatprep.mubr.bf16.mxu0 %v11205_v12  ;;  %6816 = vmatprep.mubr.bf16.mxu1 %v11205_v12  ;;  %v11303_v12 = vld [vmem:[#allocation5 + $0xa4c] ss:$16 sps:$4 sm:$0xff]  }
 0x21f   : > { %5748 = vmatpush1.bf16.msra.mxu0 %v11199_v13  ;;  %6878 = vmatpush1.bf16.msra.mxu1 %v11202_v14  ;;  %v11297_v13 = vld [vmem:[%s12908_s17 + $0xc0] ss:$80 sps:$4 sm:$0xff]  }
 0x220   : > { %5749 = vmatprep.subr.bf16.mxu0 %v11210_v15  ;;  %6879 = vmatprep.subr.bf16.mxu1 %v11213_v16  ;;  %v11298_v14 = vld [vmem:[#allocation5 + $0xa40] ss:$16 sps:$4 sm:$0xff]   ;;  %v11301_v15 = vld [vmem:[#allocation5 + $0xa48] ss:$16 sps:$4 sm:$0xff]   ;;  %v11306_v16 = vld [vmem:[#allocation5 + $0xa64] ss:$16 sps:$4 sm:$0xff]  }
 0x222   : > { %5687 = vmatmul.mubr.bf16.gmra.mrb[12].mxu0 %v11207_v17  ;;  %6817 = vmatmul.mubr.bf16.gmra.mrb[12].mxu1 %v11207_v17  ;;  %v11309_v17 = vld [vmem:[#allocation5 + $0xa6c] ss:$16 sps:$4 sm:$0xff]  }
 0x223   : > { %5750 = vmatpush1.bf16.msra.mxu0 %v11208_v18  ;;  %6880 = vmatpush1.bf16.msra.mxu1 %v11211_v19  ;;  %v11310_v18 = vld [vmem:[%s12908_s17 + $0x164] ss:$80 sps:$4 sm:$0xff]   ;;  %v11304_v19 = vld [vmem:[#allocation5 + $0xa60] ss:$16 sps:$4 sm:$0xff]  }
 0x224   : > { %5751 = vmatprep.subr.bf16.mxu0 %v11216_v20  ;;  %6881 = vmatprep.subr.bf16.mxu1 %v11219_v21  ;;  %v11307_v20 = vld [vmem:[#allocation5 + $0xa68] ss:$16 sps:$4 sm:$0xff]   ;;  %v11315_v21 = vld [vmem:[#allocation5 + $0xa84] ss:$16 sps:$4 sm:$0xff]  }
 0x225   : > { %5696 = vmatprep.mubr.bf16.mxu0 %v11220_v22  ;;  %6826 = vmatprep.mubr.bf16.mxu1 %v11220_v22  ;;  %v11318_v22 = vld [vmem:[#allocation5 + $0xa8c] ss:$16 sps:$4 sm:$0xff]  }
 0x227   : > { %5752 = vmatpush1.bf16.msra.mxu0 %v11214_v23  ;;  %6882 = vmatpush1.bf16.msra.mxu1 %v11217_v24  ;;  %v11312_v23 = vld [vmem:[%s12908_s17 + $0x160] ss:$80 sps:$4 sm:$0xff]  }
 0x228   : > { %5753 = vmatprep.subr.bf16.mxu0 %v11225_v25  ;;  %6883 = vmatprep.subr.bf16.mxu1 %v11228_v26  ;;  %v11313_v24 = vld [vmem:[#allocation5 + $0xa80] ss:$16 sps:$4 sm:$0xff]   ;;  %v11316_v25 = vld [vmem:[#allocation5 + $0xa88] ss:$16 sps:$4 sm:$0xff]   ;;  %v11321_v26 = vld [vmem:[#allocation5 + $0xaa4] ss:$16 sps:$4 sm:$0xff]  }
 0x22a   : > { %5697 = vmatmul.mubr.bf16.gmra.mrb[16].mxu0 %v11222_v27  ;;  %6827 = vmatmul.mubr.bf16.gmra.mrb[16].mxu1 %v11222_v27  ;;  %v11324_v27 = vld [vmem:[#allocation5 + $0xaac] ss:$16 sps:$4 sm:$0xff]  }
 0x22b   : > { %5754 = vmatpush1.bf16.msra.mxu0 %v11223_v28  ;;  %6884 = vmatpush1.bf16.msra.mxu1 %v11226_v29  ;;  %v11325_v28 = vld [vmem:[%s12908_s17 + $0x204] ss:$80 sps:$4 sm:$0xff]   ;;  %v11319_v29 = vld [vmem:[#allocation5 + $0xaa0] ss:$16 sps:$4 sm:$0xff]  }
 0x22c   : > { %5755 = vmatprep.subr.bf16.mxu0 %v11231_v30  ;;  %6885 = vmatprep.subr.bf16.mxu1 %v11234_v31  ;;  %v11322_v30 = vld [vmem:[#allocation5 + $0xaa8] ss:$16 sps:$4 sm:$0xff]   ;;  %v11330_v31 = vld [vmem:[#allocation5 + $0xac4] ss:$16 sps:$4 sm:$0xff]  }
 0x22d   : > { %5706 = vmatprep.mubr.bf16.mxu0 %v11235_v32  ;;  %6836 = vmatprep.mubr.bf16.mxu1 %v11235_v32  ;;  %v11333_v32 = vld [vmem:[#allocation5 + $0xacc] ss:$16 sps:$4 sm:$0xff]  }
 0x22f   : > { %5756 = vmatpush1.bf16.msra.mxu0 %v11229_v33  ;;  %6886 = vmatpush1.bf16.msra.mxu1 %v11232_v34  ;;  %v11327_v33 = vld [vmem:[%s12908_s17 + $0x200] ss:$80 sps:$4 sm:$0xff]  }
 0x230   : > { %5757 = vmatprep.subr.bf16.mxu0 %v11240_v35  ;;  %6887 = vmatprep.subr.bf16.mxu1 %v11243_v36  ;;  %v11328_v34 = vld [vmem:[#allocation5 + $0xac0] ss:$16 sps:$4 sm:$0xff]   ;;  %v11331_v35 = vld [vmem:[#allocation5 + $0xac8] ss:$16 sps:$4 sm:$0xff]   ;;  %v11336_v36 = vld [vmem:[#allocation5 + $0xae4] ss:$16 sps:$4 sm:$0xff]  }
 0x232   : > { %5707 = vmatmul.mubr.bf16.gmra.mrb[20].mxu0 %v11237_v37  ;;  %6837 = vmatmul.mubr.bf16.gmra.mrb[20].mxu1 %v11237_v37  ;;  %v11339_v37 = vld [vmem:[#allocation5 + $0xaec] ss:$16 sps:$4 sm:$0xff]  }
 0x233   : > { %5758 = vmatpush1.bf16.msra.mxu0 %v11238_v38  ;;  %6888 = vmatpush1.bf16.msra.mxu1 %v11241_v39  ;;  %v11340_v38 = vld [vmem:[%s12908_s17 + $0x2a4] ss:$80 sps:$4 sm:$0xff]   ;;  %v11334_v39 = vld [vmem:[#allocation5 + $0xae0] ss:$16 sps:$4 sm:$0xff]  }
 0x234   : > { %5759 = vmatprep.subr.bf16.mxu0 %v11246_v40  ;;  %6889 = vmatprep.subr.bf16.mxu1 %v11249_v41  ;;  %v11337_v40 = vld [vmem:[#allocation5 + $0xae8] ss:$16 sps:$4 sm:$0xff]   ;;  %v11345_v41 = vld [vmem:[#allocation5 + $0xb04] ss:$16 sps:$4 sm:$0xff]  }
 0x235   : > { %5716 = vmatprep.mubr.bf16.mxu0 %v11250_v42  ;;  %6846 = vmatprep.mubr.bf16.mxu1 %v11250_v42  ;;  %v11348_v42 = vld [vmem:[#allocation5 + $0xb0c] ss:$16 sps:$4 sm:$0xff]  }
 0x237   : > { %5760 = vmatpush1.bf16.msra.mxu0 %v11244_v43  ;;  %6890 = vmatpush1.bf16.msra.mxu1 %v11247_v44  ;;  %v11342_v43 = vld [vmem:[%s12908_s17 + $0x2a0] ss:$80 sps:$4 sm:$0xff]  }
 0x238   : > { %5761 = vmatprep.subr.bf16.mxu0 %v11255_v45  ;;  %6891 = vmatprep.subr.bf16.mxu1 %v11258_v46  ;;  %v11343_v44 = vld [vmem:[#allocation5 + $0xb00] ss:$16 sps:$4 sm:$0xff]   ;;  %v11346_v45 = vld [vmem:[#allocation5 + $0xb08] ss:$16 sps:$4 sm:$0xff]   ;;  %v11351_v46 = vld [vmem:[#allocation5 + $0xb24] ss:$16 sps:$4 sm:$0xff]  }
 0x23a   : > { %5717 = vmatmul.mubr.bf16.gmra.mrb[24].mxu0 %v11252_v47  ;;  %6847 = vmatmul.mubr.bf16.gmra.mrb[24].mxu1 %v11252_v47  ;;  %v11354_v47 = vld [vmem:[#allocation5 + $0xb2c] ss:$16 sps:$4 sm:$0xff]  }
 0x23b   : > { %5762 = vmatpush1.bf16.msra.mxu0 %v11253_v48  ;;  %6892 = vmatpush1.bf16.msra.mxu1 %v11256_v49  ;;  %v11355_v48 = vld [vmem:[%s12908_s17 + $0x344] ss:$80 sps:$4 sm:$0xff]   ;;  %v11349_v49 = vld [vmem:[#allocation5 + $0xb20] ss:$16 sps:$4 sm:$0xff]  }
 0x23c   : > { %5763 = vmatprep.subr.bf16.mxu0 %v11261_v50  ;;  %6893 = vmatprep.subr.bf16.mxu1 %v11264_v51  ;;  %v11352_v50 = vld [vmem:[#allocation5 + $0xb28] ss:$16 sps:$4 sm:$0xff]   ;;  %v11360_v51 = vld [vmem:[#allocation5 + $0xb44] ss:$16 sps:$4 sm:$0xff]  }
 0x23d   : > { %5726 = vmatprep.mubr.bf16.mxu0 %v11265_v52  ;;  %6856 = vmatprep.mubr.bf16.mxu1 %v11265_v52  ;;  %v11363_v52 = vld [vmem:[#allocation5 + $0xb4c] ss:$16 sps:$4 sm:$0xff]  }
 0x23f   : > { %5764 = vmatpush1.bf16.msra.mxu0 %v11259_v53  ;;  %6894 = vmatpush1.bf16.msra.mxu1 %v11262_v54  ;;  %v11357_v53 = vld [vmem:[%s12908_s17 + $0x340] ss:$80 sps:$4 sm:$0xff]  }
 0x240   : > { %5765 = vmatprep.subr.bf16.mxu0 %v11270_v55  ;;  %6895 = vmatprep.subr.bf16.mxu1 %v11273_v56  ;;  %v11358_v54 = vld [vmem:[#allocation5 + $0xb40] ss:$16 sps:$4 sm:$0xff]   ;;  %v11361_v55 = vld [vmem:[#allocation5 + $0xb48] ss:$16 sps:$4 sm:$0xff]   ;;  %v11366_v56 = vld [vmem:[#allocation5 + $0xb64] ss:$16 sps:$4 sm:$0xff]  }
 0x242   : > { %5727 = vmatmul.mubr.bf16.gmra.mrb[28].mxu0 %v11267_v57  ;;  %6857 = vmatmul.mubr.bf16.gmra.mrb[28].mxu1 %v11267_v57  ;;  %v11369_v57 = vld [vmem:[#allocation5 + $0xb6c] ss:$16 sps:$4 sm:$0xff]  }
 0x243   : > { %5766 = vmatpush1.bf16.msra.mxu0 %v11268_v58  ;;  %6896 = vmatpush1.bf16.msra.mxu1 %v11271_v59  ;;  %v11370_v58 = vld [vmem:[%s12908_s17 + $0x3e4] ss:$80 sps:$4 sm:$0xff]   ;;  %v11364_v59 = vld [vmem:[#allocation5 + $0xb60] ss:$16 sps:$4 sm:$0xff]  }
 0x244   : > { %5767 = vmatprep.subr.bf16.mxu0 %v11276_v60  ;;  %6897 = vmatprep.subr.bf16.mxu1 %v11279_v61  ;;  %v11367_v60 = vld [vmem:[#allocation5 + $0xb68] ss:$16 sps:$4 sm:$0xff]   ;;  %v11375_v61 = vld [vmem:[#allocation5 + $0xb84] ss:$16 sps:$4 sm:$0xff]  }
 0x245   : > { %5769 = vmatprep.mubr.bf16.mxu0 %v11282_v62  ;;  %6899 = vmatprep.mubr.bf16.mxu1 %v11282_v62  ;;  %v11378_v62 = vld [vmem:[#allocation5 + $0xb8c] ss:$16 sps:$4 sm:$0xff]  }
 0x247   : > { %5768 = vmatpush1.bf16.msra.mxu0 %v11274_v63  ;;  %6898 = vmatpush1.bf16.msra.mxu1 %v11277_v0  ;;  %v11372_v63 = vld [vmem:[%s12908_s17 + $0x3e0] ss:$80 sps:$4 sm:$0xff]  }
 0x248   : > { %5850 = vmatprep.subr.bf16.mxu0 %v11285_v1  ;;  %6980 = vmatprep.subr.bf16.mxu1 %v11288_v2  ;;  %v11373_v0 = vld [vmem:[#allocation5 + $0xb80] ss:$16 sps:$4 sm:$0xff]   ;;  %v11376_v1 = vld [vmem:[#allocation5 + $0xb88] ss:$16 sps:$4 sm:$0xff]   ;;  %v11381_v2 = vld [vmem:[#allocation5 + $0xba4] ss:$16 sps:$4 sm:$0xff]  }
 0x24a   : > { %5770 = vmatmul.mubr.bf16.vlgmr.msra.gmra.mrb[0].mxu0 %v11280_v3  ;;  %6900 = vmatmul.mubr.bf16.vlgmr.msra.gmra.mrb[0].mxu1 %v11280_v3  ;;  %v11384_v3 = vld [vmem:[#allocation5 + $0xbac] ss:$16 sps:$4 sm:$0xff]  }
 0x24b   : > { %5851 = vmatpush1.bf16.msra.mxu0 %v11283_v4  ;;  %6981 = vmatpush1.bf16.msra.mxu1 %v11286_v5  ;;  %v11385_v4 = vld [vmem:[%s12908_s17 + $0x484] ss:$80 sps:$4 sm:$0xff]   ;;  %v11379_v5 = vld [vmem:[#allocation5 + $0xba0] ss:$16 sps:$4 sm:$0xff]  }
 0x24c   : > { %5852 = vmatprep.subr.bf16.mxu0 %v11291_v6  ;;  %6982 = vmatprep.subr.bf16.mxu1 %v11294_v7  ;;  %v11382_v6 = vld [vmem:[#allocation5 + $0xba8] ss:$16 sps:$4 sm:$0xff]   ;;  %v11390_v7 = vld [vmem:[#allocation5 + $0xbc4] ss:$16 sps:$4 sm:$0xff]  }
 0x24d   : > { %5779 = vmatprep.mubr.bf16.mxu0 %v11295_v8  ;;  %6909 = vmatprep.mubr.bf16.mxu1 %v11295_v8  ;;  %v11393_v8 = vld [vmem:[#allocation5 + $0xbcc] ss:$16 sps:$4 sm:$0xff]  }
 0x24f   : > { %5853 = vmatpush1.bf16.msra.mxu0 %v11289_v9  ;;  %6983 = vmatpush1.bf16.msra.mxu1 %v11292_v10  ;;  %v11387_v9 = vld [vmem:[%s12908_s17 + $0x480] ss:$80 sps:$4 sm:$0xff]  }
 0x250   : > { %5854 = vmatprep.subr.bf16.mxu0 %v11300_v11  ;;  %6984 = vmatprep.subr.bf16.mxu1 %v11303_v12  ;;  %v11388_v10 = vld [vmem:[#allocation5 + $0xbc0] ss:$16 sps:$4 sm:$0xff]   ;;  %v11391_v11 = vld [vmem:[#allocation5 + $0xbc8] ss:$16 sps:$4 sm:$0xff]   ;;  %v11396_v12 = vld [vmem:[#allocation5 + $0xbe4] ss:$16 sps:$4 sm:$0xff]  }
 0x252   : > { %5780 = vmatmul.mubr.bf16.gmra.mrb[4].mxu0 %v11297_v13  ;;  %6910 = vmatmul.mubr.bf16.gmra.mrb[4].mxu1 %v11297_v13  ;;  %v11399_v13 = vld [vmem:[#allocation5 + $0xbec] ss:$16 sps:$4 sm:$0xff]  }
 0x253   : > { %5855 = vmatpush1.bf16.msra.mxu0 %v11298_v14  ;;  %6985 = vmatpush1.bf16.msra.mxu1 %v11301_v15  ;;  %v11402_v14 = vld [vmem:[%s12908_s17 + $0x2c] ss:$80 sps:$4 sm:$0xff]   ;;  %v11394_v15 = vld [vmem:[#allocation5 + $0xbe0] ss:$16 sps:$4 sm:$0xff]  }
 0x254   : > { %5856 = vmatprep.subr.bf16.mxu0 %v11306_v16  ;;  %6986 = vmatprep.subr.bf16.mxu1 %v11309_v17  ;;  %v11397_v16 = vld [vmem:[#allocation5 + $0xbe8] ss:$16 sps:$4 sm:$0xff]   ;;  %v11405_v17 = vld [vmem:[#allocation5 + $0xc04] ss:$16 sps:$4 sm:$0xff]  }
 0x255   : > { %5789 = vmatprep.mubr.bf16.mxu0 %v11310_v18  ;;  %6919 = vmatprep.mubr.bf16.mxu1 %v11310_v18  ;;  %v11408_v18 = vld [vmem:[#allocation5 + $0xc0c] ss:$16 sps:$4 sm:$0xff]  }
 0x257   : > { %5857 = vmatpush1.bf16.msra.mxu0 %v11304_v19  ;;  %6987 = vmatpush1.bf16.msra.mxu1 %v11307_v20  ;;  %v11400_v19 = vld [vmem:[%s12908_s17 + $0x28] ss:$80 sps:$4 sm:$0xff]   ;;  %v11403_v20 = vld [vmem:[#allocation5 + $0xc00] ss:$16 sps:$4 sm:$0xff]  }
 0x258   : > { %5858 = vmatprep.subr.bf16.mxu0 %v11315_v21  ;;  %6988 = vmatprep.subr.bf16.mxu1 %v11318_v22  ;;  %v11406_v21 = vld [vmem:[#allocation5 + $0xc08] ss:$16 sps:$4 sm:$0xff]   ;;  %v11411_v22 = vld [vmem:[#allocation5 + $0xc24] ss:$16 sps:$4 sm:$0xff]  }
 0x25a   : > { %5790 = vmatmul.mubr.bf16.gmra.mrb[8].mxu0 %v11312_v23  ;;  %6920 = vmatmul.mubr.bf16.gmra.mrb[8].mxu1 %v11312_v23  ;;  %v11414_v23 = vld [vmem:[#allocation5 + $0xc2c] ss:$16 sps:$4 sm:$0xff]  }
 0x25b   : > { %5859 = vmatpush1.bf16.msra.mxu0 %v11313_v24  ;;  %6989 = vmatpush1.bf16.msra.mxu1 %v11316_v25  ;;  %v11415_v24 = vld [vmem:[%s12908_s17 + $0xcc] ss:$80 sps:$4 sm:$0xff]   ;;  %v11409_v25 = vld [vmem:[#allocation5 + $0xc20] ss:$16 sps:$4 sm:$0xff]  }
 0x25c   : > { %5860 = vmatprep.subr.bf16.mxu0 %v11321_v26  ;;  %6990 = vmatprep.subr.bf16.mxu1 %v11324_v27  ;;  %v11412_v26 = vld [vmem:[#allocation5 + $0xc28] ss:$16 sps:$4 sm:$0xff]   ;;  %v11420_v27 = vld [vmem:[#allocation5 + $0xc44] ss:$16 sps:$4 sm:$0xff]  }
 0x25d   : > { %5799 = vmatprep.mubr.bf16.mxu0 %v11325_v28  ;;  %6929 = vmatprep.mubr.bf16.mxu1 %v11325_v28  ;;  %v11423_v28 = vld [vmem:[#allocation5 + $0xc4c] ss:$16 sps:$4 sm:$0xff]  }
 0x25f   : > { %5861 = vmatpush1.bf16.msra.mxu0 %v11319_v29  ;;  %6991 = vmatpush1.bf16.msra.mxu1 %v11322_v30  ;;  %v11417_v29 = vld [vmem:[%s12908_s17 + $0xc8] ss:$80 sps:$4 sm:$0xff]   ;;  %v11418_v30 = vld [vmem:[#allocation5 + $0xc40] ss:$16 sps:$4 sm:$0xff]  }
 0x260   : > { %5862 = vmatprep.subr.bf16.mxu0 %v11330_v31  ;;  %6992 = vmatprep.subr.bf16.mxu1 %v11333_v32  ;;  %v11421_v31 = vld [vmem:[#allocation5 + $0xc48] ss:$16 sps:$4 sm:$0xff]   ;;  %v11426_v32 = vld [vmem:[#allocation5 + $0xc64] ss:$16 sps:$4 sm:$0xff]  }
 0x262   : > { %5800 = vmatmul.mubr.bf16.gmra.mrb[12].mxu0 %v11327_v33  ;;  %6930 = vmatmul.mubr.bf16.gmra.mrb[12].mxu1 %v11327_v33  ;;  %v11429_v33 = vld [vmem:[#allocation5 + $0xc6c] ss:$16 sps:$4 sm:$0xff]  }
 0x263   : > { %5863 = vmatpush1.bf16.msra.mxu0 %v11328_v34  ;;  %6993 = vmatpush1.bf16.msra.mxu1 %v11331_v35  ;;  %v11430_v34 = vld [vmem:[%s12908_s17 + $0x16c] ss:$80 sps:$4 sm:$0xff]   ;;  %v11424_v35 = vld [vmem:[#allocation5 + $0xc60] ss:$16 sps:$4 sm:$0xff]  }
 0x264   : > { %5864 = vmatprep.subr.bf16.mxu0 %v11336_v36  ;;  %6994 = vmatprep.subr.bf16.mxu1 %v11339_v37  ;;  %v11427_v36 = vld [vmem:[#allocation5 + $0xc68] ss:$16 sps:$4 sm:$0xff]   ;;  %v11435_v37 = vld [vmem:[#allocation5 + $0xc84] ss:$16 sps:$4 sm:$0xff]  }
 0x265   : > { %5809 = vmatprep.mubr.bf16.mxu0 %v11340_v38  ;;  %6939 = vmatprep.mubr.bf16.mxu1 %v11340_v38  ;;  %v11438_v38 = vld [vmem:[#allocation5 + $0xc8c] ss:$16 sps:$4 sm:$0xff]  }
 0x267   : > { %5865 = vmatpush1.bf16.msra.mxu0 %v11334_v39  ;;  %6995 = vmatpush1.bf16.msra.mxu1 %v11337_v40  ;;  %v11432_v39 = vld [vmem:[%s12908_s17 + $0x168] ss:$80 sps:$4 sm:$0xff]   ;;  %v11433_v40 = vld [vmem:[#allocation5 + $0xc80] ss:$16 sps:$4 sm:$0xff]  }
 0x268   : > { %5866 = vmatprep.subr.bf16.mxu0 %v11345_v41  ;;  %6996 = vmatprep.subr.bf16.mxu1 %v11348_v42  ;;  %v11436_v41 = vld [vmem:[#allocation5 + $0xc88] ss:$16 sps:$4 sm:$0xff]   ;;  %v11441_v42 = vld [vmem:[#allocation5 + $0xca4] ss:$16 sps:$4 sm:$0xff]  }
 0x26a   : > { %5810 = vmatmul.mubr.bf16.gmra.mrb[16].mxu0 %v11342_v43  ;;  %6940 = vmatmul.mubr.bf16.gmra.mrb[16].mxu1 %v11342_v43  ;;  %v11444_v43 = vld [vmem:[#allocation5 + $0xcac] ss:$16 sps:$4 sm:$0xff]  }
 0x26b   : > { %5867 = vmatpush1.bf16.msra.mxu0 %v11343_v44  ;;  %6997 = vmatpush1.bf16.msra.mxu1 %v11346_v45  ;;  %v11445_v44 = vld [vmem:[%s12908_s17 + $0x20c] ss:$80 sps:$4 sm:$0xff]   ;;  %v11439_v45 = vld [vmem:[#allocation5 + $0xca0] ss:$16 sps:$4 sm:$0xff]  }
 0x26c   : > { %5868 = vmatprep.subr.bf16.mxu0 %v11351_v46  ;;  %6998 = vmatprep.subr.bf16.mxu1 %v11354_v47  ;;  %v11442_v46 = vld [vmem:[#allocation5 + $0xca8] ss:$16 sps:$4 sm:$0xff]   ;;  %v11450_v47 = vld [vmem:[#allocation5 + $0xcc4] ss:$16 sps:$4 sm:$0xff]  }
 0x26d   : > { %5819 = vmatprep.mubr.bf16.mxu0 %v11355_v48  ;;  %6949 = vmatprep.mubr.bf16.mxu1 %v11355_v48  ;;  %v11453_v48 = vld [vmem:[#allocation5 + $0xccc] ss:$16 sps:$4 sm:$0xff]  }
 0x26f   : > { %5869 = vmatpush1.bf16.msra.mxu0 %v11349_v49  ;;  %6999 = vmatpush1.bf16.msra.mxu1 %v11352_v50  ;;  %v11447_v49 = vld [vmem:[%s12908_s17 + $0x208] ss:$80 sps:$4 sm:$0xff]   ;;  %v11448_v50 = vld [vmem:[#allocation5 + $0xcc0] ss:$16 sps:$4 sm:$0xff]  }
 0x270   : > { %5870 = vmatprep.subr.bf16.mxu0 %v11360_v51  ;;  %7000 = vmatprep.subr.bf16.mxu1 %v11363_v52  ;;  %v11451_v51 = vld [vmem:[#allocation5 + $0xcc8] ss:$16 sps:$4 sm:$0xff]   ;;  %v11456_v52 = vld [vmem:[#allocation5 + $0xce4] ss:$16 sps:$4 sm:$0xff]  }
 0x272   : > { %5820 = vmatmul.mubr.bf16.gmra.mrb[20].mxu0 %v11357_v53  ;;  %6950 = vmatmul.mubr.bf16.gmra.mrb[20].mxu1 %v11357_v53  ;;  %v11459_v53 = vld [vmem:[#allocation5 + $0xcec] ss:$16 sps:$4 sm:$0xff]  }
 0x273   : > { %5871 = vmatpush1.bf16.msra.mxu0 %v11358_v54  ;;  %7001 = vmatpush1.bf16.msra.mxu1 %v11361_v55  ;;  %v11460_v54 = vld [vmem:[%s12908_s17 + $0x2ac] ss:$80 sps:$4 sm:$0xff]   ;;  %v11454_v55 = vld [vmem:[#allocation5 + $0xce0] ss:$16 sps:$4 sm:$0xff]  }
 0x274   : > { %5872 = vmatprep.subr.bf16.mxu0 %v11366_v56  ;;  %7002 = vmatprep.subr.bf16.mxu1 %v11369_v57  ;;  %v11457_v56 = vld [vmem:[#allocation5 + $0xce8] ss:$16 sps:$4 sm:$0xff]   ;;  %v11465_v57 = vld [vmem:[#allocation5 + $0xd04] ss:$16 sps:$4 sm:$0xff]  }
 0x275   : > { %5829 = vmatprep.mubr.bf16.mxu0 %v11370_v58  ;;  %6959 = vmatprep.mubr.bf16.mxu1 %v11370_v58  ;;  %v11468_v58 = vld [vmem:[#allocation5 + $0xd0c] ss:$16 sps:$4 sm:$0xff]  }
 0x277   : > { %5873 = vmatpush1.bf16.msra.mxu0 %v11364_v59  ;;  %7003 = vmatpush1.bf16.msra.mxu1 %v11367_v60  ;;  %v11462_v59 = vld [vmem:[%s12908_s17 + $0x2a8] ss:$80 sps:$4 sm:$0xff]   ;;  %v11463_v60 = vld [vmem:[#allocation5 + $0xd00] ss:$16 sps:$4 sm:$0xff]  }
 0x278   : > { %5874 = vmatprep.subr.bf16.mxu0 %v11375_v61  ;;  %7004 = vmatprep.subr.bf16.mxu1 %v11378_v62  ;;  %v11466_v61 = vld [vmem:[#allocation5 + $0xd08] ss:$16 sps:$4 sm:$0xff]   ;;  %v11471_v62 = vld [vmem:[#allocation5 + $0xd24] ss:$16 sps:$4 sm:$0xff]  }
 0x27a   : > { %5830 = vmatmul.mubr.bf16.gmra.mrb[24].mxu0 %v11372_v63  ;;  %6960 = vmatmul.mubr.bf16.gmra.mrb[24].mxu1 %v11372_v63  ;;  %v11474_v63 = vld [vmem:[#allocation5 + $0xd2c] ss:$16 sps:$4 sm:$0xff]  }
 0x27b   : > { %5875 = vmatpush1.bf16.msra.mxu0 %v11373_v0  ;;  %7005 = vmatpush1.bf16.msra.mxu1 %v11376_v1  ;;  %v11475_v0 = vld [vmem:[%s12908_s17 + $0x34c] ss:$80 sps:$4 sm:$0xff]   ;;  %v11469_v1 = vld [vmem:[#allocation5 + $0xd20] ss:$16 sps:$4 sm:$0xff]  }
 0x27c   : > { %5876 = vmatprep.subr.bf16.mxu0 %v11381_v2  ;;  %7006 = vmatprep.subr.bf16.mxu1 %v11384_v3  ;;  %v11472_v2 = vld [vmem:[#allocation5 + $0xd28] ss:$16 sps:$4 sm:$0xff]   ;;  %v11480_v3 = vld [vmem:[#allocation5 + $0xd44] ss:$16 sps:$4 sm:$0xff]  }
 0x27d   : > { %5839 = vmatprep.mubr.bf16.mxu0 %v11385_v4  ;;  %6969 = vmatprep.mubr.bf16.mxu1 %v11385_v4  ;;  %v11483_v4 = vld [vmem:[#allocation5 + $0xd4c] ss:$16 sps:$4 sm:$0xff]  }
 0x27f   : > { %5877 = vmatpush1.bf16.msra.mxu0 %v11379_v5  ;;  %7007 = vmatpush1.bf16.msra.mxu1 %v11382_v6  ;;  %v11477_v5 = vld [vmem:[%s12908_s17 + $0x348] ss:$80 sps:$4 sm:$0xff]   ;;  %v11478_v6 = vld [vmem:[#allocation5 + $0xd40] ss:$16 sps:$4 sm:$0xff]  }
 0x280   : > { %5878 = vmatprep.subr.bf16.mxu0 %v11390_v7  ;;  %7008 = vmatprep.subr.bf16.mxu1 %v11393_v8  ;;  %v11481_v7 = vld [vmem:[#allocation5 + $0xd48] ss:$16 sps:$4 sm:$0xff]   ;;  %v11486_v8 = vld [vmem:[#allocation5 + $0xd64] ss:$16 sps:$4 sm:$0xff]  }
 0x282   : > { %5840 = vmatmul.mubr.bf16.gmra.mrb[28].mxu0 %v11387_v9  ;;  %6970 = vmatmul.mubr.bf16.gmra.mrb[28].mxu1 %v11387_v9  ;;  %v11489_v9 = vld [vmem:[#allocation5 + $0xd6c] ss:$16 sps:$4 sm:$0xff]  }
 0x283   : > { %5879 = vmatpush1.bf16.msra.mxu0 %v11388_v10  ;;  %7009 = vmatpush1.bf16.msra.mxu1 %v11391_v11  ;;  %v11490_v10 = vld [vmem:[%s12908_s17 + $0x3ec] ss:$80 sps:$4 sm:$0xff]   ;;  %v11484_v11 = vld [vmem:[#allocation5 + $0xd60] ss:$16 sps:$4 sm:$0xff]  }
 0x284   : > { %5880 = vmatprep.subr.bf16.mxu0 %v11396_v12  ;;  %7010 = vmatprep.subr.bf16.mxu1 %v11399_v13  ;;  %v11487_v12 = vld [vmem:[#allocation5 + $0xd68] ss:$16 sps:$4 sm:$0xff]   ;;  %v11495_v13 = vld [vmem:[#allocation5 + $0xd84] ss:$16 sps:$4 sm:$0xff]  }
 0x285   : > { %5882 = vmatprep.mubr.bf16.mxu0 %v11402_v14  ;;  %7012 = vmatprep.mubr.bf16.mxu1 %v11402_v14  ;;  %v11498_v14 = vld [vmem:[#allocation5 + $0xd8c] ss:$16 sps:$4 sm:$0xff]  }
 0x287   : > { %5881 = vmatpush1.bf16.msra.mxu0 %v11394_v15  ;;  %7011 = vmatpush1.bf16.msra.mxu1 %v11397_v16  ;;  %v11492_v15 = vld [vmem:[%s12908_s17 + $0x3e8] ss:$80 sps:$4 sm:$0xff]   ;;  %v11493_v16 = vld [vmem:[#allocation5 + $0xd80] ss:$16 sps:$4 sm:$0xff]  }
 0x288   : > { %5963 = vmatprep.subr.bf16.mxu0 %v11405_v17  ;;  %7093 = vmatprep.subr.bf16.mxu1 %v11408_v18  ;;  %v11496_v17 = vld [vmem:[#allocation5 + $0xd88] ss:$16 sps:$4 sm:$0xff]   ;;  %v11501_v18 = vld [vmem:[#allocation5 + $0xda4] ss:$16 sps:$4 sm:$0xff]  }
 0x28a   : > { %5883 = vmatmul.mubr.bf16.vlgmr.msra.gmra.mrb[0].mxu0 %v11400_v19  ;;  %7013 = vmatmul.mubr.bf16.vlgmr.msra.gmra.mrb[0].mxu1 %v11400_v19  ;;  %v11504_v19 = vld [vmem:[#allocation5 + $0xdac] ss:$16 sps:$4 sm:$0xff]  }
 0x28b   : > { %5964 = vmatpush1.bf16.msra.mxu0 %v11403_v20  ;;  %7094 = vmatpush1.bf16.msra.mxu1 %v11406_v21  ;;  %v11505_v20 = vld [vmem:[%s12908_s17 + $0x48c] ss:$80 sps:$4 sm:$0xff]   ;;  %v11499_v21 = vld [vmem:[#allocation5 + $0xda0] ss:$16 sps:$4 sm:$0xff]  }
 0x28c   : > { %5965 = vmatprep.subr.bf16.mxu0 %v11411_v22  ;;  %7095 = vmatprep.subr.bf16.mxu1 %v11414_v23  ;;  %v11502_v22 = vld [vmem:[#allocation5 + $0xda8] ss:$16 sps:$4 sm:$0xff]   ;;  %v11510_v23 = vld [vmem:[#allocation5 + $0xdc4] ss:$16 sps:$4 sm:$0xff]  }
 0x28d   : > { %5892 = vmatprep.mubr.bf16.mxu0 %v11415_v24  ;;  %7022 = vmatprep.mubr.bf16.mxu1 %v11415_v24  ;;  %v11513_v24 = vld [vmem:[#allocation5 + $0xdcc] ss:$16 sps:$4 sm:$0xff]  }
 0x28f   : > { %5966 = vmatpush1.bf16.msra.mxu0 %v11409_v25  ;;  %7096 = vmatpush1.bf16.msra.mxu1 %v11412_v26  ;;  %v11507_v25 = vld [vmem:[%s12908_s17 + $0x488] ss:$80 sps:$4 sm:$0xff]   ;;  %v11508_v26 = vld [vmem:[#allocation5 + $0xdc0] ss:$16 sps:$4 sm:$0xff]  }
 0x290   : > { %5967 = vmatprep.subr.bf16.mxu0 %v11420_v27  ;;  %7097 = vmatprep.subr.bf16.mxu1 %v11423_v28  ;;  %v11511_v27 = vld [vmem:[#allocation5 + $0xdc8] ss:$16 sps:$4 sm:$0xff]   ;;  %v11516_v28 = vld [vmem:[#allocation5 + $0xde4] ss:$16 sps:$4 sm:$0xff]  }
 0x292   : > { %5893 = vmatmul.mubr.bf16.gmra.mrb[4].mxu0 %v11417_v29  ;;  %7023 = vmatmul.mubr.bf16.gmra.mrb[4].mxu1 %v11417_v29  ;;  %v11519_v29 = vld [vmem:[#allocation5 + $0xdec] ss:$16 sps:$4 sm:$0xff]  }
 0x293   : > { %5968 = vmatpush1.bf16.msra.mxu0 %v11418_v30  ;;  %7098 = vmatpush1.bf16.msra.mxu1 %v11421_v31  ;;  %v11522_v30 = vld [vmem:[%s12908_s17 + $0x34] ss:$80 sps:$4 sm:$0xff]   ;;  %v11514_v31 = vld [vmem:[#allocation5 + $0xde0] ss:$16 sps:$4 sm:$0xff]  }
 0x294   : > { %5969 = vmatprep.subr.bf16.mxu0 %v11426_v32  ;;  %7099 = vmatprep.subr.bf16.mxu1 %v11429_v33  ;;  %v11517_v32 = vld [vmem:[#allocation5 + $0xde8] ss:$16 sps:$4 sm:$0xff]   ;;  %v11525_v33 = vld [vmem:[#allocation5 + $0xe04] ss:$16 sps:$4 sm:$0xff]  }
 0x295   : > { %5902 = vmatprep.mubr.bf16.mxu0 %v11430_v34  ;;  %7032 = vmatprep.mubr.bf16.mxu1 %v11430_v34  ;;  %v11528_v34 = vld [vmem:[#allocation5 + $0xe0c] ss:$16 sps:$4 sm:$0xff]  }
 0x297   : > { %5970 = vmatpush1.bf16.msra.mxu0 %v11424_v35  ;;  %7100 = vmatpush1.bf16.msra.mxu1 %v11427_v36  ;;  %v11520_v35 = vld [vmem:[%s12908_s17 + $0x30] ss:$80 sps:$4 sm:$0xff]  }
 0x298   : > { %5971 = vmatprep.subr.bf16.mxu0 %v11435_v37  ;;  %7101 = vmatprep.subr.bf16.mxu1 %v11438_v38  ;;  %v11523_v36 = vld [vmem:[#allocation5 + $0xe00] ss:$16 sps:$4 sm:$0xff]   ;;  %v11526_v37 = vld [vmem:[#allocation5 + $0xe08] ss:$16 sps:$4 sm:$0xff]   ;;  %v11531_v38 = vld [vmem:[#allocation5 + $0xe24] ss:$16 sps:$4 sm:$0xff]  }
 0x29a   : > { %5903 = vmatmul.mubr.bf16.gmra.mrb[8].mxu0 %v11432_v39  ;;  %7033 = vmatmul.mubr.bf16.gmra.mrb[8].mxu1 %v11432_v39  ;;  %v11534_v39 = vld [vmem:[#allocation5 + $0xe2c] ss:$16 sps:$4 sm:$0xff]  }
 0x29b   : > { %5972 = vmatpush1.bf16.msra.mxu0 %v11433_v40  ;;  %7102 = vmatpush1.bf16.msra.mxu1 %v11436_v41  ;;  %v11535_v40 = vld [vmem:[%s12908_s17 + $0xd4] ss:$80 sps:$4 sm:$0xff]   ;;  %v11529_v41 = vld [vmem:[#allocation5 + $0xe20] ss:$16 sps:$4 sm:$0xff]  }
 0x29c   : > { %5973 = vmatprep.subr.bf16.mxu0 %v11441_v42  ;;  %7103 = vmatprep.subr.bf16.mxu1 %v11444_v43  ;;  %v11532_v42 = vld [vmem:[#allocation5 + $0xe28] ss:$16 sps:$4 sm:$0xff]   ;;  %v11540_v43 = vld [vmem:[#allocation5 + $0xe44] ss:$16 sps:$4 sm:$0xff]  }
 0x29d   : > { %5912 = vmatprep.mubr.bf16.mxu0 %v11445_v44  ;;  %7042 = vmatprep.mubr.bf16.mxu1 %v11445_v44  ;;  %v11543_v44 = vld [vmem:[#allocation5 + $0xe4c] ss:$16 sps:$4 sm:$0xff]  }
 0x29f   : > { %5974 = vmatpush1.bf16.msra.mxu0 %v11439_v45  ;;  %7104 = vmatpush1.bf16.msra.mxu1 %v11442_v46  ;;  %v11537_v45 = vld [vmem:[%s12908_s17 + $0xd0] ss:$80 sps:$4 sm:$0xff]  }
 0x2a0   : > { %5975 = vmatprep.subr.bf16.mxu0 %v11450_v47  ;;  %7105 = vmatprep.subr.bf16.mxu1 %v11453_v48  ;;  %v11538_v46 = vld [vmem:[#allocation5 + $0xe40] ss:$16 sps:$4 sm:$0xff]   ;;  %v11541_v47 = vld [vmem:[#allocation5 + $0xe48] ss:$16 sps:$4 sm:$0xff]   ;;  %v11546_v48 = vld [vmem:[#allocation5 + $0xe64] ss:$16 sps:$4 sm:$0xff]  }
 0x2a2   : > { %5913 = vmatmul.mubr.bf16.gmra.mrb[12].mxu0 %v11447_v49  ;;  %7043 = vmatmul.mubr.bf16.gmra.mrb[12].mxu1 %v11447_v49  ;;  %v11549_v49 = vld [vmem:[#allocation5 + $0xe6c] ss:$16 sps:$4 sm:$0xff]  }
 0x2a3   : > { %5976 = vmatpush1.bf16.msra.mxu0 %v11448_v50  ;;  %7106 = vmatpush1.bf16.msra.mxu1 %v11451_v51  ;;  %v11550_v50 = vld [vmem:[%s12908_s17 + $0x174] ss:$80 sps:$4 sm:$0xff]   ;;  %v11544_v51 = vld [vmem:[#allocation5 + $0xe60] ss:$16 sps:$4 sm:$0xff]  }
 0x2a4   : > { %5977 = vmatprep.subr.bf16.mxu0 %v11456_v52  ;;  %7107 = vmatprep.subr.bf16.mxu1 %v11459_v53  ;;  %v11547_v52 = vld [vmem:[#allocation5 + $0xe68] ss:$16 sps:$4 sm:$0xff]   ;;  %v11555_v53 = vld [vmem:[#allocation5 + $0xe84] ss:$16 sps:$4 sm:$0xff]  }
 0x2a5   : > { %5922 = vmatprep.mubr.bf16.mxu0 %v11460_v54  ;;  %7052 = vmatprep.mubr.bf16.mxu1 %v11460_v54  ;;  %v11558_v54 = vld [vmem:[#allocation5 + $0xe8c] ss:$16 sps:$4 sm:$0xff]  }
 0x2a7   : > { %5978 = vmatpush1.bf16.msra.mxu0 %v11454_v55  ;;  %7108 = vmatpush1.bf16.msra.mxu1 %v11457_v56  ;;  %v11552_v55 = vld [vmem:[%s12908_s17 + $0x170] ss:$80 sps:$4 sm:$0xff]  }
 0x2a8   : > { %5979 = vmatprep.subr.bf16.mxu0 %v11465_v57  ;;  %7109 = vmatprep.subr.bf16.mxu1 %v11468_v58  ;;  %v11553_v56 = vld [vmem:[#allocation5 + $0xe80] ss:$16 sps:$4 sm:$0xff]   ;;  %v11556_v57 = vld [vmem:[#allocation5 + $0xe88] ss:$16 sps:$4 sm:$0xff]   ;;  %v11561_v58 = vld [vmem:[#allocation5 + $0xea4] ss:$16 sps:$4 sm:$0xff]  }
 0x2aa   : > { %5923 = vmatmul.mubr.bf16.gmra.mrb[16].mxu0 %v11462_v59  ;;  %7053 = vmatmul.mubr.bf16.gmra.mrb[16].mxu1 %v11462_v59  ;;  %v11564_v59 = vld [vmem:[#allocation5 + $0xeac] ss:$16 sps:$4 sm:$0xff]  }
 0x2ab   : > { %5980 = vmatpush1.bf16.msra.mxu0 %v11463_v60  ;;  %7110 = vmatpush1.bf16.msra.mxu1 %v11466_v61  ;;  %v11565_v60 = vld [vmem:[%s12908_s17 + $0x214] ss:$80 sps:$4 sm:$0xff]   ;;  %v11559_v61 = vld [vmem:[#allocation5 + $0xea0] ss:$16 sps:$4 sm:$0xff]  }
 0x2ac   : > { %5981 = vmatprep.subr.bf16.mxu0 %v11471_v62  ;;  %7111 = vmatprep.subr.bf16.mxu1 %v11474_v63  ;;  %v11562_v62 = vld [vmem:[#allocation5 + $0xea8] ss:$16 sps:$4 sm:$0xff]   ;;  %v11570_v63 = vld [vmem:[#allocation5 + $0xec4] ss:$16 sps:$4 sm:$0xff]  }
 0x2ad   : > { %5932 = vmatprep.mubr.bf16.mxu0 %v11475_v0  ;;  %7062 = vmatprep.mubr.bf16.mxu1 %v11475_v0  ;;  %v11573_v0 = vld [vmem:[#allocation5 + $0xecc] ss:$16 sps:$4 sm:$0xff]  }
 0x2af   : > { %5982 = vmatpush1.bf16.msra.mxu0 %v11469_v1  ;;  %7112 = vmatpush1.bf16.msra.mxu1 %v11472_v2  ;;  %v11567_v1 = vld [vmem:[%s12908_s17 + $0x210] ss:$80 sps:$4 sm:$0xff]  }
 0x2b0   : > { %5983 = vmatprep.subr.bf16.mxu0 %v11480_v3  ;;  %7113 = vmatprep.subr.bf16.mxu1 %v11483_v4  ;;  %v11568_v2 = vld [vmem:[#allocation5 + $0xec0] ss:$16 sps:$4 sm:$0xff]   ;;  %v11571_v3 = vld [vmem:[#allocation5 + $0xec8] ss:$16 sps:$4 sm:$0xff]   ;;  %v11576_v4 = vld [vmem:[#allocation5 + $0xee4] ss:$16 sps:$4 sm:$0xff]  }
 0x2b2   : > { %5933 = vmatmul.mubr.bf16.gmra.mrb[20].mxu0 %v11477_v5  ;;  %7063 = vmatmul.mubr.bf16.gmra.mrb[20].mxu1 %v11477_v5  ;;  %v11579_v5 = vld [vmem:[#allocation5 + $0xeec] ss:$16 sps:$4 sm:$0xff]  }
 0x2b3   : > { %5984 = vmatpush1.bf16.msra.mxu0 %v11478_v6  ;;  %7114 = vmatpush1.bf16.msra.mxu1 %v11481_v7  ;;  %v11580_v6 = vld [vmem:[%s12908_s17 + $0x2b4] ss:$80 sps:$4 sm:$0xff]   ;;  %v11574_v7 = vld [vmem:[#allocation5 + $0xee0] ss:$16 sps:$4 sm:$0xff]  }
 0x2b4   : > { %5985 = vmatprep.subr.bf16.mxu0 %v11486_v8  ;;  %7115 = vmatprep.subr.bf16.mxu1 %v11489_v9  ;;  %v11577_v8 = vld [vmem:[#allocation5 + $0xee8] ss:$16 sps:$4 sm:$0xff]   ;;  %v11585_v9 = vld [vmem:[#allocation5 + $0xf04] ss:$16 sps:$4 sm:$0xff]  }
 0x2b5   : > { %5942 = vmatprep.mubr.bf16.mxu0 %v11490_v10  ;;  %7072 = vmatprep.mubr.bf16.mxu1 %v11490_v10  ;;  %v11588_v10 = vld [vmem:[#allocation5 + $0xf0c] ss:$16 sps:$4 sm:$0xff]  }
 0x2b7   : > { %5986 = vmatpush1.bf16.msra.mxu0 %v11484_v11  ;;  %7116 = vmatpush1.bf16.msra.mxu1 %v11487_v12  ;;  %v11582_v11 = vld [vmem:[%s12908_s17 + $0x2b0] ss:$80 sps:$4 sm:$0xff]  }
 0x2b8   : > { %5987 = vmatprep.subr.bf16.mxu0 %v11495_v13  ;;  %7117 = vmatprep.subr.bf16.mxu1 %v11498_v14  ;;  %v11583_v12 = vld [vmem:[#allocation5 + $0xf00] ss:$16 sps:$4 sm:$0xff]   ;;  %v11586_v13 = vld [vmem:[#allocation5 + $0xf08] ss:$16 sps:$4 sm:$0xff]   ;;  %v11591_v14 = vld [vmem:[#allocation5 + $0xf24] ss:$16 sps:$4 sm:$0xff]  }
 0x2ba   : > { %5943 = vmatmul.mubr.bf16.gmra.mrb[24].mxu0 %v11492_v15  ;;  %7073 = vmatmul.mubr.bf16.gmra.mrb[24].mxu1 %v11492_v15  ;;  %v11594_v15 = vld [vmem:[#allocation5 + $0xf2c] ss:$16 sps:$4 sm:$0xff]  }
 0x2bb   : > { %5988 = vmatpush1.bf16.msra.mxu0 %v11493_v16  ;;  %7118 = vmatpush1.bf16.msra.mxu1 %v11496_v17  ;;  %v11595_v16 = vld [vmem:[%s12908_s17 + $0x354] ss:$80 sps:$4 sm:$0xff]   ;;  %v11589_v17 = vld [vmem:[#allocation5 + $0xf20] ss:$16 sps:$4 sm:$0xff]  }
 0x2bc   : > { %5989 = vmatprep.subr.bf16.mxu0 %v11501_v18  ;;  %7119 = vmatprep.subr.bf16.mxu1 %v11504_v19  ;;  %v11592_v18 = vld [vmem:[#allocation5 + $0xf28] ss:$16 sps:$4 sm:$0xff]   ;;  %v11600_v19 = vld [vmem:[#allocation5 + $0xf44] ss:$16 sps:$4 sm:$0xff]  }
 0x2bd   : > { %5952 = vmatprep.mubr.bf16.mxu0 %v11505_v20  ;;  %7082 = vmatprep.mubr.bf16.mxu1 %v11505_v20  ;;  %v11603_v20 = vld [vmem:[#allocation5 + $0xf4c] ss:$16 sps:$4 sm:$0xff]  }
 0x2bf   : > { %5990 = vmatpush1.bf16.msra.mxu0 %v11499_v21  ;;  %7120 = vmatpush1.bf16.msra.mxu1 %v11502_v22  ;;  %v11597_v21 = vld [vmem:[%s12908_s17 + $0x350] ss:$80 sps:$4 sm:$0xff]  }
 0x2c0   : > { %5991 = vmatprep.subr.bf16.mxu0 %v11510_v23  ;;  %7121 = vmatprep.subr.bf16.mxu1 %v11513_v24  ;;  %v11598_v22 = vld [vmem:[#allocation5 + $0xf40] ss:$16 sps:$4 sm:$0xff]   ;;  %v11601_v23 = vld [vmem:[#allocation5 + $0xf48] ss:$16 sps:$4 sm:$0xff]   ;;  %v11606_v24 = vld [vmem:[#allocation5 + $0xf64] ss:$16 sps:$4 sm:$0xff]  }
 0x2c2   : > { %5953 = vmatmul.mubr.bf16.gmra.mrb[28].mxu0 %v11507_v25  ;;  %7083 = vmatmul.mubr.bf16.gmra.mrb[28].mxu1 %v11507_v25  ;;  %v11609_v25 = vld [vmem:[#allocation5 + $0xf6c] ss:$16 sps:$4 sm:$0xff]  }
 0x2c3   : > { %5992 = vmatpush1.bf16.msra.mxu0 %v11508_v26  ;;  %7122 = vmatpush1.bf16.msra.mxu1 %v11511_v27  ;;  %v11610_v26 = vld [vmem:[%s12908_s17 + $0x3f4] ss:$80 sps:$4 sm:$0xff]   ;;  %v11604_v27 = vld [vmem:[#allocation5 + $0xf60] ss:$16 sps:$4 sm:$0xff]  }
 0x2c4   : > { %5993 = vmatprep.subr.bf16.mxu0 %v11516_v28  ;;  %7123 = vmatprep.subr.bf16.mxu1 %v11519_v29  ;;  %v11607_v28 = vld [vmem:[#allocation5 + $0xf68] ss:$16 sps:$4 sm:$0xff]   ;;  %v11615_v29 = vld [vmem:[#allocation5 + $0xf84] ss:$16 sps:$4 sm:$0xff]  }
 0x2c5   : > { %5995 = vmatprep.mubr.bf16.mxu0 %v11522_v30  ;;  %7125 = vmatprep.mubr.bf16.mxu1 %v11522_v30  ;;  %v11618_v30 = vld [vmem:[#allocation5 + $0xf8c] ss:$16 sps:$4 sm:$0xff]  }
 0x2c7   : > { %5994 = vmatpush1.bf16.msra.mxu0 %v11514_v31  ;;  %7124 = vmatpush1.bf16.msra.mxu1 %v11517_v32  ;;  %v11612_v31 = vld [vmem:[%s12908_s17 + $0x3f0] ss:$80 sps:$4 sm:$0xff]  }
 0x2c8   : > { %6076 = vmatprep.subr.bf16.mxu0 %v11525_v33  ;;  %7206 = vmatprep.subr.bf16.mxu1 %v11528_v34  ;;  %v11613_v32 = vld [vmem:[#allocation5 + $0xf80] ss:$16 sps:$4 sm:$0xff]   ;;  %v11616_v33 = vld [vmem:[#allocation5 + $0xf88] ss:$16 sps:$4 sm:$0xff]   ;;  %v11621_v34 = vld [vmem:[#allocation5 + $0xfa4] ss:$16 sps:$4 sm:$0xff]  }
 0x2ca   : > { %5996 = vmatmul.mubr.bf16.vlgmr.msra.gmra.mrb[0].mxu0 %v11520_v35  ;;  %7126 = vmatmul.mubr.bf16.vlgmr.msra.gmra.mrb[0].mxu1 %v11520_v35  ;;  %v11624_v35 = vld [vmem:[#allocation5 + $0xfac] ss:$16 sps:$4 sm:$0xff]  }
 0x2cb   : > { %6077 = vmatpush1.bf16.msra.mxu0 %v11523_v36  ;;  %7207 = vmatpush1.bf16.msra.mxu1 %v11526_v37  ;;  %v11625_v36 = vld [vmem:[%s12908_s17 + $0x494] ss:$80 sps:$4 sm:$0xff]   ;;  %v11619_v37 = vld [vmem:[#allocation5 + $0xfa0] ss:$16 sps:$4 sm:$0xff]  }
 0x2cc   : > { %6078 = vmatprep.subr.bf16.mxu0 %v11531_v38  ;;  %7208 = vmatprep.subr.bf16.mxu1 %v11534_v39  ;;  %v11622_v38 = vld [vmem:[#allocation5 + $0xfa8] ss:$16 sps:$4 sm:$0xff]   ;;  %v11630_v39 = vld [vmem:[#allocation5 + $0xfc4] ss:$16 sps:$4 sm:$0xff]  }
 0x2cd   : > { %6005 = vmatprep.mubr.bf16.mxu0 %v11535_v40  ;;  %7135 = vmatprep.mubr.bf16.mxu1 %v11535_v40  ;;  %v11633_v40 = vld [vmem:[#allocation5 + $0xfcc] ss:$16 sps:$4 sm:$0xff]  }
 0x2cf   : > { %6079 = vmatpush1.bf16.msra.mxu0 %v11529_v41  ;;  %7209 = vmatpush1.bf16.msra.mxu1 %v11532_v42  ;;  %v11627_v41 = vld [vmem:[%s12908_s17 + $0x490] ss:$80 sps:$4 sm:$0xff]  }
 0x2d0   : > { %6080 = vmatprep.subr.bf16.mxu0 %v11540_v43  ;;  %7210 = vmatprep.subr.bf16.mxu1 %v11543_v44  ;;  %v11628_v42 = vld [vmem:[#allocation5 + $0xfc0] ss:$16 sps:$4 sm:$0xff]   ;;  %v11631_v43 = vld [vmem:[#allocation5 + $0xfc8] ss:$16 sps:$4 sm:$0xff]   ;;  %v11636_v44 = vld [vmem:[#allocation5 + $0xfe4] ss:$16 sps:$4 sm:$0xff]  }
 0x2d2   : > { %6006 = vmatmul.mubr.bf16.gmra.mrb[4].mxu0 %v11537_v45  ;;  %7136 = vmatmul.mubr.bf16.gmra.mrb[4].mxu1 %v11537_v45  ;;  %v11639_v45 = vld [vmem:[#allocation5 + $0xfec] ss:$16 sps:$4 sm:$0xff]  }
 0x2d3   : > { %6081 = vmatpush1.bf16.msra.mxu0 %v11538_v46  ;;  %7211 = vmatpush1.bf16.msra.mxu1 %v11541_v47  ;;  %v11642_v46 = vld [vmem:[%s12908_s17 + $0x3c] ss:$80 sps:$4 sm:$0xff]   ;;  %v11634_v47 = vld [vmem:[#allocation5 + $0xfe0] ss:$16 sps:$4 sm:$0xff]  }
 0x2d4   : > { %6082 = vmatprep.subr.bf16.mxu0 %v11546_v48  ;;  %7212 = vmatprep.subr.bf16.mxu1 %v11549_v49  ;;  %v11637_v48 = vld [vmem:[#allocation5 + $0xfe8] ss:$16 sps:$4 sm:$0xff]   ;;  %v11645_v49 = vld [vmem:[#allocation5 + $0x1004] ss:$16 sps:$4 sm:$0xff]  }
 0x2d5   : > { %6015 = vmatprep.mubr.bf16.mxu0 %v11550_v50  ;;  %7145 = vmatprep.mubr.bf16.mxu1 %v11550_v50  ;;  %v11648_v50 = vld [vmem:[#allocation5 + $0x100c] ss:$16 sps:$4 sm:$0xff]  }
 0x2d7   : > { %6083 = vmatpush1.bf16.msra.mxu0 %v11544_v51  ;;  %7213 = vmatpush1.bf16.msra.mxu1 %v11547_v52  ;;  %v11640_v51 = vld [vmem:[%s12908_s17 + $0x38] ss:$80 sps:$4 sm:$0xff]   ;;  %v11643_v52 = vld [vmem:[#allocation5 + $0x1000] ss:$16 sps:$4 sm:$0xff]  }
 0x2d8   : > { %6084 = vmatprep.subr.bf16.mxu0 %v11555_v53  ;;  %7214 = vmatprep.subr.bf16.mxu1 %v11558_v54  ;;  %v11646_v53 = vld [vmem:[#allocation5 + $0x1008] ss:$16 sps:$4 sm:$0xff]   ;;  %v11651_v54 = vld [vmem:[#allocation5 + $0x1024] ss:$16 sps:$4 sm:$0xff]  }
 0x2da   : > { %6016 = vmatmul.mubr.bf16.gmra.mrb[8].mxu0 %v11552_v55  ;;  %7146 = vmatmul.mubr.bf16.gmra.mrb[8].mxu1 %v11552_v55  ;;  %v11654_v55 = vld [vmem:[#allocation5 + $0x102c] ss:$16 sps:$4 sm:$0xff]  }
 0x2db   : > { %6085 = vmatpush1.bf16.msra.mxu0 %v11553_v56  ;;  %7215 = vmatpush1.bf16.msra.mxu1 %v11556_v57  ;;  %v11655_v56 = vld [vmem:[%s12908_s17 + $0xdc] ss:$80 sps:$4 sm:$0xff]   ;;  %v11649_v57 = vld [vmem:[#allocation5 + $0x1020] ss:$16 sps:$4 sm:$0xff]  }
 0x2dc   : > { %6086 = vmatprep.subr.bf16.mxu0 %v11561_v58  ;;  %7216 = vmatprep.subr.bf16.mxu1 %v11564_v59  ;;  %v11652_v58 = vld [vmem:[#allocation5 + $0x1028] ss:$16 sps:$4 sm:$0xff]   ;;  %v11660_v59 = vld [vmem:[#allocation5 + $0x1044] ss:$16 sps:$4 sm:$0xff]  }
 0x2dd   : > { %6025 = vmatprep.mubr.bf16.mxu0 %v11565_v60  ;;  %7155 = vmatprep.mubr.bf16.mxu1 %v11565_v60  ;;  %v11663_v60 = vld [vmem:[#allocation5 + $0x104c] ss:$16 sps:$4 sm:$0xff]  }
 0x2df   : > { %6087 = vmatpush1.bf16.msra.mxu0 %v11559_v61  ;;  %7217 = vmatpush1.bf16.msra.mxu1 %v11562_v62  ;;  %v11657_v61 = vld [vmem:[%s12908_s17 + $0xd8] ss:$80 sps:$4 sm:$0xff]   ;;  %v11658_v62 = vld [vmem:[#allocation5 + $0x1040] ss:$16 sps:$4 sm:$0xff]  }
 0x2e0   : > { %6088 = vmatprep.subr.bf16.mxu0 %v11570_v63  ;;  %7218 = vmatprep.subr.bf16.mxu1 %v11573_v0  ;;  %v11661_v63 = vld [vmem:[#allocation5 + $0x1048] ss:$16 sps:$4 sm:$0xff]   ;;  %v11666_v0 = vld [vmem:[#allocation5 + $0x1064] ss:$16 sps:$4 sm:$0xff]  }
 0x2e2   : > { %6026 = vmatmul.mubr.bf16.gmra.mrb[12].mxu0 %v11567_v1  ;;  %7156 = vmatmul.mubr.bf16.gmra.mrb[12].mxu1 %v11567_v1  ;;  %v11669_v1 = vld [vmem:[#allocation5 + $0x106c] ss:$16 sps:$4 sm:$0xff]  }
 0x2e3   : > { %6089 = vmatpush1.bf16.msra.mxu0 %v11568_v2  ;;  %7219 = vmatpush1.bf16.msra.mxu1 %v11571_v3  ;;  %v11670_v2 = vld [vmem:[%s12908_s17 + $0x17c] ss:$80 sps:$4 sm:$0xff]   ;;  %v11664_v3 = vld [vmem:[#allocation5 + $0x1060] ss:$16 sps:$4 sm:$0xff]  }
 0x2e4   : > { %6090 = vmatprep.subr.bf16.mxu0 %v11576_v4  ;;  %7220 = vmatprep.subr.bf16.mxu1 %v11579_v5  ;;  %v11667_v4 = vld [vmem:[#allocation5 + $0x1068] ss:$16 sps:$4 sm:$0xff]   ;;  %v11675_v5 = vld [vmem:[#allocation5 + $0x1084] ss:$16 sps:$4 sm:$0xff]  }
 0x2e5   : > { %6035 = vmatprep.mubr.bf16.mxu0 %v11580_v6  ;;  %7165 = vmatprep.mubr.bf16.mxu1 %v11580_v6  ;;  %v11672_v6 = vld [vmem:[%s12908_s17 + $0x178] ss:$80 sps:$4 sm:$0xff]  }
 0x2e7   : > { %6091 = vmatpush1.bf16.msra.mxu0 %v11574_v7  ;;  %7221 = vmatpush1.bf16.msra.mxu1 %v11577_v8  ;;  %v11678_v7 = vld [vmem:[#allocation5 + $0x108c] ss:$16 sps:$4 sm:$0xff]   ;;  %v11673_v8 = vld [vmem:[#allocation5 + $0x1080] ss:$16 sps:$4 sm:$0xff]  }
 0x2e8   : > { %6092 = vmatprep.subr.bf16.mxu0 %v11585_v9  ;;  %7222 = vmatprep.subr.bf16.mxu1 %v11588_v10  ;;  %v11676_v9 = vld [vmem:[#allocation5 + $0x1088] ss:$16 sps:$4 sm:$0xff]   ;;  %v11681_v10 = vld [vmem:[#allocation5 + $0x10a4] ss:$16 sps:$4 sm:$0xff]  }
 0x2ea   : > { %6036 = vmatmul.mubr.bf16.gmra.mrb[16].mxu0 %v11582_v11  ;;  %7166 = vmatmul.mubr.bf16.gmra.mrb[16].mxu1 %v11582_v11  ;;  %v11684_v11 = vld [vmem:[#allocation5 + $0x10ac] ss:$16 sps:$4 sm:$0xff]  }
 0x2eb   : > { %6093 = vmatpush1.bf16.msra.mxu0 %v11583_v12  ;;  %7223 = vmatpush1.bf16.msra.mxu1 %v11586_v13  ;;  %v11685_v12 = vld [vmem:[%s12908_s17 + $0x21c] ss:$80 sps:$4 sm:$0xff]   ;;  %v11679_v13 = vld [vmem:[#allocation5 + $0x10a0] ss:$16 sps:$4 sm:$0xff]  }
 0x2ec   : > { %6094 = vmatprep.subr.bf16.mxu0 %v11591_v14  ;;  %7224 = vmatprep.subr.bf16.mxu1 %v11594_v15  ;;  %v11682_v14 = vld [vmem:[#allocation5 + $0x10a8] ss:$16 sps:$4 sm:$0xff]   ;;  %v11690_v15 = vld [vmem:[#allocation5 + $0x10c4] ss:$16 sps:$4 sm:$0xff]  }
 0x2ed   : > { %6045 = vmatprep.mubr.bf16.mxu0 %v11595_v16  ;;  %7175 = vmatprep.mubr.bf16.mxu1 %v11595_v16  ;;  %v11693_v16 = vld [vmem:[#allocation5 + $0x10cc] ss:$16 sps:$4 sm:$0xff]  }
 0x2ef   : > { %6095 = vmatpush1.bf16.msra.mxu0 %v11589_v17  ;;  %7225 = vmatpush1.bf16.msra.mxu1 %v11592_v18  ;;  %v11687_v17 = vld [vmem:[%s12908_s17 + $0x218] ss:$80 sps:$4 sm:$0xff]   ;;  %v11688_v18 = vld [vmem:[#allocation5 + $0x10c0] ss:$16 sps:$4 sm:$0xff]  }
 0x2f0   : > { %6096 = vmatprep.subr.bf16.mxu0 %v11600_v19  ;;  %7226 = vmatprep.subr.bf16.mxu1 %v11603_v20  ;;  %v11691_v19 = vld [vmem:[#allocation5 + $0x10c8] ss:$16 sps:$4 sm:$0xff]   ;;  %v11696_v20 = vld [vmem:[#allocation5 + $0x10e4] ss:$16 sps:$4 sm:$0xff]  }
 0x2f2   : > { %6046 = vmatmul.mubr.bf16.gmra.mrb[20].mxu0 %v11597_v21  ;;  %7176 = vmatmul.mubr.bf16.gmra.mrb[20].mxu1 %v11597_v21  ;;  %v11699_v21 = vld [vmem:[#allocation5 + $0x10ec] ss:$16 sps:$4 sm:$0xff]  }
 0x2f3   : > { %6097 = vmatpush1.bf16.msra.mxu0 %v11598_v22  ;;  %7227 = vmatpush1.bf16.msra.mxu1 %v11601_v23  ;;  %v11700_v22 = vld [vmem:[%s12908_s17 + $0x2bc] ss:$80 sps:$4 sm:$0xff]   ;;  %v11694_v23 = vld [vmem:[#allocation5 + $0x10e0] ss:$16 sps:$4 sm:$0xff]  }
 0x2f4   : > { %6098 = vmatprep.subr.bf16.mxu0 %v11606_v24  ;;  %7228 = vmatprep.subr.bf16.mxu1 %v11609_v25  ;;  %v11697_v24 = vld [vmem:[#allocation5 + $0x10e8] ss:$16 sps:$4 sm:$0xff]   ;;  %v11705_v25 = vld [vmem:[#allocation5 + $0x1104] ss:$16 sps:$4 sm:$0xff]  }
 0x2f5   : > { %6055 = vmatprep.mubr.bf16.mxu0 %v11610_v26  ;;  %7185 = vmatprep.mubr.bf16.mxu1 %v11610_v26  ;;  %v11708_v26 = vld [vmem:[#allocation5 + $0x110c] ss:$16 sps:$4 sm:$0xff]  }
 0x2f7   : > { %6099 = vmatpush1.bf16.msra.mxu0 %v11604_v27  ;;  %7229 = vmatpush1.bf16.msra.mxu1 %v11607_v28  ;;  %v11702_v27 = vld [vmem:[%s12908_s17 + $0x2b8] ss:$80 sps:$4 sm:$0xff]   ;;  %v11703_v28 = vld [vmem:[#allocation5 + $0x1100] ss:$16 sps:$4 sm:$0xff]  }
 0x2f8   : > { %6100 = vmatprep.subr.bf16.mxu0 %v11615_v29  ;;  %7230 = vmatprep.subr.bf16.mxu1 %v11618_v30  ;;  %v11706_v29 = vld [vmem:[#allocation5 + $0x1108] ss:$16 sps:$4 sm:$0xff]   ;;  %v11711_v30 = vld [vmem:[#allocation5 + $0x1124] ss:$16 sps:$4 sm:$0xff]  }
 0x2fa   : > { %6056 = vmatmul.mubr.bf16.gmra.mrb[24].mxu0 %v11612_v31  ;;  %7186 = vmatmul.mubr.bf16.gmra.mrb[24].mxu1 %v11612_v31  ;;  %v11714_v31 = vld [vmem:[#allocation5 + $0x112c] ss:$16 sps:$4 sm:$0xff]  }
 0x2fb   : > { %6101 = vmatpush1.bf16.msra.mxu0 %v11613_v32  ;;  %7231 = vmatpush1.bf16.msra.mxu1 %v11616_v33  ;;  %v11715_v32 = vld [vmem:[%s12908_s17 + $0x35c] ss:$80 sps:$4 sm:$0xff]   ;;  %v11709_v33 = vld [vmem:[#allocation5 + $0x1120] ss:$16 sps:$4 sm:$0xff]  }
 0x2fc   : > { %6102 = vmatprep.subr.bf16.mxu0 %v11621_v34  ;;  %7232 = vmatprep.subr.bf16.mxu1 %v11624_v35  ;;  %v11712_v34 = vld [vmem:[#allocation5 + $0x1128] ss:$16 sps:$4 sm:$0xff]   ;;  %v11720_v35 = vld [vmem:[#allocation5 + $0x1144] ss:$16 sps:$4 sm:$0xff]  }
 0x2fd   : > { %6065 = vmatprep.mubr.bf16.mxu0 %v11625_v36  ;;  %7195 = vmatprep.mubr.bf16.mxu1 %v11625_v36  ;;  %v11723_v36 = vld [vmem:[#allocation5 + $0x114c] ss:$16 sps:$4 sm:$0xff]  }
 0x2ff   : > { %6103 = vmatpush1.bf16.msra.mxu0 %v11619_v37  ;;  %7233 = vmatpush1.bf16.msra.mxu1 %v11622_v38  ;;  %v11717_v37 = vld [vmem:[%s12908_s17 + $0x358] ss:$80 sps:$4 sm:$0xff]   ;;  %v11718_v38 = vld [vmem:[#allocation5 + $0x1140] ss:$16 sps:$4 sm:$0xff]  }
 0x300   : > { %6104 = vmatprep.subr.bf16.mxu0 %v11630_v39  ;;  %7234 = vmatprep.subr.bf16.mxu1 %v11633_v40  ;;  %v11721_v39 = vld [vmem:[#allocation5 + $0x1148] ss:$16 sps:$4 sm:$0xff]   ;;  %v11726_v40 = vld [vmem:[#allocation5 + $0x1164] ss:$16 sps:$4 sm:$0xff]  }
 0x302   : > { %6066 = vmatmul.mubr.bf16.gmra.mrb[28].mxu0 %v11627_v41  ;;  %7196 = vmatmul.mubr.bf16.gmra.mrb[28].mxu1 %v11627_v41  ;;  %v11729_v41 = vld [vmem:[#allocation5 + $0x116c] ss:$16 sps:$4 sm:$0xff]  }
 0x303   : > { %6105 = vmatpush1.bf16.msra.mxu0 %v11628_v42  ;;  %7235 = vmatpush1.bf16.msra.mxu1 %v11631_v43  ;;  %v11730_v42 = vld [vmem:[%s12908_s17 + $0x3fc] ss:$80 sps:$4 sm:$0xff]   ;;  %v11724_v43 = vld [vmem:[#allocation5 + $0x1160] ss:$16 sps:$4 sm:$0xff]  }
 0x304   : > { %6106 = vmatprep.subr.bf16.mxu0 %v11636_v44  ;;  %7236 = vmatprep.subr.bf16.mxu1 %v11639_v45  ;;  %v11727_v44 = vld [vmem:[#allocation5 + $0x1168] ss:$16 sps:$4 sm:$0xff]   ;;  %v11735_v45 = vld [vmem:[#allocation5 + $0x1184] ss:$16 sps:$4 sm:$0xff]  }
 0x305   : > { %6108 = vmatprep.mubr.bf16.mxu0 %v11642_v46  ;;  %7238 = vmatprep.mubr.bf16.mxu1 %v11642_v46  ;;  %v11738_v46 = vld [vmem:[#allocation5 + $0x118c] ss:$16 sps:$4 sm:$0xff]  }
 0x307   : > { %6107 = vmatpush1.bf16.msra.mxu0 %v11634_v47  ;;  %7237 = vmatpush1.bf16.msra.mxu1 %v11637_v48  ;;  %v11732_v47 = vld [vmem:[%s12908_s17 + $0x3f8] ss:$80 sps:$4 sm:$0xff]   ;;  %v11733_v48 = vld [vmem:[#allocation5 + $0x1180] ss:$16 sps:$4 sm:$0xff]  }
 0x308   : > { %6189 = vmatprep.subr.bf16.mxu0 %v11645_v49  ;;  %7319 = vmatprep.subr.bf16.mxu1 %v11648_v50  ;;  %v11736_v49 = vld [vmem:[#allocation5 + $0x1188] ss:$16 sps:$4 sm:$0xff]   ;;  %v11741_v50 = vld [vmem:[#allocation5 + $0x11a4] ss:$16 sps:$4 sm:$0xff]  }
 0x30a   : > { %6109 = vmatmul.mubr.bf16.vlgmr.msra.gmra.mrb[0].mxu0 %v11640_v51  ;;  %7239 = vmatmul.mubr.bf16.vlgmr.msra.gmra.mrb[0].mxu1 %v11640_v51  ;;  %v11744_v51 = vld [vmem:[#allocation5 + $0x11ac] ss:$16 sps:$4 sm:$0xff]  }
 0x30b   : > { %6190 = vmatpush1.bf16.msra.mxu0 %v11643_v52  ;;  %7320 = vmatpush1.bf16.msra.mxu1 %v11646_v53  ;;  %v11745_v52 = vld [vmem:[%s12908_s17 + $0x49c] ss:$80 sps:$4 sm:$0xff]   ;;  %v11739_v53 = vld [vmem:[#allocation5 + $0x11a0] ss:$16 sps:$4 sm:$0xff]  }
 0x30c   : > { %6191 = vmatprep.subr.bf16.mxu0 %v11651_v54  ;;  %7321 = vmatprep.subr.bf16.mxu1 %v11654_v55  ;;  %v11742_v54 = vld [vmem:[#allocation5 + $0x11a8] ss:$16 sps:$4 sm:$0xff]   ;;  %v11750_v55 = vld [vmem:[#allocation5 + $0x11c4] ss:$16 sps:$4 sm:$0xff]  }
 0x30d   : > { %6118 = vmatprep.mubr.bf16.mxu0 %v11655_v56  ;;  %7248 = vmatprep.mubr.bf16.mxu1 %v11655_v56  ;;  %v11753_v56 = vld [vmem:[#allocation5 + $0x11cc] ss:$16 sps:$4 sm:$0xff]  }
 0x30f   : > { %6192 = vmatpush1.bf16.msra.mxu0 %v11649_v57  ;;  %7322 = vmatpush1.bf16.msra.mxu1 %v11652_v58  ;;  %v11747_v57 = vld [vmem:[%s12908_s17 + $0x498] ss:$80 sps:$4 sm:$0xff]   ;;  %v11748_v58 = vld [vmem:[#allocation5 + $0x11c0] ss:$16 sps:$4 sm:$0xff]  }
 0x310   : > { %6193 = vmatprep.subr.bf16.mxu0 %v11660_v59  ;;  %7323 = vmatprep.subr.bf16.mxu1 %v11663_v60  ;;  %v11751_v59 = vld [vmem:[#allocation5 + $0x11c8] ss:$16 sps:$4 sm:$0xff]   ;;  %v11756_v60 = vld [vmem:[#allocation5 + $0x11e4] ss:$16 sps:$4 sm:$0xff]  }
 0x312   : > { %6119 = vmatmul.mubr.bf16.gmra.mrb[4].mxu0 %v11657_v61  ;;  %7249 = vmatmul.mubr.bf16.gmra.mrb[4].mxu1 %v11657_v61  ;;  %v11759_v61 = vld [vmem:[#allocation5 + $0x11ec] ss:$16 sps:$4 sm:$0xff]  }
 0x313   : > { %6194 = vmatpush1.bf16.msra.mxu0 %v11658_v62  ;;  %7324 = vmatpush1.bf16.msra.mxu1 %v11661_v63  ;;  %v11762_v62 = vld [vmem:[%s12908_s17 + $0x44] ss:$80 sps:$4 sm:$0xff]   ;;  %v11754_v63 = vld [vmem:[#allocation5 + $0x11e0] ss:$16 sps:$4 sm:$0xff]  }
 0x314   : > { %6195 = vmatprep.subr.bf16.mxu0 %v11666_v0  ;;  %7325 = vmatprep.subr.bf16.mxu1 %v11669_v1  ;;  %v11757_v0 = vld [vmem:[#allocation5 + $0x11e8] ss:$16 sps:$4 sm:$0xff]   ;;  %v11765_v1 = vld [vmem:[#allocation5 + $0x1204] ss:$16 sps:$4 sm:$0xff]  }
 0x315   : > { %6128 = vmatprep.mubr.bf16.mxu0 %v11670_v2  ;;  %7258 = vmatprep.mubr.bf16.mxu1 %v11670_v2  ;;  %v11768_v2 = vld [vmem:[#allocation5 + $0x120c] ss:$16 sps:$4 sm:$0xff]  }
 0x317   : > { %6196 = vmatpush1.bf16.msra.mxu0 %v11664_v3  ;;  %7326 = vmatpush1.bf16.msra.mxu1 %v11667_v4  ;;  %v11760_v3 = vld [vmem:[%s12908_s17 + $0x40] ss:$80 sps:$4 sm:$0xff]  }
 0x318   : > { %6197 = vmatprep.subr.bf16.mxu0 %v11675_v5  ;;  %7327 = vmatprep.subr.bf16.mxu1 %v11678_v7  ;;  %v11763_v4 = vld [vmem:[#allocation5 + $0x1200] ss:$16 sps:$4 sm:$0xff]   ;;  %v11766_v5 = vld [vmem:[#allocation5 + $0x1208] ss:$16 sps:$4 sm:$0xff]   ;;  %v11774_v7 = vld [vmem:[#allocation5 + $0x122c] ss:$16 sps:$4 sm:$0xff]  }
 0x31a   : > { %6129 = vmatmul.mubr.bf16.gmra.mrb[8].mxu0 %v11672_v6  ;;  %7259 = vmatmul.mubr.bf16.gmra.mrb[8].mxu1 %v11672_v6  ;;  %v11771_v6 = vld [vmem:[#allocation5 + $0x1224] ss:$16 sps:$4 sm:$0xff]  }
 0x31b   : > { %6198 = vmatpush1.bf16.msra.mxu0 %v11673_v8  ;;  %7328 = vmatpush1.bf16.msra.mxu1 %v11676_v9  ;;  %v11775_v8 = vld [vmem:[%s12908_s17 + $0xe4] ss:$80 sps:$4 sm:$0xff]   ;;  %v11769_v9 = vld [vmem:[#allocation5 + $0x1220] ss:$16 sps:$4 sm:$0xff]  }
 0x31c   : > { %6199 = vmatprep.subr.bf16.mxu0 %v11681_v10  ;;  %7329 = vmatprep.subr.bf16.mxu1 %v11684_v11  ;;  %v11772_v10 = vld [vmem:[#allocation5 + $0x1228] ss:$16 sps:$4 sm:$0xff]   ;;  %v11780_v11 = vld [vmem:[#allocation5 + $0x1244] ss:$16 sps:$4 sm:$0xff]  }
 0x31d   : > { %6138 = vmatprep.mubr.bf16.mxu0 %v11685_v12  ;;  %7268 = vmatprep.mubr.bf16.mxu1 %v11685_v12  ;;  %v11783_v12 = vld [vmem:[#allocation5 + $0x124c] ss:$16 sps:$4 sm:$0xff]  }
 0x31f   : > { %6200 = vmatpush1.bf16.msra.mxu0 %v11679_v13  ;;  %7330 = vmatpush1.bf16.msra.mxu1 %v11682_v14  ;;  %v11777_v13 = vld [vmem:[%s12908_s17 + $0xe0] ss:$80 sps:$4 sm:$0xff]  }
 0x320   : > { %6201 = vmatprep.subr.bf16.mxu0 %v11690_v15  ;;  %7331 = vmatprep.subr.bf16.mxu1 %v11693_v16  ;;  %v11778_v14 = vld [vmem:[#allocation5 + $0x1240] ss:$16 sps:$4 sm:$0xff]   ;;  %v11781_v15 = vld [vmem:[#allocation5 + $0x1248] ss:$16 sps:$4 sm:$0xff]   ;;  %v11786_v16 = vld [vmem:[#allocation5 + $0x1264] ss:$16 sps:$4 sm:$0xff]  }
 0x322   : > { %6139 = vmatmul.mubr.bf16.gmra.mrb[12].mxu0 %v11687_v17  ;;  %7269 = vmatmul.mubr.bf16.gmra.mrb[12].mxu1 %v11687_v17  ;;  %v11789_v17 = vld [vmem:[#allocation5 + $0x126c] ss:$16 sps:$4 sm:$0xff]  }
 0x323   : > { %6202 = vmatpush1.bf16.msra.mxu0 %v11688_v18  ;;  %7332 = vmatpush1.bf16.msra.mxu1 %v11691_v19  ;;  %v11790_v18 = vld [vmem:[%s12908_s17 + $0x184] ss:$80 sps:$4 sm:$0xff]   ;;  %v11784_v19 = vld [vmem:[#allocation5 + $0x1260] ss:$16 sps:$4 sm:$0xff]  }
 0x324   : > { %6203 = vmatprep.subr.bf16.mxu0 %v11696_v20  ;;  %7333 = vmatprep.subr.bf16.mxu1 %v11699_v21  ;;  %v11787_v20 = vld [vmem:[#allocation5 + $0x1268] ss:$16 sps:$4 sm:$0xff]   ;;  %v11795_v21 = vld [vmem:[#allocation5 + $0x1284] ss:$16 sps:$4 sm:$0xff]  }
 0x325   : > { %6148 = vmatprep.mubr.bf16.mxu0 %v11700_v22  ;;  %7278 = vmatprep.mubr.bf16.mxu1 %v11700_v22  ;;  %v11798_v22 = vld [vmem:[#allocation5 + $0x128c] ss:$16 sps:$4 sm:$0xff]  }
 0x327   : > { %6204 = vmatpush1.bf16.msra.mxu0 %v11694_v23  ;;  %7334 = vmatpush1.bf16.msra.mxu1 %v11697_v24  ;;  %v11792_v23 = vld [vmem:[%s12908_s17 + $0x180] ss:$80 sps:$4 sm:$0xff]  }
 0x328   : > { %6205 = vmatprep.subr.bf16.mxu0 %v11705_v25  ;;  %7335 = vmatprep.subr.bf16.mxu1 %v11708_v26  ;;  %v11793_v24 = vld [vmem:[#allocation5 + $0x1280] ss:$16 sps:$4 sm:$0xff]   ;;  %v11796_v25 = vld [vmem:[#allocation5 + $0x1288] ss:$16 sps:$4 sm:$0xff]   ;;  %v11801_v26 = vld [vmem:[#allocation5 + $0x12a4] ss:$16 sps:$4 sm:$0xff]  }
 0x32a   : > { %6149 = vmatmul.mubr.bf16.gmra.mrb[16].mxu0 %v11702_v27  ;;  %7279 = vmatmul.mubr.bf16.gmra.mrb[16].mxu1 %v11702_v27  ;;  %v11804_v27 = vld [vmem:[#allocation5 + $0x12ac] ss:$16 sps:$4 sm:$0xff]  }
 0x32b   : > { %6206 = vmatpush1.bf16.msra.mxu0 %v11703_v28  ;;  %7336 = vmatpush1.bf16.msra.mxu1 %v11706_v29  ;;  %v11805_v28 = vld [vmem:[%s12908_s17 + $0x224] ss:$80 sps:$4 sm:$0xff]   ;;  %v11799_v29 = vld [vmem:[#allocation5 + $0x12a0] ss:$16 sps:$4 sm:$0xff]  }
 0x32c   : > { %6207 = vmatprep.subr.bf16.mxu0 %v11711_v30  ;;  %7337 = vmatprep.subr.bf16.mxu1 %v11714_v31  ;;  %v11802_v30 = vld [vmem:[#allocation5 + $0x12a8] ss:$16 sps:$4 sm:$0xff]   ;;  %v11810_v31 = vld [vmem:[#allocation5 + $0x12c4] ss:$16 sps:$4 sm:$0xff]  }
 0x32d   : > { %6158 = vmatprep.mubr.bf16.mxu0 %v11715_v32  ;;  %7288 = vmatprep.mubr.bf16.mxu1 %v11715_v32  ;;  %v11813_v32 = vld [vmem:[#allocation5 + $0x12cc] ss:$16 sps:$4 sm:$0xff]  }
 0x32f   : > { %6208 = vmatpush1.bf16.msra.mxu0 %v11709_v33  ;;  %7338 = vmatpush1.bf16.msra.mxu1 %v11712_v34  ;;  %v11807_v33 = vld [vmem:[%s12908_s17 + $0x220] ss:$80 sps:$4 sm:$0xff]  }
 0x330   : > { %6209 = vmatprep.subr.bf16.mxu0 %v11720_v35  ;;  %7339 = vmatprep.subr.bf16.mxu1 %v11723_v36  ;;  %v11808_v34 = vld [vmem:[#allocation5 + $0x12c0] ss:$16 sps:$4 sm:$0xff]   ;;  %v11811_v35 = vld [vmem:[#allocation5 + $0x12c8] ss:$16 sps:$4 sm:$0xff]   ;;  %v11816_v36 = vld [vmem:[#allocation5 + $0x12e4] ss:$16 sps:$4 sm:$0xff]  }
 0x332   : > { %6159 = vmatmul.mubr.bf16.gmra.mrb[20].mxu0 %v11717_v37  ;;  %7289 = vmatmul.mubr.bf16.gmra.mrb[20].mxu1 %v11717_v37  ;;  %v11819_v37 = vld [vmem:[#allocation5 + $0x12ec] ss:$16 sps:$4 sm:$0xff]  }
 0x333   : > { %6210 = vmatpush1.bf16.msra.mxu0 %v11718_v38  ;;  %7340 = vmatpush1.bf16.msra.mxu1 %v11721_v39  ;;  %v11820_v38 = vld [vmem:[%s12908_s17 + $0x2c4] ss:$80 sps:$4 sm:$0xff]   ;;  %v11814_v39 = vld [vmem:[#allocation5 + $0x12e0] ss:$16 sps:$4 sm:$0xff]  }
 0x334   : > { %6211 = vmatprep.subr.bf16.mxu0 %v11726_v40  ;;  %7341 = vmatprep.subr.bf16.mxu1 %v11729_v41  ;;  %v11817_v40 = vld [vmem:[#allocation5 + $0x12e8] ss:$16 sps:$4 sm:$0xff]   ;;  %v11825_v41 = vld [vmem:[#allocation5 + $0x1304] ss:$16 sps:$4 sm:$0xff]  }
 0x335   : > { %6168 = vmatprep.mubr.bf16.mxu0 %v11730_v42  ;;  %7298 = vmatprep.mubr.bf16.mxu1 %v11730_v42  ;;  %v11828_v42 = vld [vmem:[#allocation5 + $0x130c] ss:$16 sps:$4 sm:$0xff]  }
 0x337   : > { %6212 = vmatpush1.bf16.msra.mxu0 %v11724_v43  ;;  %7342 = vmatpush1.bf16.msra.mxu1 %v11727_v44  ;;  %v11822_v43 = vld [vmem:[%s12908_s17 + $0x2c0] ss:$80 sps:$4 sm:$0xff]  }
 0x338   : > { %6213 = vmatprep.subr.bf16.mxu0 %v11735_v45  ;;  %7343 = vmatprep.subr.bf16.mxu1 %v11738_v46  ;;  %v11823_v44 = vld [vmem:[#allocation5 + $0x1300] ss:$16 sps:$4 sm:$0xff]   ;;  %v11826_v45 = vld [vmem:[#allocation5 + $0x1308] ss:$16 sps:$4 sm:$0xff]   ;;  %v11831_v46 = vld [vmem:[#allocation5 + $0x1324] ss:$16 sps:$4 sm:$0xff]  }
 0x33a   : > { %6169 = vmatmul.mubr.bf16.gmra.mrb[24].mxu0 %v11732_v47  ;;  %7299 = vmatmul.mubr.bf16.gmra.mrb[24].mxu1 %v11732_v47  ;;  %v11834_v47 = vld [vmem:[#allocation5 + $0x132c] ss:$16 sps:$4 sm:$0xff]  }
 0x33b   : > { %6214 = vmatpush1.bf16.msra.mxu0 %v11733_v48  ;;  %7344 = vmatpush1.bf16.msra.mxu1 %v11736_v49  ;;  %v11835_v48 = vld [vmem:[%s12908_s17 + $0x364] ss:$80 sps:$4 sm:$0xff]   ;;  %v11829_v49 = vld [vmem:[#allocation5 + $0x1320] ss:$16 sps:$4 sm:$0xff]  }
 0x33c   : > { %6215 = vmatprep.subr.bf16.mxu0 %v11741_v50  ;;  %7345 = vmatprep.subr.bf16.mxu1 %v11744_v51  ;;  %v11832_v50 = vld [vmem:[#allocation5 + $0x1328] ss:$16 sps:$4 sm:$0xff]   ;;  %v11840_v51 = vld [vmem:[#allocation5 + $0x1344] ss:$16 sps:$4 sm:$0xff]  }
 0x33d   : > { %6178 = vmatprep.mubr.bf16.mxu0 %v11745_v52  ;;  %7308 = vmatprep.mubr.bf16.mxu1 %v11745_v52  ;;  %v11843_v52 = vld [vmem:[#allocation5 + $0x134c] ss:$16 sps:$4 sm:$0xff]  }
 0x33f   : > { %6216 = vmatpush1.bf16.msra.mxu0 %v11739_v53  ;;  %7346 = vmatpush1.bf16.msra.mxu1 %v11742_v54  ;;  %v11837_v53 = vld [vmem:[%s12908_s17 + $0x360] ss:$80 sps:$4 sm:$0xff]  }
 0x340   : > { %6217 = vmatprep.subr.bf16.mxu0 %v11750_v55  ;;  %7347 = vmatprep.subr.bf16.mxu1 %v11753_v56  ;;  %v11838_v54 = vld [vmem:[#allocation5 + $0x1340] ss:$16 sps:$4 sm:$0xff]   ;;  %v11841_v55 = vld [vmem:[#allocation5 + $0x1348] ss:$16 sps:$4 sm:$0xff]   ;;  %v11846_v56 = vld [vmem:[#allocation5 + $0x1364] ss:$16 sps:$4 sm:$0xff]  }
 0x342   : > { %6179 = vmatmul.mubr.bf16.gmra.mrb[28].mxu0 %v11747_v57  ;;  %7309 = vmatmul.mubr.bf16.gmra.mrb[28].mxu1 %v11747_v57  ;;  %v11849_v57 = vld [vmem:[#allocation5 + $0x136c] ss:$16 sps:$4 sm:$0xff]  }
 0x343   : > { %6218 = vmatpush1.bf16.msra.mxu0 %v11748_v58  ;;  %7348 = vmatpush1.bf16.msra.mxu1 %v11751_v59  ;;  %v11850_v58 = vld [vmem:[%s12908_s17 + $0x404] ss:$80 sps:$4 sm:$0xff]   ;;  %v11844_v59 = vld [vmem:[#allocation5 + $0x1360] ss:$16 sps:$4 sm:$0xff]  }
 0x344   : > { %6219 = vmatprep.subr.bf16.mxu0 %v11756_v60  ;;  %7349 = vmatprep.subr.bf16.mxu1 %v11759_v61  ;;  %v11847_v60 = vld [vmem:[#allocation5 + $0x1368] ss:$16 sps:$4 sm:$0xff]   ;;  %v11855_v61 = vld [vmem:[#allocation5 + $0x1384] ss:$16 sps:$4 sm:$0xff]  }
 0x345   : > { %6221 = vmatprep.mubr.bf16.mxu0 %v11762_v62  ;;  %7351 = vmatprep.mubr.bf16.mxu1 %v11762_v62  ;;  %v11858_v62 = vld [vmem:[#allocation5 + $0x138c] ss:$16 sps:$4 sm:$0xff]  }
 0x347   : > { %6220 = vmatpush1.bf16.msra.mxu0 %v11754_v63  ;;  %7350 = vmatpush1.bf16.msra.mxu1 %v11757_v0  ;;  %v11852_v63 = vld [vmem:[%s12908_s17 + $0x400] ss:$80 sps:$4 sm:$0xff]  }
 0x348   : > { %6302 = vmatprep.subr.bf16.mxu0 %v11765_v1  ;;  %7432 = vmatprep.subr.bf16.mxu1 %v11768_v2  ;;  %v11853_v0 = vld [vmem:[#allocation5 + $0x1380] ss:$16 sps:$4 sm:$0xff]   ;;  %v11856_v1 = vld [vmem:[#allocation5 + $0x1388] ss:$16 sps:$4 sm:$0xff]   ;;  %v11861_v2 = vld [vmem:[#allocation5 + $0x13a4] ss:$16 sps:$4 sm:$0xff]  }
 0x34a   : > { %6222 = vmatmul.mubr.bf16.vlgmr.msra.gmra.mrb[0].mxu0 %v11760_v3  ;;  %7352 = vmatmul.mubr.bf16.vlgmr.msra.gmra.mrb[0].mxu1 %v11760_v3  ;;  %v11864_v3 = vld [vmem:[#allocation5 + $0x13ac] ss:$16 sps:$4 sm:$0xff]  }
 0x34b   : > { %6303 = vmatpush1.bf16.msra.mxu0 %v11763_v4  ;;  %7433 = vmatpush1.bf16.msra.mxu1 %v11766_v5  ;;  %v11865_v4 = vld [vmem:[%s12908_s17 + $0x4a4] ss:$80 sps:$4 sm:$0xff]   ;;  %v11859_v5 = vld [vmem:[#allocation5 + $0x13a0] ss:$16 sps:$4 sm:$0xff]  }
 0x34c   : > { %6304 = vmatprep.subr.bf16.mxu0 %v11771_v6  ;;  %7434 = vmatprep.subr.bf16.mxu1 %v11774_v7  ;;  %v11862_v6 = vld [vmem:[#allocation5 + $0x13a8] ss:$16 sps:$4 sm:$0xff]   ;;  %v11870_v7 = vld [vmem:[#allocation5 + $0x13c4] ss:$16 sps:$4 sm:$0xff]  }
 0x34d   : > { %6231 = vmatprep.mubr.bf16.mxu0 %v11775_v8  ;;  %7361 = vmatprep.mubr.bf16.mxu1 %v11775_v8  ;;  %v11873_v8 = vld [vmem:[#allocation5 + $0x13cc] ss:$16 sps:$4 sm:$0xff]  }
 0x34f   : > { %6305 = vmatpush1.bf16.msra.mxu0 %v11769_v9  ;;  %7435 = vmatpush1.bf16.msra.mxu1 %v11772_v10  ;;  %v11867_v9 = vld [vmem:[%s12908_s17 + $0x4a0] ss:$80 sps:$4 sm:$0xff]  }
 0x350   : > { %6306 = vmatprep.subr.bf16.mxu0 %v11780_v11  ;;  %7436 = vmatprep.subr.bf16.mxu1 %v11783_v12  ;;  %v11868_v10 = vld [vmem:[#allocation5 + $0x13c0] ss:$16 sps:$4 sm:$0xff]   ;;  %v11871_v11 = vld [vmem:[#allocation5 + $0x13c8] ss:$16 sps:$4 sm:$0xff]   ;;  %v11876_v12 = vld [vmem:[#allocation5 + $0x13e4] ss:$16 sps:$4 sm:$0xff]  }
 0x352   : > { %6232 = vmatmul.mubr.bf16.gmra.mrb[4].mxu0 %v11777_v13  ;;  %7362 = vmatmul.mubr.bf16.gmra.mrb[4].mxu1 %v11777_v13  ;;  %v11879_v13 = vld [vmem:[#allocation5 + $0x13ec] ss:$16 sps:$4 sm:$0xff]  }
 0x353   : > { %6307 = vmatpush1.bf16.msra.mxu0 %v11778_v14  ;;  %7437 = vmatpush1.bf16.msra.mxu1 %v11781_v15  ;;  %v11882_v14 = vld [vmem:[%s12908_s17 + $0x4c] ss:$80 sps:$4 sm:$0xff]   ;;  %v11874_v15 = vld [vmem:[#allocation5 + $0x13e0] ss:$16 sps:$4 sm:$0xff]  }
 0x354   : > { %6308 = vmatprep.subr.bf16.mxu0 %v11786_v16  ;;  %7438 = vmatprep.subr.bf16.mxu1 %v11789_v17  ;;  %v11877_v16 = vld [vmem:[#allocation5 + $0x13e8] ss:$16 sps:$4 sm:$0xff]  }
 0x355   : > { %6241 = vmatprep.mubr.bf16.mxu0 %v11790_v18  ;;  %7371 = vmatprep.mubr.bf16.mxu1 %v11790_v18  ;;  %v11904_v17 = vld [vmem:[#allocation8 + $0x40] sm:$0xff]  }
 0x356   : > { %v11906_v18 = vld [vmem:[#allocation8 + $0xc0] sm:$0xff]  }
 0x357   : > { %6309 = vmatpush1.bf16.msra.mxu0 %v11784_v19  ;;  %7439 = vmatpush1.bf16.msra.mxu1 %v11787_v20  ;;  %v11880_v19 = vld [vmem:[%s12908_s17 + $0x48] ss:$80 sps:$4 sm:$0xff]   ;;  %v11883_v20 = vld [vmem:[%s12908_s17 + $0xec] ss:$80 sps:$4 sm:$0xff]  }
 0x358   : > { %6310 = vmatprep.subr.bf16.mxu0 %v11795_v21  ;;  %7440 = vmatprep.subr.bf16.mxu1 %v11798_v22  ;;  %v11905_v21 = vld [vmem:[#allocation8] sm:$0xff]  }
 0x359   : > { %v11907_v22 = vld [vmem:[#allocation8 + $0x80] sm:$0xff]  }
 0x35a   : > { %6242 = vmatmul.mubr.bf16.gmra.mrb[8].mxu0 %v11792_v23  ;;  %7372 = vmatmul.mubr.bf16.gmra.mrb[8].mxu1 %v11792_v23  ;;  %v11908_v23 = vld [vmem:[#allocation8 + $0x48] sm:$0xff]  }
 0x35b   : > { %6311 = vmatpush1.bf16.msra.mxu0 %v11793_v24  ;;  %7441 = vmatpush1.bf16.msra.mxu1 %v11796_v25  ;;  %v11910_v24 = vld [vmem:[#allocation8 + $0xc8] sm:$0xff]  }
 0x35c   : > { %6312 = vmatprep.subr.bf16.mxu0 %v11801_v26  ;;  %7442 = vmatprep.subr.bf16.mxu1 %v11804_v27  ;;  %v11909_v25 = vld [vmem:[#allocation8 + $0x8] sm:$0xff]   ;;  %v11912_v27 = vld [vmem:[#allocation8 + $0x50] sm:$0xff]  }
 0x35d   : > { %6251 = vmatprep.mubr.bf16.mxu0 %v11805_v28  ;;  %7381 = vmatprep.mubr.bf16.mxu1 %v11805_v28  ;;  %v11911_v26 = vld [vmem:[#allocation8 + $0x88] sm:$0xff]   ;;  %v11914_v28 = vld [vmem:[#allocation8 + $0xd0] sm:$0xff]  }
 0x35f   : > { %6313 = vmatpush1.bf16.msra.mxu0 %v11799_v29  ;;  %7443 = vmatpush1.bf16.msra.mxu1 %v11802_v30  ;;  %v11885_v29 = vld [vmem:[%s12908_s17 + $0xe8] ss:$80 sps:$4 sm:$0xff]   ;;  %v11886_v30 = vld [vmem:[%s12908_s17 + $0x18c] ss:$80 sps:$4 sm:$0xff]  }
 0x360   : > { %6314 = vmatprep.subr.bf16.mxu0 %v11810_v31  ;;  %7444 = vmatprep.subr.bf16.mxu1 %v11813_v32  ;;  %v11913_v31 = vld [vmem:[#allocation8 + $0x10] sm:$0xff]  }
 0x361   : > { %v11915_v32 = vld [vmem:[#allocation8 + $0x90] sm:$0xff]  }
 0x362   : > { %6252 = vmatmul.mubr.bf16.gmra.mrb[12].mxu0 %v11807_v33  ;;  %7382 = vmatmul.mubr.bf16.gmra.mrb[12].mxu1 %v11807_v33  ;;  %v11916_v33 = vld [vmem:[#allocation8 + $0x58] sm:$0xff]  }
 0x363   : > { %6315 = vmatpush1.bf16.msra.mxu0 %v11808_v34  ;;  %7445 = vmatpush1.bf16.msra.mxu1 %v11811_v35  ;;  %v11918_v34 = vld [vmem:[#allocation8 + $0xd8] sm:$0xff]  }
 0x364   : > { %6316 = vmatprep.subr.bf16.mxu0 %v11816_v36  ;;  %7446 = vmatprep.subr.bf16.mxu1 %v11819_v37  ;;  %v11917_v35 = vld [vmem:[#allocation8 + $0x18] sm:$0xff]   ;;  %v11920_v37 = vld [vmem:[#allocation8 + $0x60] sm:$0xff]  }
 0x365   : > { %6261 = vmatprep.mubr.bf16.mxu0 %v11820_v38  ;;  %7391 = vmatprep.mubr.bf16.mxu1 %v11820_v38  ;;  %v11919_v36 = vld [vmem:[#allocation8 + $0x98] sm:$0xff]   ;;  %v11922_v38 = vld [vmem:[#allocation8 + $0xe0] sm:$0xff]  }
 0x367   : > { %6317 = vmatpush1.bf16.msra.mxu0 %v11814_v39  ;;  %7447 = vmatpush1.bf16.msra.mxu1 %v11817_v40  ;;  %v11888_v39 = vld [vmem:[%s12908_s17 + $0x188] ss:$80 sps:$4 sm:$0xff]   ;;  %v11889_v40 = vld [vmem:[%s12908_s17 + $0x22c] ss:$80 sps:$4 sm:$0xff]  }
 0x368   : > { %6318 = vmatprep.subr.bf16.mxu0 %v11825_v41  ;;  %7448 = vmatprep.subr.bf16.mxu1 %v11828_v42  ;;  %v11921_v41 = vld [vmem:[#allocation8 + $0x20] sm:$0xff]  }
 0x369   : > { %v11923_v42 = vld [vmem:[#allocation8 + $0xa0] sm:$0xff]  }
 0x36a   : > { %6262 = vmatmul.mubr.bf16.gmra.mrb[16].mxu0 %v11822_v43  ;;  %7392 = vmatmul.mubr.bf16.gmra.mrb[16].mxu1 %v11822_v43  ;;  %v11924_v43 = vld [vmem:[#allocation8 + $0x68] sm:$0xff]  }
 0x36b   : > { %6319 = vmatpush1.bf16.msra.mxu0 %v11823_v44  ;;  %7449 = vmatpush1.bf16.msra.mxu1 %v11826_v45  ;;  %v11926_v44 = vld [vmem:[#allocation8 + $0xe8] sm:$0xff]  }
 0x36c   : > { %6320 = vmatprep.subr.bf16.mxu0 %v11831_v46  ;;  %7450 = vmatprep.subr.bf16.mxu1 %v11834_v47  ;;  %v11925_v45 = vld [vmem:[#allocation8 + $0x28] sm:$0xff]   ;;  %v11891_v47 = vld [vmem:[%s12908_s17 + $0x228] ss:$80 sps:$4 sm:$0xff]  }
 0x36d   : > { %6271 = vmatprep.mubr.bf16.mxu0 %v11835_v48  ;;  %7401 = vmatprep.mubr.bf16.mxu1 %v11835_v48  ;;  %v11927_v46 = vld [vmem:[#allocation8 + $0xa8] sm:$0xff]  }
 0x36e   : > { %v11892_v48 = vld [vmem:[%s12908_s17 + $0x2cc] ss:$80 sps:$4 sm:$0xff]  }
 0x36f   : > { %6321 = vmatpush1.bf16.msra.mxu0 %v11829_v49  ;;  %7451 = vmatpush1.bf16.msra.mxu1 %v11832_v50  ;;  %v11894_v49 = vld [vmem:[%s12908_s17 + $0x2c8] ss:$80 sps:$4 sm:$0xff]   ;;  %v11895_v50 = vld [vmem:[%s12908_s17 + $0x36c] ss:$80 sps:$4 sm:$0xff]  }
 0x370   : > { %6322 = vmatprep.subr.bf16.mxu0 %v11840_v51  ;;  %7452 = vmatprep.subr.bf16.mxu1 %v11843_v52  ;;  %v11897_v51 = vld [vmem:[%s12908_s17 + $0x368] ss:$80 sps:$4 sm:$0xff]   ;;  %v11898_v52 = vld [vmem:[%s12908_s17 + $0x40c] ss:$80 sps:$4 sm:$0xff]  }
 0x372   : > { %6272 = vmatmul.mubr.bf16.gmra.mrb[20].mxu0 %v11837_v53  ;;  %7402 = vmatmul.mubr.bf16.gmra.mrb[20].mxu1 %v11837_v53  ;;  %v11900_v53 = vld [vmem:[%s12908_s17 + $0x408] ss:$80 sps:$4 sm:$0xff]  }
 0x373   : > { %6323 = vmatpush1.bf16.msra.mxu0 %v11838_v54  ;;  %7453 = vmatpush1.bf16.msra.mxu1 %v11841_v55  ;;  %v11901_v54 = vld [vmem:[%s12908_s17 + $0x4ac] ss:$80 sps:$4 sm:$0xff]   ;;  %v11903_v55 = vld [vmem:[%s12908_s17 + $0x4a8] ss:$80 sps:$4 sm:$0xff]  }
 0x374   : > { %6324 = vmatprep.subr.bf16.mxu0 %v11846_v56  ;;  %7454 = vmatprep.subr.bf16.mxu1 %v11849_v57  ;;  %v11928_v56 = vld [vmem:[#allocation8 + $0x70] sm:$0xff]  }
 0x375   : > { %6281 = vmatprep.mubr.bf16.mxu0 %v11850_v58  ;;  %7411 = vmatprep.mubr.bf16.mxu1 %v11850_v58  ;;  %v11929_v57 = vld [vmem:[#allocation8 + $0x30] sm:$0xff]  }
 0x376   : > { %v11930_v58 = vld [vmem:[#allocation8 + $0xf0] sm:$0xff]  }
 0x377   : > { %6325 = vmatpush1.bf16.msra.mxu0 %v11844_v59  ;;  %7455 = vmatpush1.bf16.msra.mxu1 %v11847_v60  ;;  %v11931_v59 = vld [vmem:[#allocation8 + $0xb0] sm:$0xff]   ;;  %v11932_v60 = vld [vmem:[#allocation8 + $0x78] sm:$0xff]  }
 0x378   : > { %6326 = vmatprep.subr.bf16.mxu0 %v11855_v61  ;;  %7456 = vmatprep.subr.bf16.mxu1 %v11858_v62  ;;  %v11933_v61 = vld [vmem:[#allocation8 + $0x38] sm:$0xff]  }
 0x379   : > { %v11934_v62 = vld [vmem:[#allocation8 + $0xf8] sm:$0xff]  }
 0x37a   : > { %6282 = vmatmul.mubr.bf16.gmra.mrb[24].mxu0 %v11852_v63  ;;  %7412 = vmatmul.mubr.bf16.gmra.mrb[24].mxu1 %v11852_v63  ;;  %v11935_v63 = vld [vmem:[#allocation8 + $0xb8] sm:$0xff]  }
 0x37b   : > { %6327 = vmatpush1.bf16.msra.mxu0 %v11853_v0  ;;  %7457 = vmatpush1.bf16.msra.mxu1 %v11856_v1  ;;  %v13090_v0 = vld [vmem:[#allocation11] sm:$0xff]   ;;  %v1265_v1 = vlaneseq }
 0x37c   : > { %6328 = vmatprep.subr.bf16.mxu0 %v11861_v2  ;;  %7458 = vmatprep.subr.bf16.mxu1 %v11864_v3 }
 0x37d   : > { %6291 = vmatprep.mubr.bf16.mxu0 %v11865_v4  ;;  %7421 = vmatprep.mubr.bf16.mxu1 %v11865_v4  ;;  %v1266_v2 = vshrl.u32 %v1265_v1, 7 }
 0x37f   : > { %6329 = vmatpush1.bf16.msra.mxu0 %v11859_v5  ;;  %7459 = vmatpush1.bf16.msra.mxu1 %v11862_v6  ;;  %v1267_v3 = vsub.s32 0, %v1266_v2  ;;  %v1275_v4 = vsub.s32 2, %v1266_v2  ;;  %v1263_v5 = vld [vmem:[#allocation7] sm:$0xf]  ;;  %v1271_v6 = vsub.s32 1, %v1266_v2 }
 0x380   : > { %6330 = vmatprep.subr.bf16.mxu0 %v11870_v7  ;;  %7460 = vmatprep.subr.bf16.mxu1 %v11873_v8  ;;  %v1279_v7 = vsub.s32 3, %v1266_v2 }
 0x381   : > { %v13093_v8 = vrot.slane %v1263_v5, %v1267_v3 }
 0x382   : > { %6292 = vmatmul.mubr.bf16.gmra.mrb[28].mxu0 %v11867_v9  ;;  %7422 = vmatmul.mubr.bf16.gmra.mrb[28].mxu1 %v11867_v9  ;;  %v13095_v9 = vrot.slane %v1263_v5, %v1275_v4 }
 0x383   : > { %6331 = vmatpush1.bf16.msra.mxu0 %v11868_v10  ;;  %7461 = vmatpush1.bf16.msra.mxu1 %v11871_v11  ;;  %v13097_v10 = vrot.slane %v1263_v5, %v1271_v6  ;;  %v13099_v11 = vrot.slane %v1263_v5, %v1279_v7 }
 0x384   : > { %6332 = vmatprep.subr.bf16.mxu0 %v11876_v12  ;;  %7462 = vmatprep.subr.bf16.mxu1 %v11879_v13 }
 0x385   : > { %6334 = vmatprep.mubr.bf16.mxu0 %v11882_v14  ;;  %7464 = vmatprep.mubr.bf16.mxu1 %v11882_v14 }
 0x387   : > { %6333 = vmatpush1.bf16.msra.mxu0 %v11874_v15  ;;  %7463 = vmatpush1.bf16.msra.mxu1 %v11877_v16 }
 0x388   : > { %9702 = vmatprep.subr.bf16.mxu0 %v11904_v17  ;;  %9766 = vmatprep.subr.bf16.mxu1 %v11906_v18 }
 0x38a   : > { %6335 = vmatmul.mubr.bf16.vlgmr.msra.gmra.mrb[0].mxu0 %v11880_v19  ;;  %7465 = vmatmul.mubr.bf16.vlgmr.msra.gmra.mrb[0].mxu1 %v11880_v19 }
 0x38b   : > { %6344 = vmatprep.mubr.bf16.mxu0 %v11883_v20  ;;  %7474 = vmatprep.mubr.bf16.mxu1 %v11883_v20 }
 0x38c   : > { %9703 = vmatpush3.bf16.msra.mxu0 %v11905_v21  ;;  %9767 = vmatpush3.bf16.msra.mxu1 %v11907_v22 }
 0x38d   : > { %9704 = vmatprep.subr.bf16.mxu0 %v11908_v23  ;;  %9768 = vmatprep.subr.bf16.mxu1 %v11910_v24 }
 0x390   : > { %9705 = vmatpush3.bf16.msra.mxu0 %v11909_v25  ;;  %9769 = vmatpush3.bf16.msra.mxu1 %v11911_v26 }
 0x391   : > { %9706 = vmatprep.subr.bf16.mxu0 %v11912_v27  ;;  %9770 = vmatprep.subr.bf16.mxu1 %v11914_v28 }
 0x392   : > { %6345 = vmatmul.mubr.bf16.gmra.mrb[4].mxu0 %v11885_v29  ;;  %7475 = vmatmul.mubr.bf16.gmra.mrb[4].mxu1 %v11885_v29 }
 0x393   : > { %6354 = vmatprep.mubr.bf16.mxu0 %v11886_v30  ;;  %7484 = vmatprep.mubr.bf16.mxu1 %v11886_v30 }
 0x394   : > { %9707 = vmatpush3.bf16.msra.mxu0 %v11913_v31  ;;  %9771 = vmatpush3.bf16.msra.mxu1 %v11915_v32 }
 0x395   : > { %9708 = vmatprep.subr.bf16.mxu0 %v11916_v33  ;;  %9772 = vmatprep.subr.bf16.mxu1 %v11918_v34 }
 0x398   : > { %9709 = vmatpush3.bf16.msra.mxu0 %v11917_v35  ;;  %9773 = vmatpush3.bf16.msra.mxu1 %v11919_v36 }
 0x399   : > { %9710 = vmatprep.subr.bf16.mxu0 %v11920_v37  ;;  %9774 = vmatprep.subr.bf16.mxu1 %v11922_v38 }
 0x39a   : > { %6355 = vmatmul.mubr.bf16.gmra.mrb[8].mxu0 %v11888_v39  ;;  %7485 = vmatmul.mubr.bf16.gmra.mrb[8].mxu1 %v11888_v39 }
 0x39b   : > { %6364 = vmatprep.mubr.bf16.mxu0 %v11889_v40  ;;  %7494 = vmatprep.mubr.bf16.mxu1 %v11889_v40 }
 0x39c   : > { %9711 = vmatpush3.bf16.msra.mxu0 %v11921_v41  ;;  %9775 = vmatpush3.bf16.msra.mxu1 %v11923_v42 }
 0x39d   : > { %9712 = vmatprep.subr.bf16.mxu0 %v11924_v43  ;;  %9776 = vmatprep.subr.bf16.mxu1 %v11926_v44 }
 0x3a0   : > { %9713 = vmatpush3.bf16.msra.mxu0 %v11925_v45  ;;  %9777 = vmatpush3.bf16.msra.mxu1 %v11927_v46 }
 0x3a1   : > { %9714 = vmatprep.subr.bf16.mxu0 %v11928_v56  ;;  %9778 = vmatprep.subr.bf16.mxu1 %v11930_v58 }
 0x3a2   : > { %6365 = vmatmul.mubr.bf16.gmra.mrb[12].mxu0 %v11891_v47  ;;  %7495 = vmatmul.mubr.bf16.gmra.mrb[12].mxu1 %v11891_v47 }
 0x3a3   : > { %6374 = vmatprep.mubr.bf16.mxu0 %v11892_v48  ;;  %7504 = vmatprep.mubr.bf16.mxu1 %v11892_v48 }
 0x3a4   : > { %9715 = vmatpush3.bf16.msra.mxu0 %v11929_v57  ;;  %9779 = vmatpush3.bf16.msra.mxu1 %v11931_v59 }
 0x3a5   : > { %9716 = vmatprep.subr.bf16.mxu0 %v11932_v60  ;;  %9780 = vmatprep.subr.bf16.mxu1 %v11934_v62 }
 0x3a8   : > { %9717 = vmatpush3.bf16.msra.mxu0 %v11933_v61  ;;  %9781 = vmatpush3.bf16.msra.mxu1 %v11935_v63 }
 0x3a9   : > { %9862 = vmatprep.subr.bf16.mxu0 %v13090_v0 }
 0x3aa   : > { %6375 = vmatmul.mubr.bf16.gmra.mrb[16].mxu0 %v11894_v49  ;;  %7505 = vmatmul.mubr.bf16.gmra.mrb[16].mxu1 %v11894_v49 }
 0x3ab   : > { %6384 = vmatprep.mubr.bf16.mxu0 %v11895_v50  ;;  %7514 = vmatprep.mubr.bf16.mxu1 %v11895_v50 }
 0x3b2   : > { %6385 = vmatmul.mubr.bf16.gmra.mrb[20].mxu0 %v11897_v51  ;;  %7515 = vmatmul.mubr.bf16.gmra.mrb[20].mxu1 %v11897_v51 }
 0x3b3   : > { %6394 = vmatprep.mubr.bf16.mxu0 %v11898_v52  ;;  %7524 = vmatprep.mubr.bf16.mxu1 %v11898_v52 }
 0x3ba   : > { %6395 = vmatmul.mubr.bf16.gmra.mrb[24].mxu0 %v11900_v53  ;;  %7525 = vmatmul.mubr.bf16.gmra.mrb[24].mxu1 %v11900_v53 }
 0x3bb   : > { %6404 = vmatprep.mubr.bf16.mxu0 %v11901_v54  ;;  %7534 = vmatprep.mubr.bf16.mxu1 %v11901_v54 }
 0x3c2   : > { %6405 = vmatmul.mubr.bf16.gmra.mrb[28].mxu0 %v11903_v55  ;;  %7535 = vmatmul.mubr.bf16.gmra.mrb[28].mxu1 %v11903_v55 }
 0x45d   : > { %v6336_v12 = vpop.f32.mrb[0].mxu0  ;;  %v7466_v13 = vpop.f32.mrb[0].mxu1 }
 0x45e   : > { %v9926_v14 = vadd.f32 %v6336_v12, %v13093_v8  ;;  %v9958_v15 = vadd.f32 %v7466_v13, %v13095_v9  ;;  %v6338_v16 = vpop.f32.mrb[1].mxu0  ;;  %v7468_v17 = vpop.f32.mrb[1].mxu1  ;;  %v11937_v13 = vld [vmem:[#allocation11 + $0x8] sm:$0xff]  }
 0x45f   : > { %v9927_v18 = vadd.f32 %v6338_v16, %v13097_v10  ;;  %v9959_v19 = vadd.f32 %v7468_v17, %v13099_v11  ;;  %v6340_v20 = vpop.f32.mrb[2].mxu0  ;;  %v7470_v21 = vpop.f32.mrb[2].mxu1 }
 0x460   : > { %11952 = vtanh.f32 %v9926_v14  ;;  %v9928_v22 = vadd.f32 %v6340_v20, %v13093_v8  ;;  %v6342_v23 = vpop.f32.mrb[3].mxu0  ;;  %v7472_v24 = vpop.f32.mrb[3].mxu1  ;;  %v9960_v25 = vadd.f32 %v7470_v21, %v13095_v9 }
 0x461   : > { %11954 = vtanh.f32 %v9958_v15  ;;  %v9929_v26 = vadd.f32 %v6342_v23, %v13097_v10  ;;  %v9961_v27 = vadd.f32 %v7472_v24, %v13099_v11 }
 0x462   : > { %11956 = vtanh.f32 %v9927_v18 }
 0x463   : > { %11958 = vtanh.f32 %v9959_v19 }
 0x464   : > { %11960 = vtanh.f32 %v9928_v22 }
 0x465   : > { %11962 = vtanh.f32 %v9960_v25  ;;  %v6346_v28 = vpop.f32.mrb[4].mxu0  ;;  %v7476_v29 = vpop.f32.mrb[4].mxu1 }
 0x466   : > { %11964 = vtanh.f32 %v9929_v26  ;;  %v9930_v30 = vadd.f32 %v6346_v28, %v13093_v8  ;;  %v9962_v31 = vadd.f32 %v7476_v29, %v13095_v9  ;;  %v6348_v32 = vpop.f32.mrb[5].mxu0  ;;  %v7478_v33 = vpop.f32.mrb[5].mxu1 }
 0x467   : > { %11966 = vtanh.f32 %v9961_v27  ;;  %v9931_v34 = vadd.f32 %v6348_v32, %v13097_v10  ;;  %v9963_v35 = vadd.f32 %v7478_v33, %v13099_v11  ;;  %v6350_v36 = vpop.f32.mrb[6].mxu0  ;;  %v7480_v37 = vpop.f32.mrb[6].mxu1 }
 0x468   : > { %11968 = vtanh.f32 %v9930_v30  ;;  %v9932_v38 = vadd.f32 %v6350_v36, %v13093_v8  ;;  %v6352_v39 = vpop.f32.mrb[7].mxu0  ;;  %v7482_v40 = vpop.f32.mrb[7].mxu1  ;;  %v9964_v41 = vadd.f32 %v7480_v37, %v13095_v9 }
 0x469   : > { %11970 = vtanh.f32 %v9962_v31  ;;  %v9933_v43 = vadd.f32 %v6352_v39, %v13097_v10  ;;  %v9965_v45 = vadd.f32 %v7482_v40, %v13099_v11 }
 0x46a   : > { %v11953_v42 = vpop.eup %11952  ;;  %11972 = vtanh.f32 %v9931_v34 }
 0x46b   : > { %v11955_v44 = vpop.eup %11954  ;;  %11974 = vtanh.f32 %v9963_v35 }
 0x46c   : > { %v11957_v46 = vpop.eup %11956  ;;  %11976 = vtanh.f32 %v9932_v38 }
 0x46d   : > { %v11959_v47 = vpop.eup %11958  ;;  %11978 = vtanh.f32 %v9964_v41  ;;  %v6356_v48 = vpop.f32.mrb[8].mxu0 }
 0x46e   : > { %v7486_v49 = vpop.f32.mrb[8].mxu1  ;;  %v11961_v50 = vpop.eup %11960  ;;  %11980 = vtanh.f32 %v9933_v43  ;;  %v9934_v51 = vadd.f32 %v6356_v48, %v13093_v8 }
 0x46f   : > { %v9966_v52 = vadd.f32 %v7486_v49, %v13095_v9  ;;  %v6358_v53 = vpop.f32.mrb[9].mxu0  ;;  %v7488_v54 = vpop.f32.mrb[9].mxu1  ;;  %11982 = vtanh.f32 %v9965_v45  ;;  %v7609_v60 = vpack.c.bf16 %v11961_v50, %v11953_v42 }
 0x470   : > { %v11963_v55 = vpop.eup %11962  ;;  %v9935_v56 = vadd.f32 %v6358_v53, %v13097_v10  ;;  %v9967_v57 = vadd.f32 %v7488_v54, %v13099_v11  ;;  %v6360_v58 = vpop.f32.mrb[10].mxu0  ;;  %11984 = vtanh.f32 %v9934_v51 }
 0x471   : > { %v7490_v59 = vpop.f32.mrb[10].mxu1  ;;  %v11965_v61 = vpop.eup %11964  ;;  %v9936_v62 = vadd.f32 %v6360_v58, %v13093_v8  ;;  %v7611_v2 = vpack.c.bf16 %v11963_v55, %v11955_v44  ;;  %11986 = vtanh.f32 %v9966_v52 }
 0x472   : > { %v6362_v63 = vpop.f32.mrb[11].mxu0  ;;  %v7492_v1 = vpop.f32.mrb[11].mxu1  ;;  %v9968_v4 = vadd.f32 %v7490_v59, %v13095_v9  ;;  %v7610_v5 = vpack.c.bf16 %v11965_v61, %v11957_v46  ;;  %11988 = vtanh.f32 %v9935_v56 }
 0x473   : > { %v11967_v3 = vpop.eup %11966  ;;  %v9937_v7 = vadd.f32 %v6362_v63, %v13097_v10  ;;  %11990 = vtanh.f32 %v9967_v57  ;;  %v9969_v15 = vadd.f32 %v7492_v1, %v13099_v11 }
 0x474   : > { %v11969_v6 = vpop.eup %11968  ;;  %v7612_v12 = vpack.c.bf16 %v11967_v3, %v11959_v47  ;;  %7936 = vmatprep.mubr.bf16.mxu0 %v7610_v5  ;;  %11992 = vtanh.f32 %v9936_v62 }
 0x475   : > { %v11971_v14 = vpop.eup %11970  ;;  %7937 = vmatmul.mubr.bf16.vlgmr.msra.gmra.mrb[32].mxu0 %v7609_v60  ;;  %11994 = vtanh.f32 %v9968_v4  ;;  %v6366_v18 = vpop.f32.mrb[12].mxu0 }
 0x476   : > { %v11973_v16 = vpop.eup %11972  ;;  %8033 = vmatprep.mubr.bf16.mxu1 %v7612_v12  ;;  %v7496_v19 = vpop.f32.mrb[12].mxu1  ;;  %9863 = vmatpush3.bf16.msra.mxu0 %v13090_v0  ;;  %11996 = vtanh.f32 %v9937_v7  ;;  %v9938_v21 = vadd.f32 %v6366_v18, %v13093_v8 }
 0x477   : > { %v11975_v17 = vpop.eup %11974  ;;  %8034 = vmatmul.mubr.bf16.vlgmr.msra.gmra.mrb[32].mxu1 %v7611_v2  ;;  %v9970_v22 = vadd.f32 %v7496_v19, %v13095_v9  ;;  %v6368_v23 = vpop.f32.mrb[13].mxu0  ;;  %9864 = vmatprep.subr.bf16.mxu0 %v11937_v13  ;;  %11998 = vtanh.f32 %v9969_v15 }
 0x478   : > { %v11977_v20 = vpop.eup %11976  ;;  %v7498_v24 = vpop.f32.mrb[13].mxu1  ;;  %v9939_v26 = vadd.f32 %v6368_v23, %v13097_v10  ;;  %12000 = vtanh.f32 %v9938_v21 }
 0x479   : > { %v11979_v25 = vpop.eup %11978  ;;  %v9971_v27 = vadd.f32 %v7498_v24, %v13099_v11  ;;  %v6370_v28 = vpop.f32.mrb[14].mxu0  ;;  %v7613_v30 = vpack.c.bf16 %v11977_v20, %v11969_v6  ;;  %12002 = vtanh.f32 %v9970_v22 }
 0x47a   : > { %v7500_v29 = vpop.f32.mrb[14].mxu1  ;;  %v11981_v31 = vpop.eup %11980  ;;  %v9940_v0 = vadd.f32 %v6370_v28, %v13093_v8  ;;  %v7615_v34 = vpack.c.bf16 %v11979_v25, %v11971_v14  ;;  %9865 = vmatpush3.bf16.msra.mxu0 %v11937_v13  ;;  %12004 = vtanh.f32 %v9939_v26 }
 0x47b   : > { %v6372_v32 = vpop.f32.mrb[15].mxu0  ;;  %v7502_v33 = vpop.f32.mrb[15].mxu1  ;;  %v9972_v36 = vadd.f32 %v7500_v29, %v13095_v9  ;;  %v7614_v37 = vpack.c.bf16 %v11981_v31, %v11973_v16  ;;  %12006 = vtanh.f32 %v9971_v27 }
 0x47c   : > { %v11983_v35 = vpop.eup %11982  ;;  %v9941_v39 = vadd.f32 %v6372_v32, %v13097_v10  ;;  %v9973_v42 = vadd.f32 %v7502_v33, %v13099_v11  ;;  %12008 = vtanh.f32 %v9940_v0 }
 0x47d   : > { %v11985_v38 = vpop.eup %11984  ;;  %v7616_v40 = vpack.c.bf16 %v11983_v35, %v11975_v17  ;;  %7944 = vmatprep.mubr.bf16.mxu0 %v7614_v37  ;;  %12010 = vtanh.f32 %v9972_v36  ;;  %v6376_v45 = vpop.f32.mrb[16].mxu0 }
 0x47e   : > { %v11987_v41 = vpop.eup %11986  ;;  %7945 = vmatmul.mubr.bf16.gmra.mrb[36].mxu0 %v7613_v30  ;;  %v7506_v46 = vpop.f32.mrb[16].mxu1  ;;  %12012 = vtanh.f32 %v9941_v39  ;;  %v9942_v48 = vadd.f32 %v6376_v45, %v13093_v8 }
 0x47f   : > { %v11989_v43 = vpop.eup %11988  ;;  %8041 = vmatprep.mubr.bf16.mxu1 %v7616_v40  ;;  %v9974_v49 = vadd.f32 %v7506_v46, %v13095_v9  ;;  %v6378_v50 = vpop.f32.mrb[17].mxu0  ;;  %12014 = vtanh.f32 %v9973_v42 }
 0x480   : > { %v11991_v44 = vpop.eup %11990  ;;  %8042 = vmatmul.mubr.bf16.gmra.mrb[36].mxu1 %v7615_v34  ;;  %v7508_v51 = vpop.f32.mrb[17].mxu1  ;;  %v9943_v53 = vadd.f32 %v6378_v50, %v13097_v10  ;;  %12016 = vtanh.f32 %v9942_v48 }
 0x481   : > { %v11993_v47 = vpop.eup %11992  ;;  %v9975_v54 = vadd.f32 %v7508_v51, %v13099_v11  ;;  %v6380_v55 = vpop.f32.mrb[18].mxu0  ;;  %12018 = vtanh.f32 %v9974_v49 }
 0x482   : > { %v11995_v52 = vpop.eup %11994  ;;  %v7510_v56 = vpop.f32.mrb[18].mxu1  ;;  %v7617_v57 = vpack.c.bf16 %v11993_v47, %v11985_v38  ;;  %v9944_v59 = vadd.f32 %v6380_v55, %v13093_v8  ;;  %12020 = vtanh.f32 %v9943_v53 }
 0x483   : > { %v11997_v58 = vpop.eup %11996  ;;  %v6382_v60 = vpop.f32.mrb[19].mxu0  ;;  %v7619_v62 = vpack.c.bf16 %v11995_v52, %v11987_v41  ;;  %v9976_v1 = vadd.f32 %v7510_v56, %v13095_v9  ;;  %12022 = vtanh.f32 %v9975_v54 }
 0x484   : > { %v7512_v61 = vpop.f32.mrb[19].mxu1  ;;  %v11999_v63 = vpop.eup %11998  ;;  %v7618_v2 = vpack.c.bf16 %v11997_v58, %v11989_v43  ;;  %v9945_v4 = vadd.f32 %v6382_v60, %v13097_v10  ;;  %12024 = vtanh.f32 %v9944_v59 }
 0x485   : > { %v12001_v3 = vpop.eup %12000  ;;  %v7620_v5 = vpack.c.bf16 %v11999_v63, %v11991_v44  ;;  %v9977_v7 = vadd.f32 %v7512_v61, %v13099_v11  ;;  %12026 = vtanh.f32 %v9976_v1  ;;  %v6386_v14 = vpop.f32.mrb[20].mxu0 }
 0x486   : > { %v12003_v6 = vpop.eup %12002  ;;  %7952 = vmatprep.mubr.bf16.mxu0 %v7618_v2  ;;  %v7516_v15 = vpop.f32.mrb[20].mxu1  ;;  %12028 = vtanh.f32 %v9945_v4  ;;  %v9946_v17 = vadd.f32 %v6386_v14, %v13093_v8 }
 0x487   : > { %v12005_v12 = vpop.eup %12004  ;;  %8049 = vmatprep.mubr.bf16.mxu1 %v7620_v5  ;;  %7953 = vmatmul.mubr.bf16.gmra.mrb[40].mxu0 %v7617_v57  ;;  %v9978_v18 = vadd.f32 %v7516_v15, %v13095_v9  ;;  %v6388_v19 = vpop.f32.mrb[21].mxu0  ;;  %12030 = vtanh.f32 %v9977_v7 }
 0x488   : > { %v12007_v13 = vpop.eup %12006  ;;  %8050 = vmatmul.mubr.bf16.gmra.mrb[40].mxu1 %v7619_v62  ;;  %v7518_v20 = vpop.f32.mrb[21].mxu1  ;;  %v9947_v22 = vadd.f32 %v6388_v19, %v13097_v10  ;;  %12032 = vtanh.f32 %v9946_v17 }
 0x489   : > { %v12009_v16 = vpop.eup %12008  ;;  %v9979_v23 = vadd.f32 %v7518_v20, %v13099_v11  ;;  %v6390_v24 = vpop.f32.mrb[22].mxu0  ;;  %12034 = vtanh.f32 %v9978_v18 }
 0x48a   : > { %v12011_v21 = vpop.eup %12010  ;;  %v7520_v25 = vpop.f32.mrb[22].mxu1  ;;  %v7621_v26 = vpack.c.bf16 %v12009_v16, %v12001_v3  ;;  %v9948_v28 = vadd.f32 %v6390_v24, %v13093_v8  ;;  %12036 = vtanh.f32 %v9947_v22 }
 0x48b   : > { %v12013_v27 = vpop.eup %12012  ;;  %v6392_v29 = vpop.f32.mrb[23].mxu0  ;;  %v7623_v31 = vpack.c.bf16 %v12011_v21, %v12003_v6  ;;  %v9980_v32 = vadd.f32 %v7520_v25, %v13095_v9  ;;  %12038 = vtanh.f32 %v9979_v23 }
 0x48c   : > { %v7522_v30 = vpop.f32.mrb[23].mxu1  ;;  %v12015_v0 = vpop.eup %12014  ;;  %v7622_v33 = vpack.c.bf16 %v12013_v27, %v12005_v12  ;;  %v9949_v35 = vadd.f32 %v6392_v29, %v13097_v10  ;;  %12040 = vtanh.f32 %v9948_v28 }
 0x48d   : > { %v12017_v34 = vpop.eup %12016  ;;  %v7624_v36 = vpack.c.bf16 %v12015_v0, %v12007_v13  ;;  %v9981_v38 = vadd.f32 %v7522_v30, %v13099_v11  ;;  %12042 = vtanh.f32 %v9980_v32  ;;  %v6396_v41 = vpop.f32.mrb[24].mxu0 }
 0x48e   : > { %v12019_v37 = vpop.eup %12018  ;;  %7960 = vmatprep.mubr.bf16.mxu0 %v7622_v33  ;;  %v7526_v42 = vpop.f32.mrb[24].mxu1  ;;  %12044 = vtanh.f32 %v9949_v35  ;;  %v9950_v44 = vadd.f32 %v6396_v41, %v13093_v8 }
 0x48f   : > { %v12021_v39 = vpop.eup %12020  ;;  %8057 = vmatprep.mubr.bf16.mxu1 %v7624_v36  ;;  %7961 = vmatmul.mubr.bf16.gmra.mrb[44].mxu0 %v7621_v26  ;;  %v9982_v45 = vadd.f32 %v7526_v42, %v13095_v9  ;;  %v6398_v46 = vpop.f32.mrb[25].mxu0  ;;  %12046 = vtanh.f32 %v9981_v38 }
 0x490   : > { %v12023_v40 = vpop.eup %12022  ;;  %8058 = vmatmul.mubr.bf16.gmra.mrb[44].mxu1 %v7623_v31  ;;  %v7528_v47 = vpop.f32.mrb[25].mxu1  ;;  %v9951_v49 = vadd.f32 %v6398_v46, %v13097_v10  ;;  %12048 = vtanh.f32 %v9950_v44 }
 0x491   : > { %v12025_v43 = vpop.eup %12024  ;;  %v9983_v50 = vadd.f32 %v7528_v47, %v13099_v11  ;;  %v6400_v51 = vpop.f32.mrb[26].mxu0  ;;  %12050 = vtanh.f32 %v9982_v45 }
 0x492   : > { %v12027_v48 = vpop.eup %12026  ;;  %v7530_v52 = vpop.f32.mrb[26].mxu1  ;;  %v7625_v53 = vpack.c.bf16 %v12025_v43, %v12017_v34  ;;  %v9952_v55 = vadd.f32 %v6400_v51, %v13093_v8  ;;  %12052 = vtanh.f32 %v9951_v49 }
 0x493   : > { %v12029_v54 = vpop.eup %12028  ;;  %v6402_v56 = vpop.f32.mrb[27].mxu0  ;;  %v7627_v58 = vpack.c.bf16 %v12027_v48, %v12019_v37  ;;  %v9984_v60 = vadd.f32 %v7530_v52, %v13095_v9  ;;  %12054 = vtanh.f32 %v9983_v50 }
 0x494   : > { %v7532_v57 = vpop.f32.mrb[27].mxu1  ;;  %v12031_v59 = vpop.eup %12030  ;;  %v7626_v61 = vpack.c.bf16 %v12029_v54, %v12021_v39  ;;  %v9953_v63 = vadd.f32 %v6402_v56, %v13097_v10  ;;  %12056 = vtanh.f32 %v9952_v55  ;;  %v11939_v54 = vld [vmem:[#allocation11 + $0x18] sm:$0xff]   ;;  %v11940_v55 = vld [vmem:[#allocation11 + $0x20] sm:$0xff]   ;;  %v11941_v56 = vld [vmem:[#allocation11 + $0x28] sm:$0xff]  }
 0x495   : > { %v12033_v62 = vpop.eup %12032  ;;  %v7628_v1 = vpack.c.bf16 %v12031_v59, %v12023_v40  ;;  %v9985_v3 = vadd.f32 %v7532_v57, %v13099_v11  ;;  %12058 = vtanh.f32 %v9984_v60  ;;  %v6406_v6 = vpop.f32.mrb[28].mxu0  ;;  %v11942_v57 = vld [vmem:[#allocation11 + $0x30] sm:$0xff]   ;;  %v11944_v59 = vld [vmem:[#allocation14] sm:$0xff]  }
 0x496   : > { %v12035_v2 = vpop.eup %12034  ;;  %7968 = vmatprep.mubr.bf16.mxu0 %v7626_v61  ;;  %v7536_v7 = vpop.f32.mrb[28].mxu1  ;;  %12060 = vtanh.f32 %v9953_v63  ;;  %v9954_v13 = vadd.f32 %v6406_v6, %v13093_v8  ;;  %v11945_v60 = vld [vmem:[#allocation14 + $0x8] sm:$0xff]   ;;  %9894 = vmatprep.subr.bf16.mxu1 %v11944_v59  ;;  %v11946_v61 = vld [vmem:[#allocation14 + $0x10] sm:$0xff]  }
 0x497   : > { %v12037_v4 = vpop.eup %12036  ;;  %8065 = vmatprep.mubr.bf16.mxu1 %v7628_v1  ;;  %7969 = vmatmul.mubr.bf16.gmra.mrb[48].mxu0 %v7625_v53  ;;  %v9986_v14 = vadd.f32 %v7536_v7, %v13095_v9  ;;  %v6408_v15 = vpop.f32.mrb[29].mxu0  ;;  %12062 = vtanh.f32 %v9985_v3  ;;  %v11938_v53 = vld [vmem:[#allocation11 + $0x10] sm:$0xff]   ;;  %v13166_v1 = vld [vmem:[#allocation10] ss:$0 sm:$0xff] }
 0x498   : > { %v12039_v5 = vpop.eup %12038  ;;  %8066 = vmatmul.mubr.bf16.gmra.mrb[48].mxu1 %v7627_v58  ;;  %v7538_v16 = vpop.f32.mrb[29].mxu1  ;;  %v9955_v18 = vadd.f32 %v6408_v15, %v13097_v10  ;;  %12064 = vtanh.f32 %v9954_v13  ;;  %9866 = vmatprep.subr.bf16.mxu0 %v11938_v53  ;;  %v11943_v58 = vld [vmem:[#allocation11 + $0x38] sm:$0xff]  }
 0x499   : > { %v12041_v12 = vpop.eup %12040  ;;  %v9987_v19 = vadd.f32 %v7538_v16, %v13099_v11  ;;  %v6410_v20 = vpop.f32.mrb[30].mxu0  ;;  %12066 = vtanh.f32 %v9986_v14  ;;  %9867 = vmatpush3.bf16.msra.mxu0 %v11938_v53  ;;  %9895 = vmatpush3.bf16.msra.mxu1 %v11944_v59 }
 0x49a   : > { %v12043_v17 = vpop.eup %12042  ;;  %v7540_v21 = vpop.f32.mrb[30].mxu1  ;;  %v7629_v22 = vpack.c.bf16 %v12041_v12, %v12033_v62  ;;  %v9956_v24 = vadd.f32 %v6410_v20, %v13093_v8  ;;  %12068 = vtanh.f32 %v9955_v18  ;;  %9868 = vmatprep.subr.bf16.mxu0 %v11939_v54  ;;  %9896 = vmatprep.subr.bf16.mxu1 %v11945_v60 }
 0x49b   : > { %v12045_v23 = vpop.eup %12044  ;;  %v6412_v25 = vpop.f32.mrb[31].mxu0  ;;  %v7631_v27 = vpack.c.bf16 %v12043_v17, %v12035_v2  ;;  %v9988_v29 = vadd.f32 %v7540_v21, %v13095_v9  ;;  %12070 = vtanh.f32 %v9987_v19 }
 0x49c   : > { %v7542_v26 = vpop.f32.mrb[31].mxu1  ;;  %v12047_v28 = vpop.eup %12046  ;;  %v7630_v30 = vpack.c.bf16 %v12045_v23, %v12037_v4  ;;  %v9957_v0 = vadd.f32 %v6412_v25, %v13097_v10  ;;  %12072 = vtanh.f32 %v9956_v24 }
 0x49d   : > { %v12049_v31 = vpop.eup %12048  ;;  %v7632_v32 = vpack.c.bf16 %v12047_v28, %v12039_v5  ;;  %v9989_v34 = vadd.f32 %v7542_v26, %v13099_v11  ;;  %12074 = vtanh.f32 %v9988_v29  ;;  %9869 = vmatpush3.bf16.msra.mxu0 %v11939_v54  ;;  %9897 = vmatpush3.bf16.msra.mxu1 %v11945_v60 }
 0x49e   : > { %v12051_v33 = vpop.eup %12050  ;;  %7976 = vmatprep.mubr.bf16.mxu0 %v7630_v30  ;;  %12076 = vtanh.f32 %v9957_v0  ;;  %9870 = vmatprep.subr.bf16.mxu0 %v11940_v55 }
 0x49f   : > { %v12053_v35 = vpop.eup %12052  ;;  %8073 = vmatprep.mubr.bf16.mxu1 %v7632_v32  ;;  %7977 = vmatmul.mubr.bf16.gmra.mrb[52].mxu0 %v7629_v22  ;;  %12078 = vtanh.f32 %v9989_v34 }
 0x4a0   : > { %v12055_v8 = vpop.eup %12054  ;;  %8074 = vmatmul.mubr.bf16.gmra.mrb[52].mxu1 %v7631_v27  ;;  %9898 = vmatprep.subr.bf16.mxu1 %v11946_v61 }
 0x4a1   : > { %v12057_v36 = vpop.eup %12056  ;;  %9871 = vmatpush3.bf16.msra.mxu0 %v11940_v55  ;;  %9899 = vmatpush3.bf16.msra.mxu1 %v11946_v61 }
 0x4a2   : > { %v12059_v9 = vpop.eup %12058  ;;  %v7633_v37 = vpack.c.bf16 %v12057_v36, %v12049_v31  ;;  %9872 = vmatprep.subr.bf16.mxu0 %v11941_v56 }
 0x4a3   : > { %v12061_v38 = vpop.eup %12060  ;;  %v7635_v10 = vpack.c.bf16 %v12059_v9, %v12051_v33 }
 0x4a4   : > { %v12063_v39 = vpop.eup %12062  ;;  %v7634_v40 = vpack.c.bf16 %v12061_v38, %v12053_v35 }
 0x4a5   : > { %v12065_v41 = vpop.eup %12064  ;;  %v7636_v42 = vpack.c.bf16 %v12063_v39, %v12055_v8  ;;  %9873 = vmatpush3.bf16.msra.mxu0 %v11941_v56 }
 0x4a6   : > { %v12067_v11 = vpop.eup %12066  ;;  %7984 = vmatprep.mubr.bf16.mxu0 %v7634_v40  ;;  %9874 = vmatprep.subr.bf16.mxu0 %v11942_v57 }
 0x4a7   : > { %v12069_v43 = vpop.eup %12068  ;;  %8081 = vmatprep.mubr.bf16.mxu1 %v7636_v42  ;;  %7985 = vmatmul.mubr.bf16.gmra.mrb[56].mxu0 %v7633_v37 }
 0x4a8   : > { %v12071_v44 = vpop.eup %12070  ;;  %8082 = vmatmul.mubr.bf16.gmra.mrb[56].mxu1 %v7635_v10 }
 0x4a9   : > { %v12073_v45 = vpop.eup %12072  ;;  %9875 = vmatpush3.bf16.msra.mxu0 %v11942_v57 }
 0x4aa   : > { %v12075_v46 = vpop.eup %12074  ;;  %v7637_v47 = vpack.c.bf16 %v12073_v45, %v12065_v41  ;;  %9876 = vmatprep.subr.bf16.mxu0 %v11943_v58 }
 0x4ab   : > { %v12077_v48 = vpop.eup %12076  ;;  %v7639_v49 = vpack.c.bf16 %v12075_v46, %v12067_v11 }
 0x4ac   : > { %v12079_v50 = vpop.eup %12078  ;;  %v7638_v51 = vpack.c.bf16 %v12077_v48, %v12069_v43 }
 0x4ad   : > { %v7640_v52 = vpack.c.bf16 %v12079_v50, %v12071_v44  ;;  %9877 = vmatpush3.bf16.msra.mxu0 %v11943_v58 }
 0x4ae   : > { %7992 = vmatprep.mubr.bf16.mxu0 %v7638_v51 }
 0x4af   : > { %8089 = vmatprep.mubr.bf16.mxu1 %v7640_v52  ;;  %7993 = vmatmul.mubr.bf16.gmra.mrb[60].mxu0 %v7637_v47 }
 0x4b0   : > { %8090 = vmatmul.mubr.bf16.gmra.mrb[60].mxu1 %v7639_v49 }
 0x548   : > { %v9718_v62 = vpop.f32.mrb[32].mxu0 }
 0x549   : > { %v9719_v2 = vpop.f32.mrb[33].mxu0 }
 0x54a   : > { %v9782_v63 = vpop.f32.mrb[32].mxu1  ;;  %v9720_v3 = vadd.f32 %v9719_v2, %v9718_v62  ;;  %v9721_v5 = vpop.f32.mrb[34].mxu0 }
 0x54b   : > { %v9783_v4 = vpop.f32.mrb[33].mxu1  ;;  %v9722_v12 = vpop.f32.mrb[35].mxu0 }
 0x54c   : > { %v9784_v6 = vadd.f32 %v9783_v4, %v9782_v63  ;;  %v9785_v7 = vpop.f32.mrb[34].mxu1  ;;  %v7939_v13 = vadd.f32 %v9720_v3, %v13166_v1  ;;  %v9723_v14 = vadd.f32 %v9722_v12, %v9721_v5 }
 0x54d   : > { %v9786_v15 = vpop.f32.mrb[35].mxu1 }
 0x54e   : > { %v9787_v16 = vadd.f32 %v9786_v15, %v9785_v7  ;;  %v8036_v17 = vadd.f32 %v9784_v6, %v7939_v13  ;;  %v7942_v18 = vadd.f32 %v9723_v14, %v13166_v1 }
 0x550   : > { %v8039_v19 = vadd.f32 %v9787_v16, %v7942_v18  ;;  %12080 = vtanh.f32 %v8036_v17 }
 0x551   : > { %v9724_v20 = vpop.f32.mrb[36].mxu0 }
 0x552   : > { %v9725_v22 = vpop.f32.mrb[37].mxu0  ;;  %12082 = vtanh.f32 %v8039_v19 }
 0x553   : > { %v9788_v21 = vpop.f32.mrb[36].mxu1  ;;  %v9726_v23 = vadd.f32 %v9725_v22, %v9724_v20  ;;  %v9727_v25 = vpop.f32.mrb[38].mxu0 }
 0x554   : > { %v9789_v24 = vpop.f32.mrb[37].mxu1  ;;  %v9728_v28 = vpop.f32.mrb[39].mxu0 }
 0x555   : > { %v9790_v26 = vadd.f32 %v9789_v24, %v9788_v21  ;;  %v9791_v27 = vpop.f32.mrb[38].mxu1  ;;  %v7947_v29 = vadd.f32 %v9726_v23, %v13166_v1  ;;  %v9729_v30 = vadd.f32 %v9728_v28, %v9727_v25 }
 0x556   : > { %v9792_v31 = vpop.f32.mrb[39].mxu1 }
 0x557   : > { %v9793_v0 = vadd.f32 %v9792_v31, %v9791_v27  ;;  %v8044_v32 = vadd.f32 %v9790_v26, %v7947_v29  ;;  %v7950_v33 = vadd.f32 %v9729_v30, %v13166_v1 }
 0x559   : > { %v8047_v34 = vadd.f32 %v9793_v0, %v7950_v33  ;;  %12084 = vtanh.f32 %v8044_v32 }
 0x55a   : > { %v9730_v35 = vpop.f32.mrb[40].mxu0  ;;  %v12081_v10 = vpop.eup %12080 }
 0x55b   : > { %v9794_v8 = vpop.f32.mrb[40].mxu1  ;;  %v9731_v36 = vpop.f32.mrb[41].mxu0  ;;  %12086 = vtanh.f32 %v8047_v34 }
 0x55c   : > { %v9732_v9 = vadd.f32 %v9731_v36, %v9730_v35  ;;  %v9795_v37 = vpop.f32.mrb[41].mxu1  ;;  %v9733_v38 = vpop.f32.mrb[42].mxu0 }
 0x55d   : > { %v9796_v39 = vadd.f32 %v9795_v37, %v9794_v8  ;;  %v9797_v40 = vpop.f32.mrb[42].mxu1  ;;  %v9734_v41 = vpop.f32.mrb[43].mxu0 }
 0x55e   : > { %v12083_v42 = vpop.eup %12082  ;;  %v7955_v11 = vadd.f32 %v9732_v9, %v13166_v1  ;;  %v9735_v43 = vadd.f32 %v9734_v41, %v9733_v38  ;;  %v9798_v44 = vpop.f32.mrb[43].mxu1 }
 0x55f   : > { %v9799_v45 = vadd.f32 %v9798_v44, %v9797_v40  ;;  %v8114_v46 = vpack.c.bf16 %v12083_v42, %v12081_v10 }
 0x560   : > { %v8052_v47 = vadd.f32 %v9796_v39, %v7955_v11  ;;  %v7958_v48 = vadd.f32 %v9735_v43, %v13166_v1 }
 0x561   : > { %9878 = vmatprep.mubr.bf16.mxu0 %v8114_v46 }
 0x562   : > { %v8055_v49 = vadd.f32 %v9799_v45, %v7958_v48  ;;  %v9736_v50 = vpop.f32.mrb[44].mxu0  ;;  %12088 = vtanh.f32 %v8052_v47 }
 0x563   : > { %v9800_v51 = vpop.f32.mrb[44].mxu1  ;;  %v9737_v52 = vpop.f32.mrb[45].mxu0 }
 0x564   : > { %12090 = vtanh.f32 %v8055_v49  ;;  %v9738_v53 = vadd.f32 %v9737_v52, %v9736_v50  ;;  %v9801_v54 = vpop.f32.mrb[45].mxu1  ;;  %v9739_v55 = vpop.f32.mrb[46].mxu0 }
 0x565   : > { %v12085_v56 = vpop.eup %12084  ;;  %v9802_v57 = vadd.f32 %v9801_v54, %v9800_v51  ;;  %v9803_v58 = vpop.f32.mrb[46].mxu1 }
 0x566   : > { %v9740_v59 = vpop.f32.mrb[47].mxu0  ;;  %v12087_v60 = vpop.eup %12086  ;;  %v7963_v61 = vadd.f32 %v9738_v53, %v13166_v1 }
 0x567   : > { %v9741_v62 = vadd.f32 %v9740_v59, %v9739_v55  ;;  %v9804_v63 = vpop.f32.mrb[47].mxu1  ;;  %v8115_v3 = vpack.c.bf16 %v12087_v60, %v12085_v56 }
 0x568   : > { %v9805_v2 = vadd.f32 %v9804_v63, %v9803_v58  ;;  %v8060_v4 = vadd.f32 %v9802_v57, %v7963_v61 }
 0x569   : > { %v7966_v5 = vadd.f32 %v9741_v62, %v13166_v1  ;;  %9879 = vmatmul.mubr.bf16.vlgmr.msra.gmra.mrb[64].mxu0 %v8115_v3 }
 0x56a   : > { %v9742_v7 = vpop.f32.mrb[48].mxu0  ;;  %12092 = vtanh.f32 %v8060_v4 }
 0x56b   : > { %v8063_v6 = vadd.f32 %v9805_v2, %v7966_v5  ;;  %v9806_v12 = vpop.f32.mrb[48].mxu1  ;;  %v9743_v13 = vpop.f32.mrb[49].mxu0 }
 0x56c   : > { %v9744_v14 = vadd.f32 %v9743_v13, %v9742_v7  ;;  %v9807_v15 = vpop.f32.mrb[49].mxu1  ;;  %v9745_v16 = vpop.f32.mrb[50].mxu0 }
 0x56d   : > { %12094 = vtanh.f32 %v8063_v6  ;;  %v12089_v17 = vpop.eup %12088  ;;  %v9808_v18 = vadd.f32 %v9807_v15, %v9806_v12  ;;  %v9809_v19 = vpop.f32.mrb[50].mxu1 }
 0x56e   : > { %v9746_v20 = vpop.f32.mrb[51].mxu0  ;;  %v12091_v21 = vpop.eup %12090  ;;  %v7971_v22 = vadd.f32 %v9744_v14, %v13166_v1 }
 0x56f   : > { %v9747_v23 = vadd.f32 %v9746_v20, %v9745_v16  ;;  %v9810_v24 = vpop.f32.mrb[51].mxu1  ;;  %v8116_v26 = vpack.c.bf16 %v12091_v21, %v12089_v17 }
 0x570   : > { %v9811_v25 = vadd.f32 %v9810_v24, %v9809_v19  ;;  %v8068_v27 = vadd.f32 %v9808_v18, %v7971_v22 }
 0x571   : > { %v7974_v28 = vadd.f32 %v9747_v23, %v13166_v1  ;;  %9882 = vmatprep.mubr.bf16.mxu0 %v8116_v26 }
 0x572   : > { %v9748_v30 = vpop.f32.mrb[52].mxu0  ;;  %12096 = vtanh.f32 %v8068_v27 }
 0x573   : > { %v8071_v29 = vadd.f32 %v9811_v25, %v7974_v28  ;;  %v9812_v31 = vpop.f32.mrb[52].mxu1  ;;  %v9749_v0 = vpop.f32.mrb[53].mxu0 }
 0x574   : > { %v9750_v32 = vadd.f32 %v9749_v0, %v9748_v30  ;;  %v9813_v33 = vpop.f32.mrb[53].mxu1  ;;  %v9751_v34 = vpop.f32.mrb[54].mxu0  ;;  %v11947_v30 = vld [vmem:[#allocation14 + $0x18] sm:$0xff]   ;;  %v11949_v0 = vld [vmem:[#allocation14 + $0x28] sm:$0xff]  }
 0x575   : > { %12098 = vtanh.f32 %v8071_v29  ;;  %v12093_v35 = vpop.eup %12092  ;;  %v9814_v8 = vadd.f32 %v9813_v33, %v9812_v31  ;;  %v9815_v36 = vpop.f32.mrb[54].mxu1  ;;  %9900 = vmatprep.subr.bf16.mxu1 %v11947_v30  ;;  %v11948_v31 = vld [vmem:[#allocation14 + $0x20] sm:$0xff]   ;;  %v13184_v33 = vld [vmem:[#allocation13] ss:$0 sm:$0xff] }
 0x576   : > { %v9752_v9 = vpop.f32.mrb[55].mxu0  ;;  %v7979_v38 = vadd.f32 %v9750_v32, %v13166_v1  ;;  %v9816_v39 = vpop.f32.mrb[55].mxu1  ;;  %9901 = vmatpush3.bf16.msra.mxu1 %v11947_v30  ;;  %v11951_v32 = vld [vmem:[#allocation14 + $0x38] sm:$0xff]  }
 0x577   : > { %v12095_v37 = vpop.eup %12094  ;;  %v9753_v10 = vadd.f32 %v9752_v9, %v9751_v34  ;;  %v9817_v40 = vadd.f32 %v9816_v39, %v9815_v36  ;;  %9902 = vmatprep.subr.bf16.mxu1 %v11948_v31 }
 0x578   : > { %v8117_v41 = vpack.c.bf16 %v12095_v37, %v12093_v35  ;;  %v8076_v42 = vadd.f32 %v9814_v8, %v7979_v38 }
 0x579   : > { %v7982_v11 = vadd.f32 %v9753_v10, %v13166_v1 }
 0x57a   : > { %9883 = vmatmul.mubr.bf16.gmra.mrb[68].mxu0 %v8117_v41  ;;  %v9754_v44 = vpop.f32.mrb[56].mxu0  ;;  %12100 = vtanh.f32 %v8076_v42  ;;  %9903 = vmatpush3.bf16.msra.mxu1 %v11948_v31 }
 0x57b   : > { %v8079_v43 = vadd.f32 %v9817_v40, %v7982_v11  ;;  %v9818_v45 = vpop.f32.mrb[56].mxu1  ;;  %v9755_v46 = vpop.f32.mrb[57].mxu0  ;;  %9904 = vmatprep.subr.bf16.mxu1 %v11949_v0 }
 0x57c   : > { %v9756_v47 = vadd.f32 %v9755_v46, %v9754_v44  ;;  %v9819_v48 = vpop.f32.mrb[57].mxu1  ;;  %v9757_v49 = vpop.f32.mrb[58].mxu0 }
 0x57d   : > { %12102 = vtanh.f32 %v8079_v43  ;;  %v12097_v50 = vpop.eup %12096  ;;  %v9820_v51 = vadd.f32 %v9819_v48, %v9818_v45  ;;  %v9821_v52 = vpop.f32.mrb[58].mxu1 }
 0x57e   : > { %v9758_v53 = vpop.f32.mrb[59].mxu0  ;;  %v7987_v55 = vadd.f32 %v9756_v47, %v13166_v1  ;;  %v9822_v57 = vpop.f32.mrb[59].mxu1  ;;  %9905 = vmatpush3.bf16.msra.mxu1 %v11949_v0 }
 0x57f   : > { %v12099_v54 = vpop.eup %12098  ;;  %v9759_v56 = vadd.f32 %v9758_v53, %v9757_v49  ;;  %v9823_v58 = vadd.f32 %v9822_v57, %v9821_v52 }
 0x580   : > { %v8118_v59 = vpack.c.bf16 %v12099_v54, %v12097_v50  ;;  %v8084_v60 = vadd.f32 %v9820_v51, %v7987_v55 }
 0x581   : > { %v7990_v61 = vadd.f32 %v9759_v56, %v13166_v1 }
 0x582   : > { %9886 = vmatprep.mubr.bf16.mxu0 %v8118_v59  ;;  %v9760_v63 = vpop.f32.mrb[60].mxu0  ;;  %12104 = vtanh.f32 %v8084_v60 }
 0x583   : > { %v8087_v62 = vadd.f32 %v9823_v58, %v7990_v61  ;;  %v9824_v2 = vpop.f32.mrb[60].mxu1  ;;  %v9761_v3 = vpop.f32.mrb[61].mxu0 }
 0x584   : > { %v9762_v4 = vadd.f32 %v9761_v3, %v9760_v63  ;;  %v9825_v5 = vpop.f32.mrb[61].mxu1  ;;  %v9763_v6 = vpop.f32.mrb[62].mxu0 }
 0x585   : > { %12106 = vtanh.f32 %v8087_v62  ;;  %v12101_v7 = vpop.eup %12100  ;;  %v9826_v12 = vadd.f32 %v9825_v5, %v9824_v2  ;;  %v9827_v13 = vpop.f32.mrb[62].mxu1 }
 0x586   : > { %v9764_v14 = vpop.f32.mrb[63].mxu0  ;;  %v7995_v16 = vadd.f32 %v9762_v4, %v13166_v1  ;;  %v9828_v18 = vpop.f32.mrb[63].mxu1 }
 0x587   : > { %v12103_v15 = vpop.eup %12102  ;;  %v9765_v17 = vadd.f32 %v9764_v14, %v9763_v6  ;;  %v9829_v19 = vadd.f32 %v9828_v18, %v9827_v13 }
 0x588   : > { %v8119_v20 = vpack.c.bf16 %v12103_v15, %v12101_v7  ;;  %v8092_v21 = vadd.f32 %v9826_v12, %v7995_v16 }
 0x589   : > { %v7998_v22 = vadd.f32 %v9765_v17, %v13166_v1  ;;  %v11950_v1 = vld [vmem:[#allocation14 + $0x30] sm:$0xff]  }
 0x58a   : > { %9887 = vmatmul.mubr.bf16.gmra.mrb[72].mxu0 %v8119_v20  ;;  %12108 = vtanh.f32 %v8092_v21  ;;  %9906 = vmatprep.subr.bf16.mxu1 %v11950_v1 }
 0x58b   : > { %v8095_v23 = vadd.f32 %v9829_v19, %v7998_v22  ;;  %9907 = vmatpush3.bf16.msra.mxu1 %v11950_v1 }
 0x58c   : > { %v12105_v24 = vpop.eup %12104  ;;  %9908 = vmatprep.subr.bf16.mxu1 %v11951_v32 }
 0x58d   : > { %12110 = vtanh.f32 %v8095_v23 }
 0x58f   : > { %v12107_v25 = vpop.eup %12106  ;;  %9909 = vmatpush3.bf16.msra.mxu1 %v11951_v32 }
 0x590   : > { %v8120_v26 = vpack.c.bf16 %v12107_v25, %v12105_v24 }
 0x592   : > { %9890 = vmatprep.mubr.bf16.mxu0 %v8120_v26 }
 0x594   : > { %v12109_v27 = vpop.eup %12108 }
 0x597   : > { %v12111_v28 = vpop.eup %12110 }
 0x598   : > { %v8121_v29 = vpack.c.bf16 %v12111_v28, %v12109_v27  ;;  %v9687_v28 = vld [vmem:[#allocation16] ss:$0 sm:$0xff] }
 0x59a   : > { %9891 = vmatmul.mubr.bf16.gmra.mrb[76].mxu0 %v8121_v29 }
 0x63c   : > { %v9880_v34 = vpop.f32.mrb[64].mxu0 }
 0x63d   : > { %v8236_v35 = vadd.f32 %v9880_v34, %v13184_v33  ;;  %v8227_v8 = vpop.f32.mrb[65].mxu0 }
 0x63e   : > { %v8228_v36 = vadd.f32 %v13184_v33, %v8227_v8  ;;  %v9881_v9 = vpop.f32.mrb[66].mxu0 }
 0x63f   : > { %12112 = vtanh.f32 %v8236_v35  ;;  %v8239_v37 = vadd.f32 %v9881_v9, %v13184_v33  ;;  %v8230_v38 = vpop.f32.mrb[67].mxu0 }
 0x640   : > { %12114 = vtanh.f32 %v8228_v36  ;;  %v8231_v10 = vadd.f32 %v13184_v33, %v8230_v38 }
 0x641   : > { %12116 = vtanh.f32 %v8239_v37 }
 0x642   : > { %12118 = vtanh.f32 %v8231_v10 }
 0x649   : > { %v12113_v39 = vpop.eup %12112 }
 0x64a   : > { %v12115_v40 = vpop.eup %12114 }
 0x64b   : > { %v12117_v41 = vpop.eup %12116 }
 0x64c   : > { %v12119_v42 = vpop.eup %12118  ;;  %v8307_v43 = vpack.c.bf16 %v12117_v41, %v12113_v39 }
 0x64d   : > { %v9884_v11 = vpop.f32.mrb[68].mxu0  ;;  %v8306_v46 = vpack.c.bf16 %v12119_v42, %v12115_v40 }
 0x64e   : > { %v8252_v44 = vadd.f32 %v9884_v11, %v13184_v33  ;;  %v8243_v45 = vpop.f32.mrb[69].mxu0 }
 0x64f   : > { %v8244_v47 = vadd.f32 %v13184_v33, %v8243_v45  ;;  %v9885_v48 = vpop.f32.mrb[70].mxu0  ;;  %9910 = vmatprep.mubr.bf16.mxu1 %v8306_v46 }
 0x650   : > { %12120 = vtanh.f32 %v8252_v44  ;;  %v8255_v49 = vadd.f32 %v9885_v48, %v13184_v33  ;;  %v8246_v50 = vpop.f32.mrb[71].mxu0  ;;  %9911 = vmatmul.mubr.bf16.vlgmr.msra.gmra.mrb[64].mxu1 %v8307_v43 }
 0x651   : > { %12122 = vtanh.f32 %v8244_v47  ;;  %v8247_v51 = vadd.f32 %v13184_v33, %v8246_v50 }
 0x652   : > { %12124 = vtanh.f32 %v8255_v49 }
 0x653   : > { %12126 = vtanh.f32 %v8247_v51 }
 0x65a   : > { %v12121_v52 = vpop.eup %12120 }
 0x65b   : > { %v12123_v53 = vpop.eup %12122 }
 0x65c   : > { %v12125_v54 = vpop.eup %12124 }
 0x65d   : > { %v12127_v55 = vpop.eup %12126  ;;  %v9888_v56 = vpop.f32.mrb[72].mxu0  ;;  %v8309_v57 = vpack.c.bf16 %v12125_v54, %v12121_v52 }
 0x65e   : > { %v8268_v58 = vadd.f32 %v9888_v56, %v13184_v33  ;;  %v8259_v59 = vpop.f32.mrb[73].mxu0  ;;  %v8308_v60 = vpack.c.bf16 %v12127_v55, %v12123_v53 }
 0x65f   : > { %v8260_v61 = vadd.f32 %v13184_v33, %v8259_v59  ;;  %v9889_v62 = vpop.f32.mrb[74].mxu0 }
 0x660   : > { %12128 = vtanh.f32 %v8268_v58  ;;  %v8271_v63 = vadd.f32 %v9889_v62, %v13184_v33  ;;  %v8262_v2 = vpop.f32.mrb[75].mxu0  ;;  %9914 = vmatprep.mubr.bf16.mxu1 %v8308_v60 }
 0x661   : > { %12130 = vtanh.f32 %v8260_v61  ;;  %v8263_v3 = vadd.f32 %v13184_v33, %v8262_v2  ;;  %9915 = vmatmul.mubr.bf16.gmra.mrb[68].mxu1 %v8309_v57 }
 0x662   : > { %12132 = vtanh.f32 %v8271_v63 }
 0x663   : > { %12134 = vtanh.f32 %v8263_v3 }
 0x66a   : > { %v12129_v4 = vpop.eup %12128 }
 0x66b   : > { %v12131_v5 = vpop.eup %12130 }
 0x66c   : > { %v12133_v6 = vpop.eup %12132 }
 0x66d   : > { %v12135_v7 = vpop.eup %12134  ;;  %v9892_v12 = vpop.f32.mrb[76].mxu0  ;;  %v8311_v13 = vpack.c.bf16 %v12133_v6, %v12129_v4 }
 0x66e   : > { %v8284_v14 = vadd.f32 %v9892_v12, %v13184_v33  ;;  %v8275_v15 = vpop.f32.mrb[77].mxu0  ;;  %v8310_v16 = vpack.c.bf16 %v12135_v7, %v12131_v5 }
 0x66f   : > { %v8276_v17 = vadd.f32 %v13184_v33, %v8275_v15  ;;  %v9893_v18 = vpop.f32.mrb[78].mxu0 }
 0x670   : > { %12136 = vtanh.f32 %v8284_v14  ;;  %v8287_v19 = vadd.f32 %v9893_v18, %v13184_v33  ;;  %v8278_v20 = vpop.f32.mrb[79].mxu0  ;;  %9918 = vmatprep.mubr.bf16.mxu1 %v8310_v16 }
 0x671   : > { %12138 = vtanh.f32 %v8276_v17  ;;  %v8279_v21 = vadd.f32 %v13184_v33, %v8278_v20  ;;  %9919 = vmatmul.mubr.bf16.gmra.mrb[72].mxu1 %v8311_v13 }
 0x672   : > { %12140 = vtanh.f32 %v8287_v19 }
 0x673   : > { %12142 = vtanh.f32 %v8279_v21 }
 0x67a   : > { %v12137_v22 = vpop.eup %12136 }
 0x67b   : > { %v12139_v23 = vpop.eup %12138 }
 0x67c   : > { %v12141_v24 = vpop.eup %12140 }
 0x67d   : > { %v12143_v25 = vpop.eup %12142  ;;  %v8313_v26 = vpack.c.bf16 %v12141_v24, %v12137_v22 }
 0x67e   : > { %v8312_v27 = vpack.c.bf16 %v12143_v25, %v12139_v23 }
 0x680   : > { %9922 = vmatprep.mubr.bf16.mxu1 %v8312_v27 }
 0x681   : > { %9923 = vmatmul.mubr.bf16.gmra.mrb[76].mxu1 %v8313_v26 }
 0x723   : > { %v9912_v29 = vpop.f32.mrb[64].mxu1 }
 0x724   : > { %v8428_v30 = vadd.f32 %v9912_v29, %v9687_v28  ;;  %v8419_v31 = vpop.f32.mrb[65].mxu1 }
 0x725   : > { %v8420_v0 = vadd.f32 %v9687_v28, %v8419_v31  ;;  %v9913_v1 = vpop.f32.mrb[66].mxu1 }
 0x726   : > { %8486 = vmax.xlane.f32.xlu1 %v8428_v30  ;;  %v8422_v32 = vpop.f32.mrb[67].mxu1  ;;  %v8431_v33 = vadd.f32 %v9913_v1, %v9687_v28 }
 0x727   : > { %8482 = vmax.xlane.f32.xlu0 %v8420_v0  ;;  %v8423_v34 = vadd.f32 %v9687_v28, %v8422_v32 }
 0x72a   : > { %8488 = vmax.xlane.f32.xlu1 %v8431_v33 }
 0x72b   : > { %8484 = vmax.xlane.f32.xlu0 %v8423_v34 }
 0x734   : > { %v9916_v35 = vpop.f32.mrb[68].mxu1 }
 0x735   : > { %v8444_v8 = vadd.f32 %v9916_v35, %v9687_v28  ;;  %v8435_v36 = vpop.f32.mrb[69].mxu1 }
 0x736   : > { %v9917_v9 = vpop.f32.mrb[70].mxu1  ;;  %v13202_v10 = vadd.f32 %v9687_v28, %v8435_v36 }
 0x737   : > { %v8447_v37 = vadd.f32 %v9917_v9, %v9687_v28  ;;  %v8438_v38 = vpop.f32.mrb[71].mxu1  ;;  %8494 = vmax.xlane.f32.xlu0 %v8444_v8 }
 0x738   : > { %v13204_v39 = vadd.f32 %v9687_v28, %v8438_v38 }
 0x739   : > { %8496 = vmax.xlane.f32.xlu1 %v8447_v37 }
 0x73b   : > { %8490 = vmax.xlane.f32.xlu0 %v13202_v10 }
 0x73d   : > { %8492 = vmax.xlane.f32.xlu1 %v13204_v39 }
 0x744   : > { %v9920_v40 = vpop.f32.mrb[72].mxu1 }
 0x745   : > { %v13208_v41 = vadd.f32 %v9920_v40, %v9687_v28  ;;  %v8451_v42 = vpop.f32.mrb[73].mxu1 }
 0x746   : > { %v9921_v11 = vpop.f32.mrb[74].mxu1  ;;  %v13213_v45 = vadd.f32 %v9687_v28, %v8451_v42 }
 0x747   : > { %v13210_v43 = vadd.f32 %v9921_v11, %v9687_v28  ;;  %v8454_v44 = vpop.f32.mrb[75].mxu1  ;;  %8502 = vmax.xlane.f32.xlu0 %v13208_v41 }
 0x748   : > { %v13216_v46 = vadd.f32 %v9687_v28, %v8454_v44 }
 0x749   : > { %8504 = vmax.xlane.f32.xlu1 %v13210_v43 }
 0x74b   : > { %8498 = vmax.xlane.f32.xlu0 %v13213_v45 }
 0x74d   : > { %8500 = vmax.xlane.f32.xlu1 %v13216_v46 }
 0x754   : > { %v9924_v47 = vpop.f32.mrb[76].mxu1 }
 0x755   : > { %v8467_v48 = vpop.f32.mrb[77].mxu1  ;;  %v13225_v53 = vadd.f32 %v9924_v47, %v9687_v28 }
 0x756   : > { %v13220_v49 = vadd.f32 %v9687_v28, %v8467_v48  ;;  %v9925_v50 = vpop.f32.mrb[78].mxu1 }
 0x757   : > { %v8470_v51 = vpop.f32.mrb[79].mxu1  ;;  %v13228_v54 = vadd.f32 %v9925_v50, %v9687_v28 }
 0x758   : > { %v13222_v52 = vadd.f32 %v9687_v28, %v8470_v51  ;;  %8506 = vmax.xlane.f32.xlu0 %v13220_v49 }
 0x75a   : > { %8508 = vmax.xlane.f32.xlu1 %v13222_v52 }
 0x75c   : > { %8510 = vmax.xlane.f32.xlu0 %v13225_v53 }
 0x75e   : > { %8512 = vmax.xlane.f32.xlu1 %v13228_v54 }
 0x7b3   : > { %v8487_v55 = vpop.xlane.xlu1 %8486 }
 0x7b4   : > { %v8516_v56 = vsub.f32 %v8428_v30, %v8487_v55  ;;  %v8483_v57 = vpop.xlane.xlu0 %8482 }
 0x7b5   : > { %v8514_v58 = vsub.f32 %v8420_v0, %v8483_v57 }
 0x7b6   : > { %v8534_v59 = vmul.f32 1.442695, %v8516_v56 }
 0x7b7   : > { %v8530_v60 = vmul.f32 1.442695, %v8514_v58  ;;  %v8489_v61 = vpop.xlane.xlu1 %8488 }
 0x7b8   : > { %12144 = vpow2.f32 %v8534_v59  ;;  %v8517_v62 = vsub.f32 %v8431_v33, %v8489_v61  ;;  %v8485_v63 = vpop.xlane.xlu0 %8484 }
 0x7b9   : > { %v8515_v2 = vsub.f32 %v8423_v34, %v8485_v63  ;;  %12146 = vpow2.f32 %v8530_v60 }
 0x7ba   : > { %v8536_v3 = vmul.f32 1.442695, %v8517_v62 }
 0x7bb   : > { %v8532_v4 = vmul.f32 1.442695, %v8515_v2 }
 0x7bc   : > { %12148 = vpow2.f32 %v8536_v3 }
 0x7bd   : > { %12150 = vpow2.f32 %v8532_v4 }
 0x7c2   : > { %v13232_v5 = vpop.eup %12144 }
 0x7c3   : > { %8566 = vadd.xlane.f32.xlu0 %v13232_v5  ;;  %v13235_v12 = vpop.eup %12146 }
 0x7c4   : > { %v8495_v6 = vpop.xlane.xlu0 %8494 }
 0x7c5   : > { %v8520_v7 = vsub.f32 %v8444_v8, %v8495_v6 }
 0x7c6   : > { %v8497_v13 = vpop.xlane.xlu1 %8496  ;;  %v13237_v14 = vpop.eup %12148 }
 0x7c7   : > { %v8542_v15 = vmul.f32 1.442695, %v8520_v7  ;;  %v8521_v16 = vsub.f32 %v8447_v37, %v8497_v13  ;;  %8568 = vadd.xlane.f32.xlu1 %v13237_v14  ;;  %8562 = vadd.xlane.f32.xlu0 %v13235_v12  ;;  %v13242_v21 = vpop.eup %12150 }
 0x7c8   : > { %v8491_v17 = vpop.xlane.xlu0 %8490 }
 0x7c9   : > { %12152 = vpow2.f32 %v8542_v15  ;;  %v8544_v18 = vmul.f32 1.442695, %v8521_v16  ;;  %v8518_v19 = vsub.f32 %v13202_v10, %v8491_v17 }
 0x7ca   : > { %v8493_v20 = vpop.xlane.xlu1 %8492 }
 0x7cb   : > { %12154 = vpow2.f32 %v8544_v18  ;;  %v8538_v22 = vmul.f32 1.442695, %v8518_v19  ;;  %v8519_v23 = vsub.f32 %v13204_v39, %v8493_v20  ;;  %8564 = vadd.xlane.f32.xlu1 %v13242_v21 }
 0x7cd   : > { %12156 = vpow2.f32 %v8538_v22  ;;  %v8540_v24 = vmul.f32 1.442695, %v8519_v23 }
 0x7cf   : > { %12158 = vpow2.f32 %v8540_v24 }
 0x7d3   : > { %v13246_v25 = vpop.eup %12152 }
 0x7d4   : > { %8574 = vadd.xlane.f32.xlu0 %v13246_v25  ;;  %v8503_v26 = vpop.xlane.xlu0 %8502 }
 0x7d5   : > { %v13249_v27 = vpop.eup %12154  ;;  %v8524_v28 = vsub.f32 %v13208_v41, %v8503_v26 }
 0x7d6   : > { %v8505_v29 = vpop.xlane.xlu1 %8504  ;;  %8576 = vadd.xlane.f32.xlu1 %v13249_v27 }
 0x7d7   : > { %v13253_v30 = vpop.eup %12156  ;;  %v8550_v31 = vmul.f32 1.442695, %v8524_v28  ;;  %v8525_v0 = vsub.f32 %v13210_v43, %v8505_v29 }
 0x7d8   : > { %8570 = vadd.xlane.f32.xlu0 %v13253_v30  ;;  %v8499_v1 = vpop.xlane.xlu0 %8498 }
 0x7d9   : > { %v13257_v32 = vpop.eup %12158  ;;  %12160 = vpow2.f32 %v8550_v31  ;;  %v8552_v33 = vmul.f32 1.442695, %v8525_v0  ;;  %v8522_v34 = vsub.f32 %v13213_v45, %v8499_v1 }
 0x7da   : > { %v8501_v35 = vpop.xlane.xlu1 %8500  ;;  %8572 = vadd.xlane.f32.xlu1 %v13257_v32 }
 0x7db   : > { %12162 = vpow2.f32 %v8552_v33  ;;  %v8546_v8 = vmul.f32 1.442695, %v8522_v34  ;;  %v8523_v36 = vsub.f32 %v13216_v46, %v8501_v35 }
 0x7dd   : > { %12164 = vpow2.f32 %v8546_v8  ;;  %v8548_v9 = vmul.f32 1.442695, %v8523_v36 }
 0x7df   : > { %12166 = vpow2.f32 %v8548_v9 }
 0x7e3   : > { %v13262_v37 = vpop.eup %12160 }
 0x7e4   : > { %8582 = vadd.xlane.f32.xlu0 %v13262_v37 }
 0x7e5   : > { %v13265_v38 = vpop.eup %12162  ;;  %v8507_v10 = vpop.xlane.xlu0 %8506 }
 0x7e6   : > { %v8526_v39 = vsub.f32 %v13220_v49, %v8507_v10  ;;  %8584 = vadd.xlane.f32.xlu1 %v13265_v38 }
 0x7e7   : > { %v13269_v40 = vpop.eup %12164  ;;  %v8509_v41 = vpop.xlane.xlu1 %8508 }
 0x7e8   : > { %v8554_v42 = vmul.f32 1.442695, %v8526_v39  ;;  %v8527_v11 = vsub.f32 %v13222_v52, %v8509_v41  ;;  %8578 = vadd.xlane.f32.xlu0 %v13269_v40 }
 0x7e9   : > { %v13273_v43 = vpop.eup %12166  ;;  %v8511_v44 = vpop.xlane.xlu0 %8510 }
 0x7ea   : > { %12168 = vpow2.f32 %v8554_v42  ;;  %v8556_v45 = vmul.f32 1.442695, %v8527_v11  ;;  %v8528_v46 = vsub.f32 %v13225_v53, %v8511_v44  ;;  %8580 = vadd.xlane.f32.xlu1 %v13273_v43 }
 0x7eb   : > { %v8513_v47 = vpop.xlane.xlu1 %8512 }
 0x7ec   : > { %12170 = vpow2.f32 %v8556_v45  ;;  %v8558_v48 = vmul.f32 1.442695, %v8528_v46  ;;  %v8529_v49 = vsub.f32 %v13228_v54, %v8513_v47 }
 0x7ee   : > { %12172 = vpow2.f32 %v8558_v48  ;;  %v8560_v50 = vmul.f32 1.442695, %v8529_v49 }
 0x7f0   : > { %12174 = vpow2.f32 %v8560_v50 }
 0x7f4   : > { %v13278_v51 = vpop.eup %12168 }
 0x7f5   : > { %8586 = vadd.xlane.f32.xlu0 %v13278_v51 }
 0x7f6   : > { %v13281_v52 = vpop.eup %12170 }
 0x7f7   : > { %8588 = vadd.xlane.f32.xlu1 %v13281_v52 }
 0x7f8   : > { %v13284_v53 = vpop.eup %12172 }
 0x7f9   : > { %8590 = vadd.xlane.f32.xlu0 %v13284_v53 }
 0x7fa   : > { %v13287_v55 = vpop.eup %12174 }
 0x7fb   : > { %8592 = vadd.xlane.f32.xlu1 %v13287_v55 }
 0x850   : > { %v8567_v54 = vpop.xlane.xlu0 %8566 }
 0x851   : > { %12176 = vrcp.f32 %v8567_v54 }
 0x854   : > { %v8569_v56 = vpop.xlane.xlu1 %8568  ;;  %v8563_v57 = vpop.xlane.xlu0 %8562 }
 0x855   : > { %12178 = vrcp.f32 %v8569_v56 }
 0x856   : > { %12180 = vrcp.f32 %v8563_v57 }
 0x858   : > { %v8565_v58 = vpop.xlane.xlu1 %8564 }
 0x859   : > { %12182 = vrcp.f32 %v8565_v58 }
 0x85b   : > { %v12177_v59 = vpop.eup %12176 }
 0x85c   : > { %v8628_v60 = vmul.f32 %v12177_v59, %v13232_v5 }
 0x85e   : > { %8644 = vst [vmem:[%s13292_s9 + $0x10] sm:$0xff] %v8628_v60 }
 0x85f   : > { %v12179_v61 = vpop.eup %12178 }
 0x860   : > { %v12181_v62 = vpop.eup %12180  ;;  %v8629_v63 = vmul.f32 %v12179_v61, %v13237_v14 }
 0x861   : > { %v8575_v2 = vpop.xlane.xlu0 %8574  ;;  %v8626_v3 = vmul.f32 %v12181_v62, %v13235_v12 }
 0x862   : > { %12184 = vrcp.f32 %v8575_v2  ;;  %8645 = vst [vmem:[%s13292_s9 + $0x18] sm:$0xff] %v8629_v63 }
 0x863   : > { %v8577_v4 = vpop.xlane.xlu1 %8576  ;;  %v12183_v5 = vpop.eup %12182  ;;  %8642 = vst [vmem:[%s13292_s9] sm:$0xff] %v8626_v3 }
 0x864   : > { %12186 = vrcp.f32 %v8577_v4  ;;  %v8627_v6 = vmul.f32 %v12183_v5, %v13242_v21 }
 0x865   : > { %v8571_v7 = vpop.xlane.xlu0 %8570 }
 0x866   : > { %12188 = vrcp.f32 %v8571_v7  ;;  %8643 = vst [vmem:[%s13292_s9 + $0x8] sm:$0xff] %v8627_v6 }
 0x867   : > { %v8573_v13 = vpop.xlane.xlu1 %8572 }
 0x868   : > { %12190 = vrcp.f32 %v8573_v13 }
 0x86c   : > { %v12185_v14 = vpop.eup %12184 }
 0x86d   : > { %v8632_v12 = vmul.f32 %v12185_v14, %v13246_v25 }
 0x86e   : > { %v12187_v15 = vpop.eup %12186 }
 0x86f   : > { %8648 = vst [vmem:[%s13292_s9 + $0x30] sm:$0xff] %v8632_v12  ;;  %v8633_v16 = vmul.f32 %v12187_v15, %v13249_v27 }
 0x870   : > { %v12189_v17 = vpop.eup %12188 }
 0x871   : > { %8649 = vst [vmem:[%s13292_s9 + $0x38] sm:$0xff] %v8633_v16  ;;  %v8630_v18 = vmul.f32 %v12189_v17, %v13253_v30  ;;  %v8583_v19 = vpop.xlane.xlu0 %8582 }
 0x872   : > { %v12191_v20 = vpop.eup %12190  ;;  %12192 = vrcp.f32 %v8583_v19 }
 0x873   : > { %8646 = vst [vmem:[%s13292_s9 + $0x20] sm:$0xff] %v8630_v18  ;;  %v8631_v21 = vmul.f32 %v12191_v20, %v13257_v32  ;;  %v8585_v22 = vpop.xlane.xlu1 %8584 }
 0x874   : > { %12194 = vrcp.f32 %v8585_v22 }
 0x875   : > { %8647 = vst [vmem:[%s13292_s9 + $0x28] sm:$0xff] %v8631_v21  ;;  %v8579_v23 = vpop.xlane.xlu0 %8578 }
 0x876   : > { %12196 = vrcp.f32 %v8579_v23 }
 0x877   : > { %v8581_v24 = vpop.xlane.xlu1 %8580 }
 0x878   : > { %12198 = vrcp.f32 %v8581_v24 }
 0x87c   : > { %v12193_v25 = vpop.eup %12192 }
 0x87d   : > { %v8636_v26 = vmul.f32 %v12193_v25, %v13262_v37 }
 0x87e   : > { %v12195_v27 = vpop.eup %12194 }
 0x87f   : > { %8652 = vst [vmem:[%s13292_s9 + $0x50] sm:$0xff] %v8636_v26  ;;  %v8637_v28 = vmul.f32 %v12195_v27, %v13265_v38 }
 0x880   : > { %v12197_v29 = vpop.eup %12196 }
 0x881   : > { %8653 = vst [vmem:[%s13292_s9 + $0x58] sm:$0xff] %v8637_v28  ;;  %v8634_v30 = vmul.f32 %v12197_v29, %v13269_v40 }
 0x882   : > { %v12199_v31 = vpop.eup %12198  ;;  %v8587_v0 = vpop.xlane.xlu0 %8586 }
 0x883   : > { %8650 = vst [vmem:[%s13292_s9 + $0x40] sm:$0xff] %v8634_v30  ;;  %v8635_v1 = vmul.f32 %v12199_v31, %v13273_v43  ;;  %12200 = vrcp.f32 %v8587_v0 }
 0x884   : > { %v8589_v32 = vpop.xlane.xlu1 %8588 }
 0x885   : > { %8651 = vst [vmem:[%s13292_s9 + $0x48] sm:$0xff] %v8635_v1  ;;  %12202 = vrcp.f32 %v8589_v32 }
 0x886   : > { %v8591_v33 = vpop.xlane.xlu0 %8590 }
 0x887   : > { %12204 = vrcp.f32 %v8591_v33 }
 0x888   : > { %v8593_v34 = vpop.xlane.xlu1 %8592 }
 0x889   : > { %12206 = vrcp.f32 %v8593_v34 }
 0x88d   : > { %v12201_v35 = vpop.eup %12200 }
 0x88e   : > { %v8638_v8 = vmul.f32 %v12201_v35, %v13278_v51 }
 0x88f   : > { %v12203_v36 = vpop.eup %12202 }
 0x890   : > { %8654 = vst [vmem:[%s13292_s9 + $0x60] sm:$0xff] %v8638_v8  ;;  %v8639_v9 = vmul.f32 %v12203_v36, %v13281_v52 }
 0x891   : > { %v12205_v37 = vpop.eup %12204 }
 0x892   : > { %8655 = vst [vmem:[%s13292_s9 + $0x68] sm:$0xff] %v8639_v9  ;;  %v8640_v38 = vmul.f32 %v12205_v37, %v13284_v53 }
 0x893   : > { %v12207_v10 = vpop.eup %12206 }
 0x894   : > { %8656 = vst [vmem:[%s13292_s9 + $0x70] sm:$0xff] %v8640_v38  ;;  %v8641_v39 = vmul.f32 %v12207_v10, %v13287_v55 }
 0x896   : > { %8657 = vst [vmem:[%s13292_s9 + $0x78] sm:$0xff] %v8641_v39 }
 0x897   : > { %12475 = shalt.err (!%p12472_p9)
}
 0x898   : > { %s12476_s20 = scalar_lea.hbm %s13327_s13, 2048  ;;  %s12480_s9 = scalar_lea.hbm %s13412_s22, 4096 }
 0x899   : > { %p12477_p4 = scmp.ne.s32.totalorder %s13327_s13, %s12476_s20  ;;  %p12481_p2 = scmp.lt.u32.totalorder %s13327_s13, %s13412_s22 }
 0x89a   : > { %p12482_p0 = scmp.lt.u32.totalorder %s12480_s9, %s12476_s20  ;;  %p12484_p10 = scmp.lt.u32.totalorder %s12476_s20, %s13327_s13 }
 0x89b   : > { %p12478_p3 = pnand %p12477_p4, %p13413_p1 }
 0x89c   : > { %p12483_p5 = por %p12482_p0, %p12481_p2 }
 0x89d   : > { %p12479_p6 = pneg %p12478_p3 }
 0x89e   : > { %p12485_p11 = por %p12484_p10, %p12483_p5 }
 0x8a0   : > { %p12486_p12 = pnand %p12485_p11, %p12479_p6 }
 0x8a2   : > { %12489 = shalt.err (!%p12486_p12)
}
 0x8a3   : > { %s12562_s27 = smov 128   ;;  %s12563_s2 = smov 8  }
 0x8a4   : > { %10603 = dma.vmem_to_hbm [thread:$0]  (%p13413_p1), %s13329_s29, 2048, %s13327_s13, %s8659_s15, %s12562_s27, %s12562_s27, %s12563_s2  }
 0x8a5 PF: > { %s8687_s14 = sand.u32 1, %s12532_s30   ;;  %p13414_p13 = scmp.ne.s32.totalorder %s13401_s1, 0 }
 0x8a6   : > { %p13415_p8 = scmp.ge.s32.totalorder %s12544_s12, 2  ;;  %s8688_s25 = scalar_lea.sflag [#allocation4], %s8687_s14 }
 0x8a8   : > { %p10635_p7 = pnand %p13415_p8, %p13414_p13 }
 0x8aa   : > { %12527 = dma.done.wait (!%p10635_p7), %s8688_s25, 2048  }
 0x8ab   : > { %12529 = vsyncadd (!%p10635_p7), %s8688_s25, 4294965248  ;;  %p26_p9 = scmp.ge.s32.totalorder %s12831_s19, 4   ;;  %s13416_s30 = smov %s12536_s10 }
 0x8ac   : > { %s13417_s10 = smov %s12540_s11  ;;  %s13418_s11 = smov %s12842_s18 }
 0x8ad   : > { %s13419_s12 = smov %s12831_s19  ;;  %28 = sbr.rel (!%p26_p9) target bundleno = 13 (0xd), region = 133 }
 0x8b4   :  { %8693 = vsyncpa [#allocation3], 1 }
 0x8b5   :  { %8695 = vsyncpa [#allocation3 + $0x1], 1 }
 0x8b6   :  { %8696 = vsyncpa [#allocation6], 1 }
 0x8b7   :  { %8697 = vsyncpa [#allocation9], 1 }
 0x8b8   :  { %8698 = vsyncpa [#allocation12], 1 }
 0x8b9   :  { %8699 = vsyncpa [#allocation15], 1 }
 0x8ba   :  { %8700 = vsyncpa [#allocation4], 1 }
 0x8bb   :  { %8702 = vsyncpa [#allocation4 + $0x1], 1 }

</bundles_post_ra>
